<compile_context>
chip_gen: v5e
topology: v5e:2x2
jax: 0.10.0
libtpu: 0.0.40
codegen_flags: <defaults>
</compile_context>

<pallas_src>
import functools

import jax
import jax.numpy as jnp
from jax.experimental import pallas as pl
from jax.experimental.pallas import tpu as pltpu


def _round_up(v, m):
    return (v + m - 1) // m * m


def _pick_tile_h(hout, wout, target_rows=256):
    """Smallest divisor of Hout whose tile gives >= target_rows matmul rows."""
    for t in range(1, hout + 1):
        if hout % t == 0 and t * wout >= target_rows:
            return t
    return hout


def _fireconv_kernel(x_ref, w_ref, b_ref, o_ref, *scratch, KH, KW):
    # x_ref:       (1, Hp, Wp, Cin_p)           padded NHWC image, one batch elem (bf16)
    # w_ref:       (KH*KW*Cin_p, Cout_p)        im2col-ordered weights (bf16)
    # b_ref:       (1, Cout_p)                  f32 bias
    # o_ref:       (1, TILE_H, Wout, Cout_p)    output tile
    # scratch[0]:  (TILE_H*Wout, KH*KW*Cin_p)   VMEM im2col buffer (only if KH*KW > 1)
    _, _, _, cin_p = x_ref.shape
    _, tile_h, wout, cout_p = o_ref.shape
    m = tile_h * wout

    row0 = pl.multiple_of(pl.program_id(1) * tile_h, tile_h)

    if KH == 1 and KW == 1:
        # 1x1 conv: no patch gather needed, feed the activation slice directly.
        lhs = x_ref[0, pl.ds(row0, tile_h), :, :].reshape(m, cin_p)
    else:
        patches_ref, = scratch
        # im2col: one lane-aligned, 128-wide column block per kernel tap.
        for kh in range(KH):
            for kw in range(KW):
                tap = kh * KW + kw
                patch = x_ref[0, pl.ds(row0 + kh, tile_h), kw:kw + wout, :]
                patches_ref[:, tap * cin_p:(tap + 1) * cin_p] = (
                    patch.reshape(m, cin_p))
        lhs = patches_ref[...]

    # Single MXU matmul, f32 accumulation; bias + ReLU fused, all lane-dense.
    acc = jnp.dot(lhs, w_ref[...], preferred_element_type=jnp.float32)
    acc = jnp.maximum(acc + b_ref[...], 0.0)
    o_ref[...] = acc.reshape(1, tile_h, wout, cout_p).astype(o_ref.dtype)


def fire_conv(x_nchw, weight_oikk, bias, padding, *,
              compute_dtype=jnp.bfloat16):
    """FireConv forward: Conv2d(stride=1, padding=padding) + ReLU.

    x_nchw:      (B, Cin, H, W)      -- PyTorch NCHW convention
    weight_oikk: (Cout, Cin, KH, KW) -- PyTorch Conv2d weight layout
    bias:        (Cout,)
    """
    if isinstance(padding, int):
        padding = (padding, padding)
    ph, pw = padding

    B, Cin, H, W = x_nchw.shape
    Cout, _, KH, KW = weight_oikk.shape
    Hout = H + 2 * ph - KH + 1
    Wout = W + 2 * pw - KW + 1
    Hp, Wp = H + 2 * ph, W + 2 * pw

    LANE = 128
    Cin_p = _round_up(Cin, LANE)
    Cout_p = _round_up(Cout, LANE)
    Kp = KH * KW * Cin_p

    # One fused prep pass: NCHW->NHWC, spatial zero-pad, channel pad, bf16 cast.
    x_prep = jnp.pad(jnp.transpose(x_nchw, (0, 2, 3, 1)),
                     ((0, 0), (ph, ph), (pw, pw), (0, Cin_p - Cin))
                     ).astype(compute_dtype)

    # Weights -> (KH*KW*Cin_p, Cout_p), rows ordered (kh, kw, cin) to match the
    # in-kernel im2col column layout.
    w = jnp.transpose(weight_oikk, (2, 3, 1, 0))                 # (KH,KW,Cin,Cout)
    w = jnp.pad(w, ((0, 0), (0, 0), (0, Cin_p - Cin), (0, Cout_p - Cout)))
    w = w.astype(compute_dtype).reshape(Kp, Cout_p)
    b2 = jnp.pad(bias, (0, Cout_p - Cout)).astype(jnp.float32).reshape(1, Cout_p)

    TILE_H = _pick_tile_h(Hout, Wout)
    n_ht = Hout // TILE_H

    scratch_shapes = []
    if KH * KW > 1:
        scratch_shapes.append(pltpu.VMEM((TILE_H * Wout, Kp), compute_dtype))

    kernel = functools.partial(_fireconv_kernel, KH=KH, KW=KW)

    out_nhwc = pl.pallas_call(
        kernel,
        out_shape=jax.ShapeDtypeStruct((B, Hout, Wout, Cout_p), x_nchw.dtype),
        grid_spec=pltpu.PrefetchScalarGridSpec(
            num_scalar_prefetch=0,
            grid=(B, n_ht),
            in_specs=[
                # Full padded image per batch element; block index constant
                # along the H-tile axis -> fetched once per batch element.
                pl.BlockSpec((1, Hp, Wp, Cin_p), lambda b, h: (b, 0, 0, 0)),
                # Grid-invariant weights / bias (DMA'd once).
                pl.BlockSpec((Kp, Cout_p), lambda b, h: (0, 0)),
                pl.BlockSpec((1, Cout_p), lambda b, h: (0, 0)),
            ],
            out_specs=pl.BlockSpec((1, TILE_H, Wout, Cout_p),
                                   lambda b, h: (b, h, 0, 0)),
            scratch_shapes=scratch_shapes,
        ),
        compiler_params=pltpu.CompilerParams(
            dimension_semantics=("parallel", "parallel"),
            vmem_limit_bytes=32 * 1024 * 1024),
    )(x_prep, w, b2)

    # Drop channel padding, back to PyTorch NCHW.
    return jnp.transpose(out_nhwc[..., :Cout], (0, 3, 1, 2))


def fire_unit(x, squeeze_w, squeeze_b, e1_w, e1_b, e3_w, e3_b, *,
              residual=False):
    """FireUnit forward composed of FireConv Pallas kernels (NCHW in/out)."""
    identity = x
    s = fire_conv(x, squeeze_w, squeeze_b, 0)
    y1 = fire_conv(s, e1_w, e1_b, 0)
    y2 = fire_conv(s, e3_w, e3_b, 1)
    out = jnp.concatenate([y1, y2], axis=1)
    if residual:
        out = out + identity
    return out


# ---------------------------- references (test) ----------------------------

def _ref_fireconv(x, w, b, padding, compute_dtype=jnp.bfloat16):
    if isinstance(padding, int):
        padding = (padding, padding)
    xr = x.astype(compute_dtype).astype(jnp.float32)
    wr = w.astype(compute_dtype).astype(jnp.float32)
    y = jax.lax.conv_general_dilated(
        xr, wr, window_strides=(1, 1),
        padding=((padding[0], padding[0]), (padding[1], padding[1])),
        dimension_numbers=("NCHW", "OIHW", "NCHW"),
        precision=jax.lax.Precision.HIGHEST)
    return jnp.maximum(y + b.reshape(1, -1, 1, 1), 0.0)


def _ref_fireunit(x, sw, sb, e1w, e1b, e3w, e3b, *, residual=False):
    s = _ref_fireconv(x, sw, sb, 0)
    y1 = _ref_fireconv(s, e1w, e1b, 0)
    y2 = _ref_fireconv(s, e3w, e3b, 1)
    out = jnp.concatenate([y1, y2], axis=1)
    if residual:
        out = out + x
    return out


if __name__ == "__main__":
    key = jax.random.PRNGKey(0)
    ks = jax.random.split(key, 12)

    def check(name, out, ref, atol, rtol):
        assert out.shape == ref.shape, (name, out.shape, ref.shape)
        err = float(jnp.max(jnp.abs(out - ref)))
        assert jnp.allclose(out, ref, atol=atol, rtol=rtol), (name, err)

    # (a) 3x3 FireConv (expand3x3-style), tiny channels, 16x16 image.
    B, Cin, H, W, Cout = 2, 4, 16, 16, 8
    x = jax.random.normal(ks[0], (B, Cin, H, W), dtype=jnp.float32)
    w = jax.random.normal(ks[1], (Cout, Cin, 3, 3), dtype=jnp.float32) * 0.1
    b = jax.random.normal(ks[2], (Cout,), dtype=jnp.float32) * 0.1
    out = jax.block_until_ready(fire_conv(x, w, b, 1))
    check("fireconv3x3", out, _ref_fireconv(x, w, b, 1), 2e-2, 2e-2)

    # (b) 1x1 FireConv (squeeze-style), 32x32 image -> exercises H-tiling.
    B, Cin, H, W, Cout = 2, 8, 32, 32, 16
    x = jax.random.normal(ks[3], (B, Cin, H, W), dtype=jnp.float32)
    w = jax.random.normal(ks[4], (Cout, Cin, 1, 1), dtype=jnp.float32) * 0.1
    b = jax.random.normal(ks[5], (Cout,), dtype=jnp.float32) * 0.1
    out = jax.block_until_ready(fire_conv(x, w, b, 0))
    check("fireconv1x1", out, _ref_fireconv(x, w, b, 0), 2e-2, 2e-2)

    # (c) Full FireUnit: squeeze + expand1x1 + expand3x3 + concat + residual.
    B, Cin, H, W = 2, 32, 16, 16
    sq, e1, e3 = 8, 16, 16
    x = jax.random.normal(ks[6], (B, Cin, H, W), dtype=jnp.float32)
    sw = jax.random.normal(ks[7], (sq, Cin, 1, 1), dtype=jnp.float32) * 0.1
    sb = jnp.zeros((sq,), jnp.float32)
    e1w = jax.random.normal(ks[8], (e1, sq, 1, 1), dtype=jnp.float32) * 0.1
    e1b = jnp.zeros((e1,), jnp.float32)
    e3w = jax.random.normal(ks[9], (e3, sq, 3, 3), dtype=jnp.float32) * 0.1
    e3b = jnp.zeros((e3,), jnp.float32)
    out = jax.block_until_ready(
        fire_unit(x, sw, sb, e1w, e1b, e3w, e3b, residual=True))
    ref = _ref_fireunit(x, sw, sb, e1w, e1b, e3w, e3b, residual=True)
    check("fireunit", out, ref, 3e-2, 3e-2)

    print("KERNEL_OK")
</pallas_src>

<mosaic_0001>
module attributes {stable_mosaic.version = 11 : i64} {
  func.func @_fireconv_kernel(%arg0: i32, %arg1: i32, %arg2: memref<1x18x18x128xbf16, #tpu.memory_space<vmem>>, %arg3: memref<1152x128xbf16, #tpu.memory_space<vmem>>, %arg4: memref<1x128xf32, #tpu.memory_space<vmem>>, %arg5: memref<1x16x16x128xf32, #tpu.memory_space<vmem>>, %arg6: memref<256x1152xbf16, #tpu.memory_space<vmem>>) attributes {dimension_semantics = [#tpu.dimension_semantics<parallel>, #tpu.dimension_semantics<parallel>], iteration_bounds = array<i64: 2, 1>, scalar_prefetch = 0 : i64, scratch_operands = 1 : i64, tpu.core_type = #tpu.core_type<tc>, window_params = [{transform_indices = @transform_0, window_bounds = array<i64: 1, 18, 18, 128>}, {pipeline_mode = #tpu.pipeline_mode<synchronous>, transform_indices = @transform_1, window_bounds = array<i64: 1152, 128>}, {pipeline_mode = #tpu.pipeline_mode<synchronous>, transform_indices = @transform_2, window_bounds = array<i64: 1, 128>}, {transform_indices = @transform_3, window_bounds = array<i64: 1, 16, 16, 128>}]} {
    %c16_i32 = arith.constant 16 : i32
    %0 = arith.muli %arg1, %c16_i32 : i32
    %1 = tpu.assume_multiple %0, 16 : i32
    %c0_i32 = arith.constant 0 : i32
    %2 = arith.addi %1, %c0_i32 : i32
    %c0 = arith.constant 0 : index
    %3 = arith.index_cast %2 : i32 to index
    %c0_0 = arith.constant 0 : index
    %c0_1 = arith.constant 0 : index
    %4 = vector.load %arg2[%c0, %3, %c0_0, %c0_1] : memref<1x18x18x128xbf16, #tpu.memory_space<vmem>>, vector<1x16x16x128xbf16>
    %5 = vector.shape_cast %4 : vector<1x16x16x128xbf16> to vector<16x16x128xbf16>
    %6 = vector.shape_cast %5 : vector<16x16x128xbf16> to vector<256x128xbf16>
    %c0_2 = arith.constant 0 : index
    %c0_3 = arith.constant 0 : index
    %7 = vector.load %arg6[%c0_2, %c0_3] : memref<256x1152xbf16, #tpu.memory_space<vmem>>, vector<256x128xbf16>
    tpu.vector_store %arg6[%c0_2, %c0_3], %6 {strides = array<i32>} : memref<256x1152xbf16, #tpu.memory_space<vmem>>, vector<256x128xbf16>,
    %c0_i32_4 = arith.constant 0 : i32
    %8 = arith.addi %1, %c0_i32_4 : i32
    %c0_5 = arith.constant 0 : index
    %9 = arith.index_cast %8 : i32 to index
    %c1 = arith.constant 1 : index
    %c0_6 = arith.constant 0 : index
    %10 = vector.load %arg2[%c0_5, %9, %c1, %c0_6] : memref<1x18x18x128xbf16, #tpu.memory_space<vmem>>, vector<1x16x16x128xbf16>
    %11 = vector.shape_cast %10 : vector<1x16x16x128xbf16> to vector<16x16x128xbf16>
    %12 = vector.shape_cast %11 : vector<16x16x128xbf16> to vector<256x128xbf16>
    %c0_7 = arith.constant 0 : index
    %c128 = arith.constant 128 : index
    %13 = vector.load %arg6[%c0_7, %c128] : memref<256x1152xbf16, #tpu.memory_space<vmem>>, vector<256x128xbf16>
    tpu.vector_store %arg6[%c0_7, %c128], %12 {strides = array<i32>} : memref<256x1152xbf16, #tpu.memory_space<vmem>>, vector<256x128xbf16>,
    %c0_i32_8 = arith.constant 0 : i32
    %14 = arith.addi %1, %c0_i32_8 : i32
    %c0_9 = arith.constant 0 : index
    %15 = arith.index_cast %14 : i32 to index
    %c2 = arith.constant 2 : index
    %c0_10 = arith.constant 0 : index
    %16 = vector.load %arg2[%c0_9, %15, %c2, %c0_10] : memref<1x18x18x128xbf16, #tpu.memory_space<vmem>>, vector<1x16x16x128xbf16>
    %17 = vector.shape_cast %16 : vector<1x16x16x128xbf16> to vector<16x16x128xbf16>
    %18 = vector.shape_cast %17 : vector<16x16x128xbf16> to vector<256x128xbf16>
    %c0_11 = arith.constant 0 : index
    %c256 = arith.constant 256 : index
    %19 = vector.load %arg6[%c0_11, %c256] : memref<256x1152xbf16, #tpu.memory_space<vmem>>, vector<256x128xbf16>
    tpu.vector_store %arg6[%c0_11, %c256], %18 {strides = array<i32>} : memref<256x1152xbf16, #tpu.memory_space<vmem>>, vector<256x128xbf16>,
    %c1_i32 = arith.constant 1 : i32
    %20 = arith.addi %1, %c1_i32 : i32
    %c0_12 = arith.constant 0 : index
    %21 = arith.index_cast %20 : i32 to index
    %c0_13 = arith.constant 0 : index
    %c0_14 = arith.constant 0 : index
    %22 = vector.load %arg2[%c0_12, %21, %c0_13, %c0_14] : memref<1x18x18x128xbf16, #tpu.memory_space<vmem>>, vector<1x16x16x128xbf16>
    %23 = vector.shape_cast %22 : vector<1x16x16x128xbf16> to vector<16x16x128xbf16>
    %24 = vector.shape_cast %23 : vector<16x16x128xbf16> to vector<256x128xbf16>
    %c0_15 = arith.constant 0 : index
    %c384 = arith.constant 384 : index
    %25 = vector.load %arg6[%c0_15, %c384] : memref<256x1152xbf16, #tpu.memory_space<vmem>>, vector<256x128xbf16>
    tpu.vector_store %arg6[%c0_15, %c384], %24 {strides = array<i32>} : memref<256x1152xbf16, #tpu.memory_space<vmem>>, vector<256x128xbf16>,
    %c1_i32_16 = arith.constant 1 : i32
    %26 = arith.addi %1, %c1_i32_16 : i32
    %c0_17 = arith.constant 0 : index
    %27 = arith.index_cast %26 : i32 to index
    %c1_18 = arith.constant 1 : index
    %c0_19 = arith.constant 0 : index
    %28 = vector.load %arg2[%c0_17, %27, %c1_18, %c0_19] : memref<1x18x18x128xbf16, #tpu.memory_space<vmem>>, vector<1x16x16x128xbf16>
    %29 = vector.shape_cast %28 : vector<1x16x16x128xbf16> to vector<16x16x128xbf16>
    %30 = vector.shape_cast %29 : vector<16x16x128xbf16> to vector<256x128xbf16>
    %c0_20 = arith.constant 0 : index
    %c512 = arith.constant 512 : index
    %31 = vector.load %arg6[%c0_20, %c512] : memref<256x1152xbf16, #tpu.memory_space<vmem>>, vector<256x128xbf16>
    tpu.vector_store %arg6[%c0_20, %c512], %30 {strides = array<i32>} : memref<256x1152xbf16, #tpu.memory_space<vmem>>, vector<256x128xbf16>,
    %c1_i32_21 = arith.constant 1 : i32
    %32 = arith.addi %1, %c1_i32_21 : i32
    %c0_22 = arith.constant 0 : index
    %33 = arith.index_cast %32 : i32 to index
    %c2_23 = arith.constant 2 : index
    %c0_24 = arith.constant 0 : index
    %34 = vector.load %arg2[%c0_22, %33, %c2_23, %c0_24] : memref<1x18x18x128xbf16, #tpu.memory_space<vmem>>, vector<1x16x16x128xbf16>
    %35 = vector.shape_cast %34 : vector<1x16x16x128xbf16> to vector<16x16x128xbf16>
    %36 = vector.shape_cast %35 : vector<16x16x128xbf16> to vector<256x128xbf16>
    %c0_25 = arith.constant 0 : index
    %c640 = arith.constant 640 : index
    %37 = vector.load %arg6[%c0_25, %c640] : memref<256x1152xbf16, #tpu.memory_space<vmem>>, vector<256x128xbf16>
    tpu.vector_store %arg6[%c0_25, %c640], %36 {strides = array<i32>} : memref<256x1152xbf16, #tpu.memory_space<vmem>>, vector<256x128xbf16>,
    %c2_i32 = arith.constant 2 : i32
    %38 = arith.addi %1, %c2_i32 : i32
    %c0_26 = arith.constant 0 : index
    %39 = arith.index_cast %38 : i32 to index
    %c0_27 = arith.constant 0 : index
    %c0_28 = arith.constant 0 : index
    %40 = vector.load %arg2[%c0_26, %39, %c0_27, %c0_28] : memref<1x18x18x128xbf16, #tpu.memory_space<vmem>>, vector<1x16x16x128xbf16>
    %41 = vector.shape_cast %40 : vector<1x16x16x128xbf16> to vector<16x16x128xbf16>
    %42 = vector.shape_cast %41 : vector<16x16x128xbf16> to vector<256x128xbf16>
    %c0_29 = arith.constant 0 : index
    %c768 = arith.constant 768 : index
    %43 = vector.load %arg6[%c0_29, %c768] : memref<256x1152xbf16, #tpu.memory_space<vmem>>, vector<256x128xbf16>
    tpu.vector_store %arg6[%c0_29, %c768], %42 {strides = array<i32>} : memref<256x1152xbf16, #tpu.memory_space<vmem>>, vector<256x128xbf16>,
    %c2_i32_30 = arith.constant 2 : i32
    %44 = arith.addi %1, %c2_i32_30 : i32
    %c0_31 = arith.constant 0 : index
    %45 = arith.index_cast %44 : i32 to index
    %c1_32 = arith.constant 1 : index
    %c0_33 = arith.constant 0 : index
    %46 = vector.load %arg2[%c0_31, %45, %c1_32, %c0_33] : memref<1x18x18x128xbf16, #tpu.memory_space<vmem>>, vector<1x16x16x128xbf16>
    %47 = vector.shape_cast %46 : vector<1x16x16x128xbf16> to vector<16x16x128xbf16>
    %48 = vector.shape_cast %47 : vector<16x16x128xbf16> to vector<256x128xbf16>
    %c0_34 = arith.constant 0 : index
    %c896 = arith.constant 896 : index
    %49 = vector.load %arg6[%c0_34, %c896] : memref<256x1152xbf16, #tpu.memory_space<vmem>>, vector<256x128xbf16>
    tpu.vector_store %arg6[%c0_34, %c896], %48 {strides = array<i32>} : memref<256x1152xbf16, #tpu.memory_space<vmem>>, vector<256x128xbf16>,
    %c2_i32_35 = arith.constant 2 : i32
    %50 = arith.addi %1, %c2_i32_35 : i32
    %c0_36 = arith.constant 0 : index
    %51 = arith.index_cast %50 : i32 to index
    %c2_37 = arith.constant 2 : index
    %c0_38 = arith.constant 0 : index
    %52 = vector.load %arg2[%c0_36, %51, %c2_37, %c0_38] : memref<1x18x18x128xbf16, #tpu.memory_space<vmem>>, vector<1x16x16x128xbf16>
    %53 = vector.shape_cast %52 : vector<1x16x16x128xbf16> to vector<16x16x128xbf16>
    %54 = vector.shape_cast %53 : vector<16x16x128xbf16> to vector<256x128xbf16>
    %c0_39 = arith.constant 0 : index
    %c1024 = arith.constant 1024 : index
    %55 = vector.load %arg6[%c0_39, %c1024] : memref<256x1152xbf16, #tpu.memory_space<vmem>>, vector<256x128xbf16>
    tpu.vector_store %arg6[%c0_39, %c1024], %54 {strides = array<i32>} : memref<256x1152xbf16, #tpu.memory_space<vmem>>, vector<256x128xbf16>,
    %c0_40 = arith.constant 0 : index
    %c0_41 = arith.constant 0 : index
    %56 = vector.load %arg6[%c0_40, %c0_41] : memref<256x1152xbf16, #tpu.memory_space<vmem>>, vector<256x1152xbf16>
    %c0_42 = arith.constant 0 : index
    %c0_43 = arith.constant 0 : index
    %57 = vector.load %arg3[%c0_42, %c0_43] : memref<1152x128xbf16, #tpu.memory_space<vmem>>, vector<1152x128xbf16>
    %cst = arith.constant dense<0.000000e+00> : vector<256x128xf32>
    %58 = tpu.matmul %56, %57, %cst {dimension_numbers = #tpu.dot_dimension_numbers<[1], [0], [0], [1], [0, 0, 1, 1], [], []>} : vector<256x1152xbf16>, vector<1152x128xbf16>, vector<256x128xf32> -> vector<256x128xf32>
    %c0_44 = arith.constant 0 : index
    %c0_45 = arith.constant 0 : index
    %59 = vector.load %arg4[%c0_44, %c0_45] : memref<1x128xf32, #tpu.memory_space<vmem>>, vector<1x128xf32>
    %60 = vector.broadcast %59 : vector<1x128xf32> to vector<256x128xf32>
    %61 = arith.addf %58, %60 : vector<256x128xf32>
    %cst_46 = arith.constant 0.000000e+00 : f32
    %62 = vector.broadcast %cst_46 : f32 to vector<256x128xf32>
    %63 = arith.maximumf %61, %62 : vector<256x128xf32>
    %64 = vector.shape_cast %63 : vector<256x128xf32> to vector<1x16x16x128xf32>
    %c0_47 = arith.constant 0 : index
    %c0_48 = arith.constant 0 : index
    %c0_49 = arith.constant 0 : index
    %c0_50 = arith.constant 0 : index
    %65 = vector.load %arg5[%c0_47, %c0_48, %c0_49, %c0_50] : memref<1x16x16x128xf32, #tpu.memory_space<vmem>>, vector<1x16x16x128xf32>
    tpu.vector_store %arg5[%c0_47, %c0_48, %c0_49, %c0_50], %64 {strides = array<i32>} : memref<1x16x16x128xf32, #tpu.memory_space<vmem>>, vector<1x16x16x128xf32>,
    return
  }
  func.func @transform_0(%arg0: i32, %arg1: i32) -> (i32, i32, i32, i32) {
    %c0_i32 = arith.constant 0 : i32
    %c0_i32_0 = arith.constant 0 : i32
    %c0_i32_1 = arith.constant 0 : i32
    %c0_i32_2 = arith.constant 0 : i32
    return %arg0, %c0_i32, %c0_i32_0, %c0_i32_1 : i32, i32, i32, i32
  }
  func.func @transform_1(%arg0: i32, %arg1: i32) -> (i32, i32) {
    %c0_i32 = arith.constant 0 : i32
    %c0_i32_0 = arith.constant 0 : i32
    %c0_i32_1 = arith.constant 0 : i32
    return %c0_i32, %c0_i32_0 : i32, i32
  }
  func.func @transform_2(%arg0: i32, %arg1: i32) -> (i32, i32) {
    %c0_i32 = arith.constant 0 : i32
    %c0_i32_0 = arith.constant 0 : i32
    %c0_i32_1 = arith.constant 0 : i32
    return %c0_i32, %c0_i32_0 : i32, i32
  }
  func.func @transform_3(%arg0: i32, %arg1: i32) -> (i32, i32, i32, i32) {
    %c0_i32 = arith.constant 0 : i32
    %c0_i32_0 = arith.constant 0 : i32
    %c0_i32_1 = arith.constant 0 : i32
    return %arg0, %arg1, %c0_i32, %c0_i32_0 : i32, i32, i32, i32
  }
}

</mosaic_0001>

<bundles_post_ra>
// kernel: tpu_custom_call.1
= control target key start
LH: loop header
LB: loop body
LE: loop exit
PB: predicated region body
PF: predicated region fallthrough
CT: control target
= control target key end

     0   :  { %8 = vsyncpa [#allocation4], 0  ;;  %s8128_s0 = inlined_call_operand.vmem [shape: bf16[2,18,18,128], index: 0, kind: input, shape index: {}]   ;;  %s8129_s1 = inlined_call_operand.vmem [shape: bf16[1152,128], index: 1, kind: input, shape index: {}]   ;;  %s8130_s2 = inlined_call_operand.vmem [shape: f32[1,128], index: 2, kind: input, shape index: {}]   ;;  %s8131_s3 = inlined_call_operand.hbm [shape: f32[2,16,16,128], index: 3, kind: output, shape index: {}]  }
   0x1   :  { %10 = vsyncpa [#allocation4 + $0x1], 0  ;;  %s6724_s12 = smov 0   ;;  %s6726_s13 = smov 0  }
   0x2   :  { %s6728_s14 = smov 0   ;;  %s6730_s15 = smov 0  }
   0x3   :  { %s6732_s16 = smov 0   ;;  %s6734_s17 = smov 0  }
   0x4 LB: > { %s5141_s18 = sadd.s32 4294967295, %s6700_s17   ;;  %s5142_s19 = sadd.s32 4294967294, %s6700_s17   ;;  %s6700_s17 = sphi %s6734_s17, %s16_s17   ;;  %s6696_s16 = sphi %s6732_s16, %s8154_s16   ;;  %s6692_s15 = sphi %s6730_s15, %s8153_s15   ;;  %s6688_s14 = sphi %s6728_s14, %s8152_s14   ;;  %s6684_s13 = sphi %s6726_s13, %s8151_s13   ;;  %s6680_s12 = sphi %s6724_s12, %s8150_s12  }
   0x5   : > { %s28_s20 = sadd.s32 1, %s6696_s16  ;;  %s105_s21 = sadd.s32 1, %s6688_s14 }
   0x6   : > { %p30_p0 = scmp.ge.s32.totalorder %s28_s20, 2  ;;  %p115_p1 = scmp.ne.s32.totalorder %s6688_s14, %s6684_s13 }
   0x7   : > { %p116_p2 = scmp.eq.s32.totalorder %s5141_s18, 1  ;;  %p121_p3 = scmp.ne.s32.totalorder %s6684_s13, %s6680_s12 }
   0x8   : > { %s8156_s20 = smov (%p30_p0, %s28_s20), 0  ;;  %p122_p5 = scmp.eq.s32.totalorder %s5142_s19, 1 }
   0x9   : > { %p6764_p4 = por %p116_p2, %p115_p1  ;;  %s100_s23 = ssub.s32 %s6696_s16, %s8156_s20 }
   0xa   : > { %p5145_p6 = scmp.ge.s32.totalorder %s6700_s17, 1  ;;  %p103_p7 = scmp.eq.s32.totalorder %s100_s23, 0 }
   0xb   : > { %p6771_p8 = por %p122_p5, %p121_p3  ;;  %p154_p9 = scmp.lt.s32.totalorder %s6700_s17, 3 }
   0xc   : > { %s6777_s25 = scalar_select %p103_p7, %s6688_s14, %s105_s21  }
   0xd   : > { %p155_p10 = pnand %p5145_p6, %p154_p9 }
   0xf   : > { %158 = sbr.rel (%p155_p10) target bundleno = 764 (0x2fc), region = 32 }
  0x14   : > { %v6472_v0 = vld [vmem:[%s8129_s1 + $0x38] sm:$0xff]  ;;  %p178_p11 = scmp.lt.s32.totalorder %s6692_s15, 1  ;;  %v6471_v1 = vld [vmem:[%s8129_s1 + $0x30] sm:$0xff]  ;;  %v6470_v2 = vld [vmem:[%s8129_s1 + $0x28] sm:$0xff]  ;;  %vm300_vm0 = vsmask.f32 3328 }
  0x15   : > { %6538 = vmatpush.bf16.msra.mxu1 %v6472_v0  ;;  %6539 = vmatpush.bf16.msra.mxu2 %v6472_v0  ;;  %v6469_v8 = vld [vmem:[%s8129_s1 + $0x20] sm:$0xff]  ;;  %v6468_v13 = vld [vmem:[%s8129_s1 + $0x18] sm:$0xff]  ;;  %v6467_v18 = vld [vmem:[%s8129_s1 + $0x10] sm:$0xff]  ;;  %vm301_vm1 = vsmask.f32 7440  ;;  %vm847_vm2 = vcmask 1042432  }
  0x16   : > { %s179_s30 = scalar_select %p178_p11, %s6692_s15, 1  ;;  %6540 = vmatpush.bf16.msra.mxu3 %v6472_v0  ;;  %4174 = vmatpush.bf16.msra.mxu0 %v6472_v0  ;;  %v6466_v22 = vld [vmem:[%s8129_s1 + $0x8] sm:$0xff]  ;;  %v6465_v25 = vld [vmem:[%s8129_s1] sm:$0xff]  ;;  %v6488_v38 = vld [vmem:[%s8129_s1 + $0xb8] sm:$0xff]  ;;  %vm848_vm4 = vcmask 1046532  }
  0x17   : > { %v6496_v39 = vld [vmem:[%s8129_s1 + $0xf8] sm:$0xff]  ;;  %v6487_v48 = vld [vmem:[%s8129_s1 + $0xb0] sm:$0xff]  ;;  %v6486_v52 = vld [vmem:[%s8129_s1 + $0xa8] sm:$0xff]  ;;  %s175_s7 = sand.u32 1, %s6684_s13  }
  0x18   : > { %s6562_s4 = smul.u32 216, %s179_s30  ;;  %v6480_v46 = vld [vmem:[%s8129_s1 + $0x78] sm:$0xff]  ;;  %v6495_v49 = vld [vmem:[%s8129_s1 + $0xf0] sm:$0xff]  ;;  %v6494_v53 = vld [vmem:[%s8129_s1 + $0xe8] sm:$0xff]  ;;  %s7912_s8 = sshll.u32 %s175_s7, 8 }
  0x19   : > { %6541 = vmatpush.bf16.msra.mxu1 %v6471_v1  ;;  %6542 = vmatpush.bf16.msra.mxu2 %v6471_v1  ;;  %v6504_v47 = vld [vmem:[%s8129_s1 + $0x138] sm:$0xff]  ;;  %v6479_v50 = vld [vmem:[%s8129_s1 + $0x70] sm:$0xff]  ;;  %v6478_v54 = vld [vmem:[%s8129_s1 + $0x68] sm:$0xff]  ;;  %s7931_s10 = scalar_lea.vmem [#allocation3], %s7912_s8  ;;  %s6642_s30 = scalar_lea.hbm %s8131_s3, 512 }
  0x1a   : > { %s6793_s9 = scalar_lea.vmem %s8128_s0, %s6562_s4  ;;  %6543 = vmatpush.bf16.msra.mxu3 %v6471_v1  ;;  %4175 = vmatpush.bf16.msra.mxu0 %v6471_v1  ;;  %v6503_v51 = vld [vmem:[%s8129_s1 + $0x130] sm:$0xff]  ;;  %v6485_v55 = vld [vmem:[%s8129_s1 + $0xa0] sm:$0xff]  ;;  %v6502_v57 = vld [vmem:[%s8129_s1 + $0x128] sm:$0xff]  ;;  %s5055_s21 = sshll.u32 %s7931_s10, 4  ;;  %s5056_s21 = int_to_ptr.vmem [resolvable:$true] %s5055_s21 }
  0x1b   : > { %v196_v3 = vld [vmem:[%s6793_s9 + $0x30] sm:$0xf]  ;;  %v197_v4 = vld [vmem:[%s6793_s9 + $0x34] sm:$0xf]  ;;  %v204_v5 = vld [vmem:[%s6793_s9 + $0x60] sm:$0xf] }
  0x1c   : > { %228 = vst [vmem:[#allocation2 + $0x120] sm:$0xf] %v196_v3  ;;  %v205_v6 = vld [vmem:[%s6793_s9 + $0x64] sm:$0xf]  ;;  %v212_v7 = vld [vmem:[%s6793_s9 + $0x90] sm:$0xf]  ;;  %vm6940_vm3 = vmor %vm300_vm0, %vm301_vm1 }
  0x1d   : > { %229 = vst [vmem:[#allocation2 + $0x144] sm:$0xf] %v197_v4  ;;  %6544 = vmatpush.bf16.msra.mxu1 %v6470_v2  ;;  %6545 = vmatpush.bf16.msra.mxu2 %v6470_v2  ;;  %v213_v9 = vld [vmem:[%s6793_s9 + $0x94] sm:$0xf]  ;;  %v188_v10 = vld [vmem:[%s6793_s9] sm:$0xf]  ;;  %vm6954_vm5 = vmor %vm847_vm2, %vm848_vm4 }
  0x1e   : > { %236 = vst [vmem:[#allocation2 + $0x240] sm:$0xf] %v204_v5  ;;  %6546 = vmatpush.bf16.msra.mxu3 %v6470_v2  ;;  %4176 = vmatpush.bf16.msra.mxu0 %v6470_v2  ;;  %v189_v11 = vld [vmem:[%s6793_s9 + $0x4] sm:$0xf]  ;;  %v198_v12 = vld [vmem:[%s6793_s9 + $0x3c] sm:$0xf] }
  0x1f   : > { %237 = vst [vmem:[#allocation2 + $0x264] sm:$0xf] %v205_v6  ;;  %v199_v14 = vld [vmem:[%s6793_s9 + $0x40] sm:$0xf]  ;;  %v206_v15 = vld [vmem:[%s6793_s9 + $0x6c] sm:$0xf] }
  0x20   : > { %244 = vst [vmem:[#allocation2 + $0x360] sm:$0xf] %v212_v7  ;;  %v207_v16 = vld [vmem:[%s6793_s9 + $0x70] sm:$0xf]  ;;  %v214_v17 = vld [vmem:[%s6793_s9 + $0x9c] sm:$0xf] }
  0x21   : > { %245 = vst [vmem:[#allocation2 + $0x384] sm:$0xf] %v213_v9  ;;  %6547 = vmatpush.bf16.msra.mxu1 %v6469_v8  ;;  %6548 = vmatpush.bf16.msra.mxu2 %v6469_v8  ;;  %v215_v19 = vld [vmem:[%s6793_s9 + $0xa0] sm:$0xf]  ;;  %v190_v20 = vld [vmem:[%s6793_s9 + $0xc] sm:$0xf] }
  0x22   : > { %220 = vst [vmem:[#allocation2] sm:$0xf] %v188_v10  ;;  %6549 = vmatpush.bf16.msra.mxu3 %v6469_v8  ;;  %4177 = vmatpush.bf16.msra.mxu0 %v6469_v8  ;;  %v191_v21 = vld [vmem:[%s6793_s9 + $0x10] sm:$0xf]  ;;  %v200_v23 = vld [vmem:[%s6793_s9 + $0x48] sm:$0xf] }
  0x23   : > { %221 = vst [vmem:[#allocation2 + $0x24] sm:$0xf] %v189_v11  ;;  %v201_v24 = vld [vmem:[%s6793_s9 + $0x4c] sm:$0xf]  ;;  %v5598_v26 = vld [vmem:[#allocation2 + $0x120] sm:$0xf] }
  0x24   : > { %230 = vst [vmem:[#allocation2 + $0x168] sm:$0xf] %v198_v12  ;;  %v6361_v27 = vld [vmem:[#allocation2 + $0x140] sm:$0xf0]  ;;  %v208_v30 = vld [vmem:[%s6793_s9 + $0x78] sm:$0xf] }
  0x25   : > { %231 = vst [vmem:[#allocation2 + $0x18c] sm:$0xf] %v199_v14  ;;  %6550 = vmatpush.bf16.msra.mxu1 %v6468_v13  ;;  %6551 = vmatpush.bf16.msra.mxu2 %v6468_v13  ;;  %v5742_v28 = vld [vmem:[#allocation2 + $0x240] sm:$0xf]  ;;  %v209_v33 = vld [vmem:[%s6793_s9 + $0x7c] sm:$0xf]  ;;  %v5599_v41 = vor.u32 %v6361_v27, %v5598_v26 }
  0x26   : > { %238 = vst [vmem:[#allocation2 + $0x288] sm:$0xf] %v206_v15  ;;  %6552 = vmatpush.bf16.msra.mxu3 %v6468_v13  ;;  %4178 = vmatpush.bf16.msra.mxu0 %v6468_v13  ;;  %v6397_v29 = vld [vmem:[#allocation2 + $0x260] sm:$0xf0]  ;;  %v216_v35 = vld [vmem:[%s6793_s9 + $0xa8] sm:$0xf] }
  0x27   : > { %239 = vst [vmem:[#allocation2 + $0x2ac] sm:$0xf] %v207_v16  ;;  %v5886_v31 = vld [vmem:[#allocation2 + $0x360] sm:$0xf]  ;;  %v217_v37 = vld [vmem:[%s6793_s9 + $0xac] sm:$0xf]  ;;  %v5743_v42 = vor.u32 %v6397_v29, %v5742_v28 }
  0x28   : > { %246 = vst [vmem:[#allocation2 + $0x3a8] sm:$0xf] %v214_v17  ;;  %v6433_v32 = vld [vmem:[#allocation2 + $0x380] sm:$0xf0]  ;;  %v192_v40 = vld [vmem:[%s6793_s9 + $0x18] sm:$0xf] }
  0x29   : > { %247 = vst [vmem:[#allocation2 + $0x3cc] sm:$0xf] %v215_v19  ;;  %6553 = vmatpush.bf16.msra.mxu1 %v6467_v18  ;;  %6554 = vmatpush.bf16.msra.mxu2 %v6467_v18  ;;  %v5454_v34 = vld [vmem:[#allocation2] sm:$0xf]  ;;  %v193_v43 = vld [vmem:[%s6793_s9 + $0x1c] sm:$0xf]  ;;  %v5887_v44 = vor.u32 %v6433_v32, %v5886_v31 }
  0x2a   : > { %222 = vst [vmem:[#allocation2 + $0x48] sm:$0xf] %v190_v20  ;;  %6555 = vmatpush.bf16.msra.mxu3 %v6467_v18  ;;  %4179 = vmatpush.bf16.msra.mxu0 %v6467_v18  ;;  %v6325_v36 = vld [vmem:[#allocation2 + $0x20] sm:$0xf0]  ;;  %v202_v58 = vld [vmem:[%s6793_s9 + $0x54] sm:$0xf] }
  0x2b   : > { %223 = vst [vmem:[#allocation2 + $0x6c] sm:$0xf] %v191_v21  ;;  %v5455_v45 = vor.u32 %v6325_v36, %v5454_v34  ;;  %v6493_v56 = vld [vmem:[%s8129_s1 + $0xe0] sm:$0xff]  ;;  %v203_v59 = vld [vmem:[%s6793_s9 + $0x58] sm:$0xf]  ;;  %v6475_v31 = vld [vmem:[%s8129_s1 + $0x50] sm:$0xff] }
  0x2c   : > { %232 = vst [vmem:[#allocation2 + $0x1b0] sm:$0xf] %v200_v23  ;;  %v210_v60 = vld [vmem:[%s6793_s9 + $0x84] sm:$0xf]  ;;  %v211_v61 = vld [vmem:[%s6793_s9 + $0x88] sm:$0xf] }
  0x2d   : > { %233 = vst [vmem:[#allocation2 + $0x1d4] sm:$0xf] %v201_v24  ;;  %6556 = vmatpush.bf16.msra.mxu1 %v6466_v22  ;;  %6557 = vmatpush.bf16.msra.mxu2 %v6466_v22  ;;  %v5634_v62 = vld [vmem:[#allocation2 + $0x168] sm:$0xf]  ;;  %v6370_v63 = vld [vmem:[#allocation2 + $0x188] sm:$0xf0] }
  0x2e   : > { %240 = vst [vmem:[#allocation2 + $0x2d0] sm:$0xf] %v208_v30  ;;  %6558 = vmatpush.bf16.msra.mxu3 %v6466_v22  ;;  %4180 = vmatpush.bf16.msra.mxu0 %v6466_v22  ;;  %v5778_v0 = vld [vmem:[#allocation2 + $0x288] sm:$0xf]  ;;  %v6406_v1 = vld [vmem:[#allocation2 + $0x2a8] sm:$0xf0]  ;;  %v5635_v14 = vor.u32 %v6370_v63, %v5634_v62 }
  0x2f   : > { %241 = vst [vmem:[#allocation2 + $0x2f4] sm:$0xf] %v209_v33  ;;  %v218_v2 = vld [vmem:[%s6793_s9 + $0xb4] sm:$0xf]  ;;  %v5922_v3 = vld [vmem:[#allocation2 + $0x3a8] sm:$0xf]  ;;  %v5779_v15 = vor.u32 %v6406_v1, %v5778_v0 }
  0x30   : > { %248 = vst [vmem:[#allocation2 + $0x3f0] sm:$0xf] %v216_v35  ;;  %v6442_v4 = vld [vmem:[#allocation2 + $0x3c8] sm:$0xf0]  ;;  %v219_v6 = vld [vmem:[%s6793_s9 + $0xb8] sm:$0xf] }
  0x31   : > { %249 = vst [vmem:[#allocation2 + $0x414] sm:$0xf] %v217_v37  ;;  %6559 = vmatpush.bf16.msra.mxu1 %v6465_v25  ;;  %6560 = vmatpush.bf16.msra.mxu2 %v6465_v25  ;;  %v5490_v5 = vld [vmem:[#allocation2 + $0x48] sm:$0xf]  ;;  %v194_v8 = vld [vmem:[%s6793_s9 + $0x24] sm:$0xf]  ;;  %v5923_v16 = vor.u32 %v6442_v4, %v5922_v3 }
  0x32   : > { %224 = vst [vmem:[#allocation2 + $0x90] sm:$0xf] %v192_v40  ;;  %6561 = vmatpush.bf16.msra.mxu3 %v6465_v25  ;;  %4181 = vmatpush.bf16.msra.mxu0 %v6465_v25  ;;  %v6334_v7 = vld [vmem:[#allocation2 + $0x68] sm:$0xf0]  ;;  %v6477_v9 = vld [vmem:[%s8129_s1 + $0x60] sm:$0xff]  ;;  %v6484_v12 = vld [vmem:[%s8129_s1 + $0x98] sm:$0xff] }
  0x33   : > { %225 = vst [vmem:[#allocation2 + $0xb4] sm:$0xf] %v193_v43  ;;  %v6501_v10 = vld [vmem:[%s8129_s1 + $0x120] sm:$0xff]  ;;  %v195_v11 = vld [vmem:[%s6793_s9 + $0x28] sm:$0xf]  ;;  %v6492_v13 = vld [vmem:[%s8129_s1 + $0xd8] sm:$0xff]  ;;  %v5491_v17 = vor.u32 %v6334_v7, %v5490_v5 }
  0x34   : > { %4202 = vmatmul.bf16.vlgmr.msra.gmra.mxu1 %v5599_v41  ;;  %4222 = vmatmul.bf16.vlgmr.msra.gmra.mxu2 %v5743_v42  ;;  %234 = vst [vmem:[#allocation2 + $0x1f8] sm:$0xf] %v202_v58  ;;  %v252_v18 = vld [vmem:[%s6793_s9] sm:$0xf]  ;;  %v6476_v19 = vld [vmem:[%s8129_s1 + $0x58] sm:$0xff]  ;;  %v6483_v24 = vld [vmem:[%s8129_s1 + $0x90] sm:$0xff] }
  0x35   : > { %4352 = vmatpush.bf16.msrb.mxu2 %v6488_v38  ;;  %4242 = vmatmul.bf16.vlgmr.msra.gmra.mxu3 %v5887_v44  ;;  %235 = vst [vmem:[#allocation2 + $0x21c] sm:$0xf] %v203_v59  ;;  %v6500_v20 = vld [vmem:[%s8129_s1 + $0x118] sm:$0xff]  ;;  %v253_v21 = vld [vmem:[%s6793_s9 + $0x4] sm:$0xf]  ;;  %v304_v22 = vshrl.u32 %v252_v18, 16 }
  0x36   : > { %4441 = vmatpush.bf16.msrb.mxu3 %v6496_v39  ;;  %4182 = vmatmul.bf16.vlgmr.msra.gmra.mxu0 %v5455_v45  ;;  %242 = vst [vmem:[#allocation2 + $0x318] sm:$0xf] %v210_v60  ;;  %v307_v23 = vshll.u32 %v252_v18, 16  ;;  %v6491_v25 = vld [vmem:[%s8129_s1 + $0xd0] sm:$0xff]  ;;  %v313_v26 = vshll.u32 %v253_v21, 16  ;;  %v317_v27 = vshrl.u32 %v253_v21, 16 }
  0x37   : > { %4263 = vmatpush.bf16.msrb.mxu1 %v6480_v46  ;;  %4530 = vmatpush.bf16.msrb.mxu0 %v6504_v47  ;;  %243 = vst [vmem:[#allocation2 + $0x33c] sm:$0xf] %v211_v61  ;;  %v306_v28 = vrot.slane %v304_v22, 4  ;;  %v6911_v30 = vld [vmem:[%s6793_s9 + $0xc] sm:$0xf]  ;;  %v6499_v32 = vld [vmem:[%s8129_s1 + $0x110] sm:$0xff] }
  0x38   : > { %250 = vst [vmem:[#allocation2 + $0x438] sm:$0xf] %v218_v2  ;;  %v309_v29 = vrot.slane %v307_v23, 5  ;;  %v6482_v34 = vld [vmem:[%s8129_s1 + $0x88] sm:$0xff]  ;;  %v315_v36 = vrot.slane %v313_v26, 5  ;;  %v319_v37 = vrot.slane %v317_v27, 4 }
  0x39   : > { %4353 = vmatpush.bf16.msrb.mxu2 %v6487_v48  ;;  %251 = vst [vmem:[#allocation2 + $0x45c] sm:$0xf] %v219_v6  ;;  %v6490_v35 = vld [vmem:[%s8129_s1 + $0xc8] sm:$0xff]  ;;  %v6481_v40 = vld [vmem:[%s8129_s1 + $0x80] sm:$0xff]  ;;  %v1143_v46 = vshrl.u32 %v6911_v30, 16 }
  0x3a   : > { %4442 = vmatpush.bf16.msrb.mxu3 %v6495_v49  ;;  %226 = vst [vmem:[#allocation2 + $0xd8] sm:$0xf] %v194_v8  ;;  %v310_v33 = vor.u32 %v309_v29, %v306_v28  ;;  %v6474_v38 = vld [vmem:[%s8129_s1 + $0x48] sm:$0xff]  ;;  %v6489_v41 = vld [vmem:[%s8129_s1 + $0xc0] sm:$0xff]  ;;  %v320_v45 = vor.u32 %v319_v37, %v315_v36  ;;  %v5958_v61 = vld [vmem:[#allocation2 + $0x3f0] sm:$0xf] }
  0x3b   : > { %4264 = vmatpush.bf16.msrb.mxu1 %v6479_v50  ;;  %4531 = vmatpush.bf16.msrb.mxu0 %v6503_v51  ;;  %227 = vst [vmem:[#allocation2 + $0xfc] sm:$0xf] %v195_v11  ;;  %v6498_v42 = vld [vmem:[%s8129_s1 + $0x108] sm:$0xff]  ;;  %v751_v49 = vld [vmem:[%s6793_s9] sm:$0xe]  ;;  %v1145_v5 = vrot.slane %v1143_v46, 4 }
  0x3c   : > { %v311_v39 = vrot.slane %v310_v33, 4  ;;  %v254_v43 = vld [vmem:[%s6793_s9 + $0x8] sm:$0x1]  ;;  %v752_v50 = vld [vmem:[%s6793_s9 + $0x4] sm:$0xf]  ;;  %v5148_v60 = vrot.slane %v751_v49, 9 }
  0x3d   : > { %4354 = vmatpush.bf16.msrb.mxu2 %v6486_v52  ;;  %v323_v48 = vshll.u32 %v254_v43, 16  ;;  %v5197_v51 = vld [vmem:[%s6793_s9 + $0x10] sm:$0xf]  ;;  %v1146_v52 = vshll.u32 %v6911_v30, 16  ;;  %v753_v58 = vld [vmem:[%s6793_s9 + $0x8] sm:$0x1] }
  0x3e   : > { %4443 = vmatpush.bf16.msrb.mxu3 %v6494_v53  ;;  %v316_v47 = vsel %vm6940_vm3, %v311_v39, %v315_v36  ;;  %v5670_v53 = vld [vmem:[#allocation2 + $0x1b0] sm:$0xf]  ;;  %v6451_v62 = vld [vmem:[#allocation2 + $0x410] sm:$0xf0]  ;;  %v852_v2 = vrot.slane %v752_v50, 5  ;;  %v855_v3 = vrot.slane %v753_v58, 5 }
  0x3f   : > { %4265 = vmatpush.bf16.msrb.mxu1 %v6478_v54  ;;  %4532 = vmatpush.bf16.msrb.mxu0 %v6502_v57  ;;  %v6379_v54 = vld [vmem:[#allocation2 + $0x1d0] sm:$0xf0]  ;;  %v321_v57 = vrot.slane %v320_v45, 4  ;;  %719 = vst [vmem:[#allocation2 + $0x4] sm:$0xf] %v316_v47  ;;  %v325_v1 = vrot.slane %v323_v48, 5  ;;  %v5959_v21 = vor.u32 %v6451_v62, %v5958_v61 }
  0x40   : > { %v5526_v63 = vld [vmem:[#allocation2 + $0x90] sm:$0xf]  ;;  %v6343_v0 = vld [vmem:[#allocation2 + $0xb0] sm:$0xf0]  ;;  %v5164_v4 = vld [vmem:[%s6793_s9 + $0xc] sm:$0xf]  ;;  %v853_v11 = vsel %vm6954_vm5, %v5148_v60, %v852_v2 }
  0x41   : > { %4355 = vmatpush.bf16.msrb.mxu2 %v6485_v55  ;;  %v5814_v55 = vld [vmem:[#allocation2 + $0x2d0] sm:$0xf]  ;;  %1062 = vst [vmem:[#allocation2 + $0xc] sm:$0xf] %v5164_v4  ;;  %v5198_v7 = vld [vmem:[%s6793_s9 + $0x14] sm:$0x1]  ;;  %v5527_v22 = vor.u32 %v6343_v0, %v5526_v63 }
  0x42   : > { %4444 = vmatpush.bf16.msrb.mxu3 %v6493_v56  ;;  %v6415_v56 = vld [vmem:[#allocation2 + $0x2f0] sm:$0xf0]  ;;  %v5165_v6 = vld [vmem:[%s6793_s9 + $0x10] sm:$0xf]  ;;  %v6473_v8 = vld [vmem:[%s8129_s1 + $0x40] sm:$0xff] }
  0x43   : > { %4266 = vmatpush.bf16.msrb.mxu1 %v6477_v9  ;;  %4533 = vmatpush.bf16.msrb.mxu0 %v6501_v10  ;;  %v6497_v9 = vld [vmem:[%s8129_s1 + $0x100] sm:$0xff]  ;;  %v326_v10 = vsel %vm6940_vm3, %v321_v57, %v325_v1  ;;  %1063 = vst [vmem:[#allocation2 + $0x30] sm:$0xf] %v5165_v6  ;;  %v5815_v18 = vor.u32 %v6415_v56, %v5814_v55  ;;  %v255_v26 = vld [vmem:[%s6793_s9 + $0xc] sm:$0xf]  ;;  %v6528_v37 = vld [vmem:[%s8129_s1 + $0x1f8] sm:$0xff] }
  0x44   : > { %4207 = vmatmul.bf16.gmra.mxu1 %v5635_v14  ;;  %4227 = vmatmul.bf16.gmra.mxu2 %v5779_v15  ;;  %720 = vst [vmem:[#allocation2 + $0x28] sm:$0xf] %v326_v10  ;;  %v1152_v14 = vshll.u32 %v5197_v51, 16  ;;  %v1156_v15 = vshrl.u32 %v5197_v51, 16  ;;  %v256_v29 = vld [vmem:[%s6793_s9 + $0x10] sm:$0xf] }
  0x45   : > { %4356 = vmatpush.bf16.msrb.mxu2 %v6484_v12  ;;  %4247 = vmatmul.bf16.gmra.mxu3 %v5923_v16  ;;  %v854_v12 = vrot.slane %v852_v2, 4  ;;  %v1162_v16 = vshll.u32 %v5198_v7, 16  ;;  %994 = vst [vmem:[#allocation2 + $0x8] sm:$0xf] %v853_v11  ;;  %v328_v30 = vshrl.u32 %v255_v26, 16  ;;  %v337_v33 = vshll.u32 %v256_v29, 16 }
  0x46   : > { %4445 = vmatpush.bf16.msrb.mxu3 %v6492_v13  ;;  %4187 = vmatmul.bf16.gmra.mxu0 %v5491_v17  ;;  %v1148_v13 = vrot.slane %v1146_v52, 5  ;;  %v5671_v17 = vor.u32 %v6379_v54, %v5670_v53  ;;  %v1154_v23 = vrot.slane %v1152_v14, 5  ;;  %v257_v43 = vld [vmem:[%s6793_s9 + $0x14] sm:$0x1]  ;;  %v5199_v49 = vld [vmem:[%s6793_s9 + $0x18] sm:$0xf] }
  0x47   : > { %4267 = vmatpush.bf16.msrb.mxu1 %v6476_v19  ;;  %4534 = vmatpush.bf16.msrb.mxu0 %v6500_v20  ;;  %v856_v19 = vsel %vm6954_vm5, %v854_v12, %v855_v3  ;;  %v1164_v28 = vrot.slane %v1162_v16, 5  ;;  %v330_v39 = vrot.slane %v328_v30, 4  ;;  %v339_v45 = vrot.slane %v337_v33, 5  ;;  %v754_v50 = vld [vmem:[%s6793_s9 + $0xc] sm:$0xe] }
  0x48   : > { %v1149_v20 = vor.u32 %v1148_v13, %v1145_v5  ;;  %995 = vst [vmem:[#allocation2 + $0x2c] sm:$0xf] %v856_v19  ;;  %v347_v48 = vshll.u32 %v257_v43, 16  ;;  %v755_v51 = vld [vmem:[%s6793_s9 + $0x10] sm:$0xf]  ;;  %v5149_v57 = vrot.slane %v754_v50, 9 }
  0x49   : > { %4357 = vmatpush.bf16.msrb.mxu2 %v6483_v24  ;;  %v1158_v24 = vrot.slane %v1156_v15, 4  ;;  %v756_v52 = vld [vmem:[%s6793_s9 + $0x14] sm:$0x1]  ;;  %v5200_v53 = vld [vmem:[%s6793_s9 + $0x1c] sm:$0xf]  ;;  %v859_v0 = vrot.slane %v755_v51, 5 }
  0x4a   : > { %4446 = vmatpush.bf16.msrb.mxu3 %v6491_v25  ;;  %v1150_v25 = vrot.slane %v1149_v20, 4  ;;  %v349_v56 = vrot.slane %v347_v48, 5  ;;  %v5166_v58 = vld [vmem:[%s6793_s9 + $0x18] sm:$0xf]  ;;  %v6388_v61 = vld [vmem:[#allocation2 + $0x218] sm:$0xf0] }
  0x4b   : > { %4268 = vmatpush.bf16.msrb.mxu1 %v6475_v31  ;;  %4535 = vmatpush.bf16.msrb.mxu0 %v6499_v32  ;;  %v1159_v27 = vor.u32 %v1158_v24, %v1154_v23  ;;  %v331_v31 = vshll.u32 %v255_v26, 16  ;;  %v5706_v60 = vld [vmem:[#allocation2 + $0x1f8] sm:$0xf]  ;;  %v6424_v63 = vld [vmem:[#allocation2 + $0x338] sm:$0xf0]  ;;  %v862_v1 = vrot.slane %v756_v52, 5  ;;  %v860_v10 = vsel %vm6954_vm5, %v5149_v57, %v859_v0 }
  0x4c   : > { %v1155_v32 = vsel %vm6940_vm3, %v1150_v25, %v1154_v23  ;;  %v5850_v62 = vld [vmem:[#allocation2 + $0x318] sm:$0xf]  ;;  %v5167_v2 = vld [vmem:[%s6793_s9 + $0x1c] sm:$0xf]  ;;  %1064 = vst [vmem:[#allocation2 + $0x54] sm:$0xf] %v5166_v58 }
  0x4d   : > { %4358 = vmatpush.bf16.msrb.mxu2 %v6482_v34  ;;  %v341_v34 = vshrl.u32 %v256_v29, 16  ;;  %v1160_v36 = vrot.slane %v1159_v27, 4  ;;  %1558 = vst [vmem:[#allocation2 + $0x10] sm:$0xf] %v1155_v32  ;;  %v5994_v3 = vld [vmem:[#allocation2 + $0x438] sm:$0xf] }
  0x4e   : > { %4447 = vmatpush.bf16.msrb.mxu3 %v6490_v35  ;;  %v6520_v35 = vld [vmem:[%s8129_s1 + $0x1b8] sm:$0xff]  ;;  %1065 = vst [vmem:[#allocation2 + $0x78] sm:$0xf] %v5167_v2  ;;  %v861_v11 = vrot.slane %v859_v0, 4  ;;  %v5201_v12 = vld [vmem:[%s6793_s9 + $0x20] sm:$0x1] }
  0x4f   : > { %4269 = vmatpush.bf16.msrb.mxu1 %v6474_v38  ;;  %4536 = vmatpush.bf16.msrb.mxu0 %v6498_v42  ;;  %v6512_v38 = vld [vmem:[%s8129_s1 + $0x178] sm:$0xff]  ;;  %v343_v47 = vrot.slane %v341_v34, 4  ;;  %v1170_v13 = vshll.u32 %v5199_v49, 16  ;;  %996 = vst [vmem:[#allocation2 + $0x50] sm:$0xf] %v860_v10  ;;  %v1176_v16 = vshll.u32 %v5200_v53, 16 }
  0x50   : > { %v6536_v42 = vld [vmem:[%s8129_s1 + $0x238] sm:$0xff]  ;;  %v1186_v20 = vshll.u32 %v5201_v12, 16  ;;  %v6321_v0 = vld [vmem:[#allocation2 + $0x4] sm:$0xf]  ;;  %v5462_v2 = vld [vmem:[#allocation2 + $0x8] sm:$0xf] }
  0x51   : > { %4359 = vmatpush.bf16.msrb.mxu2 %v6481_v40  ;;  %v333_v40 = vrot.slane %v331_v31, 5  ;;  %v344_v55 = vor.u32 %v343_v47, %v339_v45  ;;  %v6460_v4 = vld [vmem:[#allocation2 + $0x458] sm:$0xf0]  ;;  %v5562_v5 = vld [vmem:[#allocation2 + $0xd8] sm:$0xf]  ;;  %v1172_v19 = vrot.slane %v1170_v13, 5 }
  0x52   : > { %4448 = vmatpush.bf16.msrb.mxu3 %v6489_v41  ;;  %v1165_v41 = vsel %vm6940_vm3, %v1160_v36, %v1164_v28  ;;  %v6352_v6 = vld [vmem:[#allocation2 + $0xf8] sm:$0xf0]  ;;  %v1178_v23 = vrot.slane %v1176_v16, 5  ;;  %v5995_v25 = vor.u32 %v6460_v4, %v5994_v3  ;;  %v1188_v28 = vrot.slane %v1186_v20, 5  ;;  %v258_v29 = vld [vmem:[%s6793_s9 + $0x18] sm:$0xf] }
  0x53   : > { %4270 = vmatpush.bf16.msrb.mxu1 %v6473_v8  ;;  %4537 = vmatpush.bf16.msrb.mxu0 %v6497_v9  ;;  %1559 = vst [vmem:[#allocation2 + $0x34] sm:$0xf] %v1165_v41  ;;  %v334_v46 = vor.u32 %v333_v40, %v330_v39  ;;  %v345_v8 = vrot.slane %v344_v55, 4  ;;  %v1167_v9 = vshrl.u32 %v5199_v49, 16  ;;  %v5563_v26 = vor.u32 %v6352_v6, %v5562_v5  ;;  %v259_v30 = vld [vmem:[%s6793_s9 + $0x1c] sm:$0xf] }
  0x54   : > { %4212 = vmatmul.bf16.gmra.mxu1 %v5671_v17  ;;  %4232 = vmatmul.bf16.gmra.mxu2 %v5815_v18  ;;  %v1180_v17 = vshrl.u32 %v5200_v53, 16  ;;  %v863_v18 = vsel %vm6954_vm5, %v861_v11, %v862_v1  ;;  %v352_v32 = vshrl.u32 %v258_v29, 16  ;;  %v355_v33 = vshll.u32 %v258_v29, 16  ;;  %v5202_v40 = vld [vmem:[%s6793_s9 + $0x24] sm:$0xf] }
  0x55   : > { %4252 = vmatmul.bf16.gmra.mxu3 %v5959_v21  ;;  %4708 = vmatpush.bf16.msra.mxu2 %v6520_v35  ;;  %v335_v54 = vrot.slane %v334_v46, 4  ;;  %v350_v14 = vsel %vm6940_vm3, %v345_v8, %v349_v56  ;;  %v1169_v15 = vrot.slane %v1167_v9, 4  ;;  %v5707_v21 = vor.u32 %v6388_v61, %v5706_v60  ;;  %997 = vst [vmem:[#allocation2 + $0x74] sm:$0xf] %v863_v18  ;;  %v757_v50 = vld [vmem:[%s6793_s9 + $0x18] sm:$0xe] }
  0x56   : > { %4192 = vmatmul.bf16.gmra.mxu0 %v5527_v22  ;;  %4797 = vmatpush.bf16.msra.mxu3 %v6528_v37  ;;  %722 = vst [vmem:[#allocation2 + $0x70] sm:$0xf] %v350_v14  ;;  %v5851_v22 = vor.u32 %v6424_v63, %v5850_v62  ;;  %v1182_v24 = vrot.slane %v1180_v17, 4  ;;  %v361_v34 = vshll.u32 %v259_v30, 16  ;;  %v365_v36 = vshrl.u32 %v259_v30, 16 }
  0x57   : > { %4619 = vmatpush.bf16.msra.mxu1 %v6512_v38  ;;  %4886 = vmatpush.bf16.msra.mxu0 %v6536_v42  ;;  %v340_v7 = vsel %vm6940_vm3, %v335_v54, %v339_v45  ;;  %v1173_v27 = vor.u32 %v1172_v19, %v1169_v15  ;;  %v354_v38 = vrot.slane %v352_v32, 4  ;;  %v357_v39 = vrot.slane %v355_v33, 5  ;;  %v260_v42 = vld [vmem:[%s6793_s9 + $0x20] sm:$0x1]  ;;  %v758_v54 = vld [vmem:[%s6793_s9 + $0x1c] sm:$0xf] }
  0x58   : > { %721 = vst [vmem:[#allocation2 + $0x4c] sm:$0xf] %v340_v7  ;;  %v1183_v31 = vor.u32 %v1182_v24, %v1178_v23  ;;  %v363_v43 = vrot.slane %v361_v34, 5  ;;  %v367_v45 = vrot.slane %v365_v36, 4  ;;  %v371_v48 = vshll.u32 %v260_v42, 16  ;;  %v6527_v42 = vld [vmem:[%s8129_s1 + $0x1f0] sm:$0xff] }
  0x59   : > { %v1174_v35 = vrot.slane %v1173_v27, 4  ;;  %v358_v47 = vor.u32 %v357_v39, %v354_v38  ;;  %v1191_v51 = vshrl.u32 %v5202_v40, 16  ;;  %v759_v55 = vld [vmem:[%s6793_s9 + $0x20] sm:$0x1]  ;;  %v5150_v57 = vrot.slane %v757_v50, 9 }
  0x5a   : > { %v1184_v37 = vrot.slane %v1183_v31, 4  ;;  %v368_v49 = vor.u32 %v367_v45, %v363_v43  ;;  %v373_v53 = vrot.slane %v371_v48, 5  ;;  %v866_v58 = vrot.slane %v758_v54, 5  ;;  %v5203_v61 = vld [vmem:[%s6793_s9 + $0x28] sm:$0xf]  ;;  %v6535_v45 = vld [vmem:[%s8129_s1 + $0x230] sm:$0xff]  ;;  %4798 = vmatpush.bf16.msra.mxu3 %v6527_v42 }
  0x5b   : > { %v1179_v41 = vsel %vm6940_vm3, %v1174_v35, %v1178_v23  ;;  %v359_v52 = vrot.slane %v358_v47, 4  ;;  %v869_v60 = vrot.slane %v759_v55, 5  ;;  %v5204_v63 = vld [vmem:[%s6793_s9 + $0x2c] sm:$0x1]  ;;  %v5456_v1 = vld [vmem:[#allocation2 + $0x24] sm:$0xf0]  ;;  %4887 = vmatpush.bf16.msra.mxu0 %v6535_v45 }
  0x5c   : > { %v1189_v46 = vsel %vm6940_vm3, %v1184_v37, %v1188_v28  ;;  %1560 = vst [vmem:[#allocation2 + $0x58] sm:$0xf] %v1179_v41  ;;  %v369_v56 = vrot.slane %v368_v49, 4  ;;  %v6326_v3 = vld [vmem:[#allocation2 + $0x28] sm:$0xf0]  ;;  %v867_v5 = vsel %vm6954_vm5, %v5150_v57, %v866_v58  ;;  %v868_v6 = vrot.slane %v866_v58, 4 }
  0x5d   : > { %1561 = vst [vmem:[#allocation2 + $0x7c] sm:$0xf] %v1189_v46  ;;  %v364_v62 = vsel %vm6940_vm3, %v359_v52, %v363_v43  ;;  %v5168_v7 = vld [vmem:[%s6793_s9 + $0x24] sm:$0xf]  ;;  %v6322_v8 = vld [vmem:[#allocation2 + $0xc] sm:$0xf]  ;;  %v5463_v23 = vor.u32 %v6326_v3, %v5462_v2 }
  0x5e   : > { %v374_v4 = vsel %vm6940_vm3, %v369_v56, %v373_v53  ;;  %723 = vst [vmem:[#allocation2 + $0x94] sm:$0xf] %v364_v62  ;;  %v5464_v9 = vld [vmem:[#allocation2 + $0x2c] sm:$0xf0]  ;;  %v1193_v11 = vrot.slane %v1191_v51, 4  ;;  %v1194_v12 = vshll.u32 %v5202_v40, 16  ;;  %v870_v15 = vsel %vm6954_vm5, %v868_v6, %v869_v60 }
  0x5f   : > { %v5470_v10 = vld [vmem:[#allocation2 + $0x10] sm:$0xf]  ;;  %724 = vst [vmem:[#allocation2 + $0xb8] sm:$0xf] %v374_v4  ;;  %v1200_v13 = vshll.u32 %v5203_v61, 16  ;;  %v1204_v14 = vshrl.u32 %v5203_v61, 16 }
  0x60   : > { %998 = vst [vmem:[#allocation2 + $0x98] sm:$0xf] %v867_v5  ;;  %v5169_v16 = vld [vmem:[%s6793_s9 + $0x28] sm:$0xf]  ;;  %v1210_v17 = vshll.u32 %v5204_v63, 16  ;;  %v1196_v19 = vrot.slane %v1194_v12, 5 }
  0x61   : > { %v6327_v18 = vld [vmem:[#allocation2 + $0x30] sm:$0xf0]  ;;  %999 = vst [vmem:[#allocation2 + $0xbc] sm:$0xf] %v870_v15  ;;  %v1202_v20 = vrot.slane %v1200_v13, 5 }
  0x62   : > { %1066 = vst [vmem:[#allocation2 + $0x9c] sm:$0xf] %v5168_v7  ;;  %v1197_v24 = vor.u32 %v1196_v19, %v1193_v11  ;;  %v1212_v28 = vrot.slane %v1210_v17, 5  ;;  %v261_v29 = vld [vmem:[%s6793_s9 + $0x24] sm:$0xf]  ;;  %v6519_v40 = vld [vmem:[%s8129_s1 + $0x1b0] sm:$0xff] }
  0x63   : > { %1067 = vst [vmem:[#allocation2 + $0xc0] sm:$0xf] %v5169_v16  ;;  %v262_v30 = vld [vmem:[%s6793_s9 + $0x28] sm:$0xf]  ;;  %v376_v32 = vshrl.u32 %v261_v29, 16  ;;  %v379_v33 = vshll.u32 %v261_v29, 16  ;;  %4709 = vmatpush.bf16.msra.mxu2 %v6519_v40 }
  0x64   : > { %4217 = vmatmul.bf16.gmra.mxu1 %v5707_v21  ;;  %4237 = vmatmul.bf16.gmra.mxu2 %v5851_v22  ;;  %v1206_v21 = vrot.slane %v1204_v14, 4  ;;  %v5459_v22 = vor.u32 %v6321_v0, %v5456_v1  ;;  %v1198_v31 = vrot.slane %v1197_v24, 4  ;;  %v385_v35 = vshll.u32 %v262_v30, 16  ;;  %v6511_v43 = vld [vmem:[%s8129_s1 + $0x170] sm:$0xff]  ;;  %v263_v47 = vld [vmem:[%s6793_s9 + $0x2c] sm:$0x1] }
  0x65   : > { %4257 = vmatmul.bf16.gmra.mxu3 %v5995_v25  ;;  %v5467_v25 = vor.u32 %v6322_v8, %v5464_v9  ;;  %v389_v36 = vshrl.u32 %v262_v30, 16  ;;  %v378_v38 = vrot.slane %v376_v32, 4  ;;  %v381_v39 = vrot.slane %v379_v33, 5  ;;  %v5205_v50 = vld [vmem:[%s6793_s9 + $0x30] sm:$0xf]  ;;  %4620 = vmatpush.bf16.msra.mxu1 %v6511_v43 }
  0x66   : > { %4197 = vmatmul.bf16.gmra.mxu0 %v5563_v26  ;;  %v5471_v26 = vor.u32 %v6327_v18, %v5470_v10  ;;  %v1207_v27 = vor.u32 %v1206_v21, %v1202_v20  ;;  %v1203_v37 = vsel %vm6940_vm3, %v1198_v31, %v1202_v20  ;;  %v387_v48 = vrot.slane %v385_v35, 5  ;;  %v760_v53 = vld [vmem:[%s6793_s9 + $0x24] sm:$0xe]  ;;  %v761_v54 = vld [vmem:[%s6793_s9 + $0x28] sm:$0xf] }
  0x67   : > { %1562 = vst [vmem:[#allocation2 + $0xa0] sm:$0xf] %v1203_v37  ;;  %v382_v46 = vor.u32 %v381_v39, %v378_v38  ;;  %v391_v49 = vrot.slane %v389_v36, 4  ;;  %v395_v52 = vshll.u32 %v263_v47, 16  ;;  %v762_v56 = vld [vmem:[%s6793_s9 + $0x2c] sm:$0x1] }
  0x68   : > { %v1208_v34 = vrot.slane %v1207_v27, 4  ;;  %v5151_v57 = vrot.slane %v760_v53, 9  ;;  %v873_v58 = vrot.slane %v761_v54, 5  ;;  %v5206_v60 = vld [vmem:[%s6793_s9 + $0x34] sm:$0xf]  ;;  %v876_v63 = vrot.slane %v762_v56, 5 }
  0x69   : > { %v383_v51 = vrot.slane %v382_v46, 4  ;;  %v392_v55 = vor.u32 %v391_v49, %v387_v48  ;;  %v397_v62 = vrot.slane %v395_v52, 5  ;;  %v5170_v0 = vld [vmem:[%s6793_s9 + $0x30] sm:$0xf]  ;;  %v5207_v1 = vld [vmem:[%s6793_s9 + $0x38] sm:$0x1] }
  0x6a   : > { %v1213_v41 = vsel %vm6940_vm3, %v1208_v34, %v1212_v28  ;;  %v6330_v2 = vld [vmem:[#allocation2 + $0x4c] sm:$0xf]  ;;  %v5492_v3 = vld [vmem:[#allocation2 + $0x6c] sm:$0xf0]  ;;  %v6335_v5 = vld [vmem:[#allocation2 + $0x70] sm:$0xf0]  ;;  %v874_v7 = vsel %vm6954_vm5, %v5151_v57, %v873_v58 }
  0x6b   : > { %1563 = vst [vmem:[#allocation2 + $0xc4] sm:$0xf] %v1213_v41  ;;  %v388_v61 = vsel %vm6940_vm3, %v383_v51, %v387_v48  ;;  %v5498_v4 = vld [vmem:[#allocation2 + $0x50] sm:$0xf]  ;;  %v393_v6 = vrot.slane %v392_v55, 4  ;;  %v875_v8 = vrot.slane %v873_v58, 4 }
  0x6c   : > { %725 = vst [vmem:[#allocation2 + $0xdc] sm:$0xf] %v388_v61  ;;  %v1215_v9 = vshrl.u32 %v5205_v50, 16  ;;  %v6331_v10 = vld [vmem:[#allocation2 + $0x54] sm:$0xf]  ;;  %v1218_v14 = vshll.u32 %v5205_v50, 16 }
  0x6d   : > { %v5500_v11 = vld [vmem:[#allocation2 + $0x74] sm:$0xf0]  ;;  %v6336_v13 = vld [vmem:[#allocation2 + $0x78] sm:$0xf0]  ;;  %1000 = vst [vmem:[#allocation2 + $0xe0] sm:$0xf] %v874_v7  ;;  %v398_v16 = vsel %vm6940_vm3, %v393_v6, %v397_v62  ;;  %v877_v17 = vsel %vm6954_vm5, %v875_v8, %v876_v63 }
  0x6e   : > { %v5506_v12 = vld [vmem:[#allocation2 + $0x58] sm:$0xf]  ;;  %v1224_v15 = vshll.u32 %v5206_v60, 16  ;;  %v5171_v18 = vld [vmem:[%s6793_s9 + $0x34] sm:$0xf]  ;;  %v1217_v19 = vrot.slane %v1215_v9, 4  ;;  %v5503_v28 = vor.u32 %v6331_v10, %v5500_v11 }
  0x6f   : > { %1068 = vst [vmem:[#allocation2 + $0xe4] sm:$0xf] %v5170_v0  ;;  %v1228_v20 = vshrl.u32 %v5206_v60, 16  ;;  %v1220_v21 = vrot.slane %v1218_v14, 5  ;;  %v5507_v29 = vor.u32 %v6336_v13, %v5506_v12  ;;  %v264_v32 = vld [vmem:[%s6793_s9 + $0x30] sm:$0xf] }
  0x70   : > { %726 = vst [vmem:[#allocation2 + $0x100] sm:$0xf] %v398_v16  ;;  %v265_v33 = vld [vmem:[%s6793_s9 + $0x34] sm:$0xf]  ;;  %v400_v35 = vshrl.u32 %v264_v32, 16  ;;  %v403_v36 = vshll.u32 %v264_v32, 16 }
  0x71   : > { %1001 = vst [vmem:[#allocation2 + $0x104] sm:$0xf] %v877_v17  ;;  %v1230_v24 = vrot.slane %v1228_v20, 4  ;;  %v1221_v27 = vor.u32 %v1220_v21, %v1217_v19  ;;  %v409_v37 = vshll.u32 %v265_v33, 16  ;;  %v413_v39 = vshrl.u32 %v265_v33, 16 }
  0x72   : > { %1069 = vst [vmem:[#allocation2 + $0x108] sm:$0xf] %v5171_v18  ;;  %v402_v41 = vrot.slane %v400_v35, 4  ;;  %v405_v42 = vrot.slane %v403_v36, 5  ;;  %v266_v46 = vld [vmem:[%s6793_s9 + $0x38] sm:$0x1] }
  0x73   : > { %v1222_v34 = vrot.slane %v1221_v27, 4  ;;  %v411_v45 = vrot.slane %v409_v37, 5  ;;  %v415_v48 = vrot.slane %v413_v39, 4  ;;  %v419_v49 = vshll.u32 %v266_v46, 16  ;;  %v763_v50 = vld [vmem:[%s6793_s9 + $0x30] sm:$0xe] }
  0x74   : > { %4271 = vmatmul.bf16.vlgmr.msrb.gmra.mxu1 %v5459_v22  ;;  %4360 = vmatmul.bf16.vlgmr.msrb.gmra.mxu2 %v5463_v23  ;;  %v1226_v22 = vrot.slane %v1224_v15, 5  ;;  %v1234_v23 = vshll.u32 %v5207_v1, 16  ;;  %v406_v47 = vor.u32 %v405_v42, %v402_v41  ;;  %v5208_v51 = vld [vmem:[%s6793_s9 + $0x3c] sm:$0xf]  ;;  %v764_v53 = vld [vmem:[%s6793_s9 + $0x34] sm:$0xf] }
  0x75   : > { %4449 = vmatmul.bf16.vlgmr.msrb.gmra.mxu3 %v5467_v25  ;;  %v5495_v25 = vor.u32 %v6330_v2, %v5492_v3  ;;  %v765_v54 = vld [vmem:[%s6793_s9 + $0x38] sm:$0x1]  ;;  %v5152_v55 = vrot.slane %v763_v50, 9  ;;  %v416_v56 = vor.u32 %v415_v48, %v411_v45  ;;  %v421_v57 = vrot.slane %v419_v49, 5  ;;  %v5209_v61 = vld [vmem:[%s6793_s9 + $0x40] sm:$0xf] }
  0x76   : > { %4538 = vmatmul.bf16.vlgmr.msrb.gmra.mxu0 %v5471_v26  ;;  %v5499_v26 = vor.u32 %v6335_v5, %v5498_v4  ;;  %v1231_v30 = vor.u32 %v1230_v24, %v1226_v22  ;;  %v1236_v31 = vrot.slane %v1234_v23, 5  ;;  %v1227_v40 = vsel %vm6940_vm3, %v1222_v34, %v1226_v22  ;;  %v5172_v63 = vld [vmem:[%s6793_s9 + $0x3c] sm:$0xf]  ;;  %v5210_v0 = vld [vmem:[%s6793_s9 + $0x44] sm:$0x1]  ;;  %v6518_v42 = vld [vmem:[%s8129_s1 + $0x1a8] sm:$0xff] }
  0x77   : > { %1564 = vst [vmem:[#allocation2 + $0xe8] sm:$0xf] %v1227_v40  ;;  %v407_v52 = vrot.slane %v406_v47, 4  ;;  %v880_v58 = vrot.slane %v764_v53, 5  ;;  %v883_v60 = vrot.slane %v765_v54, 5  ;;  %v417_v5 = vrot.slane %v416_v56, 4  ;;  %4710 = vmatpush.bf16.msra.mxu2 %v6518_v42 }
  0x78   : > { %v1232_v38 = vrot.slane %v1231_v30, 4  ;;  %v6339_v1 = vld [vmem:[#allocation2 + $0x94] sm:$0xf]  ;;  %v5528_v2 = vld [vmem:[#allocation2 + $0xb4] sm:$0xf0]  ;;  %v1239_v8 = vshrl.u32 %v5208_v51, 16 }
  0x79   : > { %v412_v62 = vsel %vm6940_vm3, %v407_v52, %v411_v45  ;;  %v5534_v3 = vld [vmem:[#allocation2 + $0x98] sm:$0xf]  ;;  %v6344_v4 = vld [vmem:[#allocation2 + $0xb8] sm:$0xf0]  ;;  %v881_v6 = vsel %vm6954_vm5, %v5152_v55, %v880_v58  ;;  %v882_v7 = vrot.slane %v880_v58, 4  ;;  %v1242_v13 = vshll.u32 %v5208_v51, 16 }
  0x7a   : > { %v1237_v43 = vsel %vm6940_vm3, %v1232_v38, %v1236_v31  ;;  %727 = vst [vmem:[#allocation2 + $0x124] sm:$0xf] %v412_v62  ;;  %v6340_v9 = vld [vmem:[#allocation2 + $0x9c] sm:$0xf]  ;;  %v5536_v10 = vld [vmem:[#allocation2 + $0xbc] sm:$0xf0]  ;;  %v422_v15 = vsel %vm6940_vm3, %v417_v5, %v421_v57  ;;  %v5531_v24 = vor.u32 %v6339_v1, %v5528_v2 }
  0x7b   : > { %1565 = vst [vmem:[#allocation2 + $0x10c] sm:$0xf] %v1237_v43  ;;  %v5542_v11 = vld [vmem:[#allocation2 + $0xa0] sm:$0xf]  ;;  %v6345_v12 = vld [vmem:[#allocation2 + $0xc0] sm:$0xf0]  ;;  %v884_v16 = vsel %vm6954_vm5, %v882_v7, %v883_v60  ;;  %v5539_v27 = vor.u32 %v6340_v9, %v5536_v10 }
  0x7c   : > { %1002 = vst [vmem:[#allocation2 + $0x128] sm:$0xf] %v881_v6  ;;  %v1248_v14 = vshll.u32 %v5209_v61, 16  ;;  %v5173_v17 = vld [vmem:[%s6793_s9 + $0x40] sm:$0xf]  ;;  %v1241_v18 = vrot.slane %v1239_v8, 4 }
  0x7d   : > { %1070 = vst [vmem:[#allocation2 + $0x12c] sm:$0xf] %v5172_v63  ;;  %v1252_v19 = vshrl.u32 %v5209_v61, 16  ;;  %v1244_v20 = vrot.slane %v1242_v13, 5  ;;  %v1258_v22 = vshll.u32 %v5210_v0, 16  ;;  %v6526_v45 = vld [vmem:[%s8129_s1 + $0x1e8] sm:$0xff] }
  0x7e   : > { %728 = vst [vmem:[#allocation2 + $0x148] sm:$0xf] %v422_v15  ;;  %v1250_v21 = vrot.slane %v1248_v14, 5  ;;  %v267_v31 = vld [vmem:[%s6793_s9 + $0x3c] sm:$0xf]  ;;  %4799 = vmatpush.bf16.msra.mxu3 %v6526_v45  ;;  %v6510_v57 = vld [vmem:[%s8129_s1 + $0x168] sm:$0xff] }
  0x7f   : > { %1003 = vst [vmem:[#allocation2 + $0x14c] sm:$0xf] %v884_v16  ;;  %v1254_v23 = vrot.slane %v1252_v19, 4  ;;  %v1260_v30 = vrot.slane %v1258_v22, 5  ;;  %v268_v32 = vld [vmem:[%s6793_s9 + $0x40] sm:$0xf]  ;;  %4621 = vmatpush.bf16.msra.mxu1 %v6510_v57 }
  0x80   : > { %1071 = vst [vmem:[#allocation2 + $0x150] sm:$0xf] %v5173_v17  ;;  %v424_v34 = vshrl.u32 %v267_v31, 16  ;;  %v427_v35 = vshll.u32 %v267_v31, 16  ;;  %v433_v36 = vshll.u32 %v268_v32, 16  ;;  %v437_v38 = vshrl.u32 %v268_v32, 16 }
  0x81   : > { %v269_v47 = vld [vmem:[%s6793_s9 + $0x44] sm:$0x1]  ;;  %v766_v51 = vld [vmem:[%s6793_s9 + $0x3c] sm:$0xe]  ;;  %v5211_v52 = vld [vmem:[%s6793_s9 + $0x48] sm:$0xf] }
  0x82   : > { %v426_v40 = vrot.slane %v424_v34, 4  ;;  %v429_v41 = vrot.slane %v427_v35, 5  ;;  %v435_v46 = vrot.slane %v433_v36, 5  ;;  %v439_v49 = vrot.slane %v437_v38, 4  ;;  %v767_v54 = vld [vmem:[%s6793_s9 + $0x40] sm:$0xf] }
  0x83   : > { %v443_v50 = vshll.u32 %v269_v47, 16  ;;  %v768_v55 = vld [vmem:[%s6793_s9 + $0x44] sm:$0x1]  ;;  %v5153_v56 = vrot.slane %v766_v51, 9  ;;  %v887_v61 = vrot.slane %v767_v54, 5  ;;  %v6534_v7 = vld [vmem:[%s8129_s1 + $0x228] sm:$0xff] }
  0x84   : > { %4276 = vmatmul.bf16.gmra.mxu1 %v5495_v25  ;;  %4365 = vmatmul.bf16.gmra.mxu2 %v5499_v26  ;;  %v5535_v25 = vor.u32 %v6344_v4, %v5534_v3  ;;  %v1245_v26 = vor.u32 %v1244_v20, %v1241_v18  ;;  %v430_v48 = vor.u32 %v429_v41, %v426_v40  ;;  %v890_v62 = vrot.slane %v768_v55, 5  ;;  %v5212_v63 = vld [vmem:[%s6793_s9 + $0x4c] sm:$0xf]  ;;  %v5174_v1 = vld [vmem:[%s6793_s9 + $0x48] sm:$0xf] }
  0x85   : > { %4454 = vmatmul.bf16.gmra.mxu3 %v5503_v28  ;;  %v5543_v28 = vor.u32 %v6345_v12, %v5542_v11  ;;  %v440_v58 = vor.u32 %v439_v49, %v435_v46  ;;  %v445_v60 = vrot.slane %v443_v50, 5  ;;  %v5213_v2 = vld [vmem:[%s6793_s9 + $0x50] sm:$0x1]  ;;  %v6348_v3 = vld [vmem:[#allocation2 + $0xdc] sm:$0xf]  ;;  %v888_v9 = vsel %vm6954_vm5, %v5153_v56, %v887_v61  ;;  %4888 = vmatpush.bf16.msra.mxu0 %v6534_v7 }
  0x86   : > { %4543 = vmatmul.bf16.gmra.mxu0 %v5507_v29  ;;  %v1255_v29 = vor.u32 %v1254_v23, %v1250_v21  ;;  %v1246_v33 = vrot.slane %v1245_v26, 4  ;;  %v431_v53 = vrot.slane %v430_v48, 4  ;;  %v5564_v4 = vld [vmem:[#allocation2 + $0xfc] sm:$0xf0]  ;;  %v6353_v6 = vld [vmem:[#allocation2 + $0x100] sm:$0xf0] }
  0x87   : > { %v5570_v5 = vld [vmem:[#allocation2 + $0xe0] sm:$0xf]  ;;  %v441_v8 = vrot.slane %v440_v58, 4  ;;  %v889_v10 = vrot.slane %v887_v61, 4  ;;  %v1263_v11 = vshrl.u32 %v5211_v52, 16  ;;  %v1266_v16 = vshll.u32 %v5211_v52, 16 }
  0x88   : > { %v1256_v37 = vrot.slane %v1255_v29, 4  ;;  %v1251_v39 = vsel %vm6940_vm3, %v1246_v33, %v1250_v21  ;;  %v436_v0 = vsel %vm6940_vm3, %v431_v53, %v435_v46  ;;  %v6349_v12 = vld [vmem:[#allocation2 + $0xe4] sm:$0xf]  ;;  %v5572_v13 = vld [vmem:[#allocation2 + $0x104] sm:$0xf0]  ;;  %v1272_v17 = vshll.u32 %v5212_v63, 16 }
  0x89   : > { %1566 = vst [vmem:[#allocation2 + $0x130] sm:$0xf] %v1251_v39  ;;  %v5578_v14 = vld [vmem:[#allocation2 + $0xe8] sm:$0xf]  ;;  %v6354_v15 = vld [vmem:[#allocation2 + $0x108] sm:$0xf0]  ;;  %v446_v18 = vsel %vm6940_vm3, %v441_v8, %v445_v60  ;;  %v891_v19 = vsel %vm6954_vm5, %v889_v10, %v890_v62 }
  0x8a   : > { %v1261_v43 = vsel %vm6940_vm3, %v1256_v37, %v1260_v30  ;;  %729 = vst [vmem:[#allocation2 + $0x16c] sm:$0xf] %v436_v0  ;;  %v5175_v20 = vld [vmem:[%s6793_s9 + $0x4c] sm:$0xf]  ;;  %v1265_v21 = vrot.slane %v1263_v11, 4  ;;  %v1276_v22 = vshrl.u32 %v5212_v63, 16  ;;  %v5575_v30 = vor.u32 %v6349_v12, %v5572_v13 }
  0x8b   : > { %1567 = vst [vmem:[#allocation2 + $0x154] sm:$0xf] %v1261_v43  ;;  %v1268_v23 = vrot.slane %v1266_v16, 5  ;;  %v5579_v31 = vor.u32 %v6354_v15, %v5578_v14  ;;  %v270_v34 = vld [vmem:[%s6793_s9 + $0x48] sm:$0xf] }
  0x8c   : > { %1004 = vst [vmem:[#allocation2 + $0x170] sm:$0xf] %v888_v9  ;;  %v1278_v26 = vrot.slane %v1276_v22, 4  ;;  %v271_v35 = vld [vmem:[%s6793_s9 + $0x4c] sm:$0xf]  ;;  %v448_v37 = vshrl.u32 %v270_v34, 16 }
  0x8d   : > { %1072 = vst [vmem:[#allocation2 + $0x174] sm:$0xf] %v5174_v1  ;;  %v1269_v29 = vor.u32 %v1268_v23, %v1265_v21  ;;  %v451_v38 = vshll.u32 %v270_v34, 16  ;;  %v457_v39 = vshll.u32 %v271_v35, 16  ;;  %v461_v41 = vshrl.u32 %v271_v35, 16 }
  0x8e   : > { %730 = vst [vmem:[#allocation2 + $0x190] sm:$0xf] %v446_v18  ;;  %v450_v43 = vrot.slane %v448_v37, 4  ;;  %v272_v48 = vld [vmem:[%s6793_s9 + $0x50] sm:$0x1] }
  0x8f   : > { %1005 = vst [vmem:[#allocation2 + $0x194] sm:$0xf] %v891_v19  ;;  %v1270_v36 = vrot.slane %v1269_v29, 4  ;;  %v453_v45 = vrot.slane %v451_v38, 5  ;;  %v459_v46 = vrot.slane %v457_v39, 5  ;;  %v463_v50 = vrot.slane %v461_v41, 4 }
  0x90   : > { %1073 = vst [vmem:[#allocation2 + $0x198] sm:$0xf] %v5175_v20  ;;  %v467_v51 = vshll.u32 %v272_v48, 16  ;;  %v5214_v52 = vld [vmem:[%s6793_s9 + $0x54] sm:$0xf] }
  0x91   : > { %v454_v49 = vor.u32 %v453_v45, %v450_v43  ;;  %v769_v53 = vld [vmem:[%s6793_s9 + $0x48] sm:$0xe]  ;;  %v770_v54 = vld [vmem:[%s6793_s9 + $0x4c] sm:$0xf]  ;;  %v464_v56 = vor.u32 %v463_v50, %v459_v46  ;;  %v771_v58 = vld [vmem:[%s6793_s9 + $0x50] sm:$0x1] }
  0x92   : > { %v469_v57 = vrot.slane %v467_v51, 5  ;;  %v5215_v60 = vld [vmem:[%s6793_s9 + $0x58] sm:$0xf]  ;;  %v5154_v61 = vrot.slane %v769_v53, 9  ;;  %v894_v62 = vrot.slane %v770_v54, 5  ;;  %v897_v63 = vrot.slane %v771_v58, 5 }
  0x93   : > { %v455_v55 = vrot.slane %v454_v49, 4  ;;  %v1287_v0 = vshrl.u32 %v5214_v52, 16  ;;  %v6357_v1 = vld [vmem:[#allocation2 + $0x124] sm:$0xf]  ;;  %v5606_v7 = vld [vmem:[#allocation2 + $0x128] sm:$0xf] }
  0x94   : > { %4281 = vmatmul.bf16.gmra.mxu1 %v5531_v24  ;;  %4370 = vmatmul.bf16.gmra.mxu2 %v5535_v25  ;;  %v1274_v24 = vrot.slane %v1272_v17, 5  ;;  %v1282_v25 = vshll.u32 %v5213_v2, 16  ;;  %v5600_v2 = vld [vmem:[#allocation2 + $0x144] sm:$0xf0]  ;;  %v6362_v8 = vld [vmem:[#allocation2 + $0x148] sm:$0xf0]  ;;  %v895_v9 = vsel %vm6954_vm5, %v5154_v61, %v894_v62 }
  0x95   : > { %4459 = vmatmul.bf16.gmra.mxu3 %v5539_v27  ;;  %v5567_v27 = vor.u32 %v6348_v3, %v5564_v4  ;;  %v460_v3 = vsel %vm6940_vm3, %v455_v55, %v459_v46  ;;  %v465_v4 = vrot.slane %v464_v56, 4  ;;  %v896_v10 = vrot.slane %v894_v62, 4  ;;  %v7144_v13 = vld [vmem:[%s8130_s2] ss:$0 sm:$0xff]  ;;  %v6358_v14 = vld [vmem:[#allocation2 + $0x12c] sm:$0xf] }
  0x96   : > { %4548 = vmatmul.bf16.gmra.mxu0 %v5543_v28  ;;  %v5571_v28 = vor.u32 %v6353_v6, %v5570_v5  ;;  %v1279_v32 = vor.u32 %v1278_v26, %v1274_v24  ;;  %v1284_v33 = vrot.slane %v1282_v25, 5  ;;  %v1275_v42 = vsel %vm6940_vm3, %v1270_v36, %v1274_v24  ;;  %v5216_v5 = vld [vmem:[%s6793_s9 + $0x5c] sm:$0x1]  ;;  %731 = vst [vmem:[#allocation2 + $0x1b4] sm:$0xf] %v460_v3  ;;  %v6517_v49 = vld [vmem:[%s8129_s1 + $0x1a0] sm:$0xff] }
  0x97   : > { %1568 = vst [vmem:[#allocation2 + $0x178] sm:$0xf] %v1275_v42  ;;  %v1290_v6 = vshll.u32 %v5214_v52, 16  ;;  %v1289_v11 = vrot.slane %v1287_v0, 4  ;;  %v1296_v12 = vshll.u32 %v5215_v60, 16  ;;  %v470_v17 = vsel %vm6940_vm3, %v465_v4, %v469_v57  ;;  %v6525_v50 = vld [vmem:[%s8129_s1 + $0x1e0] sm:$0xff]  ;;  %4711 = vmatpush.bf16.msra.mxu2 %v6517_v49 }
  0x98   : > { %v1280_v40 = vrot.slane %v1279_v32, 4  ;;  %v5608_v15 = vld [vmem:[#allocation2 + $0x14c] sm:$0xf0]  ;;  %1006 = vst [vmem:[#allocation2 + $0x1b8] sm:$0xf] %v895_v9  ;;  %v1300_v20 = vshrl.u32 %v5215_v60, 16  ;;  %v898_v21 = vsel %vm6954_vm5, %v896_v10, %v897_v63  ;;  %v5607_v29 = vor.u32 %v6362_v8, %v5606_v7  ;;  %4800 = vmatpush.bf16.msra.mxu3 %v6525_v50 }
  0x99   : > { %v5614_v16 = vld [vmem:[#allocation2 + $0x130] sm:$0xf]  ;;  %v5176_v18 = vld [vmem:[%s6793_s9 + $0x54] sm:$0xf]  ;;  %v1292_v19 = vrot.slane %v1290_v6, 5  ;;  %v1298_v23 = vrot.slane %v1296_v12, 5  ;;  %v5611_v34 = vor.u32 %v6358_v14, %v5608_v15 }
  0x9a   : > { %v1285_v47 = vsel %vm6940_vm3, %v1280_v40, %v1284_v33  ;;  %732 = vst [vmem:[#allocation2 + $0x1d8] sm:$0xf] %v470_v17  ;;  %v5177_v22 = vld [vmem:[%s6793_s9 + $0x58] sm:$0xf]  ;;  %v1306_v24 = vshll.u32 %v5216_v5, 16  ;;  %v6509_v3 = vld [vmem:[%s8129_s1 + $0x160] sm:$0xff] }
  0x9b   : > { %1569 = vst [vmem:[#allocation2 + $0x19c] sm:$0xf] %v1285_v47  ;;  %v6363_v25 = vld [vmem:[#allocation2 + $0x150] sm:$0xf0]  ;;  %v1293_v26 = vor.u32 %v1292_v19, %v1289_v11  ;;  %v274_v37 = vld [vmem:[%s6793_s9 + $0x58] sm:$0xf]  ;;  %4622 = vmatpush.bf16.msra.mxu1 %v6509_v3 }
  0x9c   : > { %1007 = vst [vmem:[#allocation2 + $0x1dc] sm:$0xf] %v898_v21  ;;  %v1308_v32 = vrot.slane %v1306_v24, 5  ;;  %v5615_v35 = vor.u32 %v6363_v25, %v5614_v16  ;;  %v273_v36 = vld [vmem:[%s6793_s9 + $0x54] sm:$0xf]  ;;  %v481_v45 = vshll.u32 %v274_v37, 16 }
  0x9d   : > { %1074 = vst [vmem:[#allocation2 + $0x1bc] sm:$0xf] %v5176_v18  ;;  %v472_v42 = vshrl.u32 %v273_v36, 16  ;;  %v475_v43 = vshll.u32 %v273_v36, 16  ;;  %v485_v48 = vshrl.u32 %v274_v37, 16  ;;  %v6533_v17 = vld [vmem:[%s8129_s1 + $0x220] sm:$0xff] }
  0x9e   : > { %1075 = vst [vmem:[#allocation2 + $0x1e0] sm:$0xf] %v5177_v22  ;;  %v275_v51 = vld [vmem:[%s6793_s9 + $0x5c] sm:$0x1]  ;;  %v483_v53 = vrot.slane %v481_v45, 5  ;;  %4889 = vmatpush.bf16.msra.mxu0 %v6533_v17 }
  0x9f   : > { %v474_v47 = vrot.slane %v472_v42, 4  ;;  %v477_v52 = vrot.slane %v475_v43, 5  ;;  %v487_v55 = vrot.slane %v485_v48, 4  ;;  %v491_v56 = vshll.u32 %v275_v51, 16  ;;  %v772_v57 = vld [vmem:[%s6793_s9 + $0x54] sm:$0xe] }
  0xa0   : > { %v773_v62 = vld [vmem:[%s6793_s9 + $0x58] sm:$0xf]  ;;  %v774_v63 = vld [vmem:[%s6793_s9 + $0x5c] sm:$0x1]  ;;  %v5155_v0 = vrot.slane %v772_v57, 9 }
  0xa1   : > { %v478_v61 = vor.u32 %v477_v52, %v474_v47  ;;  %v488_v4 = vor.u32 %v487_v55, %v483_v53  ;;  %v493_v5 = vrot.slane %v491_v56, 5  ;;  %v901_v6 = vrot.slane %v773_v62, 5  ;;  %v6366_v9 = vld [vmem:[#allocation2 + $0x16c] sm:$0xf]  ;;  %v5636_v10 = vld [vmem:[#allocation2 + $0x18c] sm:$0xf0] }
  0xa2   : > { %v5642_v11 = vld [vmem:[#allocation2 + $0x170] sm:$0xf]  ;;  %v6371_v12 = vld [vmem:[#allocation2 + $0x190] sm:$0xf0]  ;;  %v904_v15 = vrot.slane %v774_v63, 5 }
  0xa3   : > { %v479_v14 = vrot.slane %v478_v61, 4  ;;  %v5217_v16 = vld [vmem:[%s6793_s9 + $0x60] sm:$0xf]  ;;  %v489_v18 = vrot.slane %v488_v4, 4  ;;  %v902_v19 = vsel %vm6954_vm5, %v5155_v0, %v901_v6  ;;  %v5218_v21 = vld [vmem:[%s6793_s9 + $0x64] sm:$0xf] }
  0xa4   : > { %4286 = vmatmul.bf16.gmra.mxu1 %v5567_v27  ;;  %4375 = vmatmul.bf16.gmra.mxu2 %v5571_v28  ;;  %v1302_v27 = vrot.slane %v1300_v20, 4  ;;  %v5603_v28 = vor.u32 %v6357_v1, %v5600_v2  ;;  %v903_v20 = vrot.slane %v901_v6, 4  ;;  %v6367_v22 = vld [vmem:[#allocation2 + $0x174] sm:$0xf]  ;;  %v5650_v24 = vld [vmem:[#allocation2 + $0x178] sm:$0xf] }
  0xa5   : > { %4464 = vmatmul.bf16.gmra.mxu3 %v5575_v30  ;;  %v1294_v30 = vrot.slane %v1293_v26, 4  ;;  %v6372_v25 = vld [vmem:[#allocation2 + $0x198] sm:$0xf0]  ;;  %v484_v26 = vsel %vm6940_vm3, %v479_v14, %v483_v53  ;;  %1008 = vst [vmem:[#allocation2 + $0x200] sm:$0xf] %v902_v19 }
  0xa6   : > { %4553 = vmatmul.bf16.gmra.mxu0 %v5579_v31  ;;  %v1303_v31 = vor.u32 %v1302_v27, %v1298_v23  ;;  %v5178_v27 = vld [vmem:[%s6793_s9 + $0x60] sm:$0xf]  ;;  %733 = vst [vmem:[#allocation2 + $0x1fc] sm:$0xf] %v484_v26  ;;  %v5651_v52 = vor.u32 %v6372_v25, %v5650_v24  ;;  %v277_v61 = vld [vmem:[%s6793_s9 + $0x64] sm:$0xf] }
  0xa7   : > { %v1299_v40 = vsel %vm6940_vm3, %v1294_v30, %v1298_v23  ;;  %v5644_v23 = vld [vmem:[#allocation2 + $0x194] sm:$0xf0]  ;;  %v905_v30 = vsel %vm6954_vm5, %v903_v20, %v904_v15  ;;  %1076 = vst [vmem:[#allocation2 + $0x204] sm:$0xf] %v5178_v27  ;;  %v505_v0 = vshll.u32 %v277_v61, 16 }
  0xa8   : > { %v1304_v41 = vrot.slane %v1303_v31, 4  ;;  %1570 = vst [vmem:[#allocation2 + $0x1c0] sm:$0xf] %v1299_v40  ;;  %v5179_v31 = vld [vmem:[%s6793_s9 + $0x64] sm:$0xf]  ;;  %v5639_v40 = vor.u32 %v6366_v9, %v5636_v10  ;;  %v5647_v51 = vor.u32 %v6367_v22, %v5644_v23 }
  0xa9   : > { %1009 = vst [vmem:[#allocation2 + $0x224] sm:$0xf] %v905_v30  ;;  %v278_v6 = vld [vmem:[%s6793_s9 + $0x68] sm:$0x1]  ;;  %v507_v10 = vrot.slane %v505_v0, 5 }
  0xaa   : > { %v1309_v46 = vsel %vm6940_vm3, %v1304_v41, %v1308_v32  ;;  %v1311_v32 = vshrl.u32 %v5217_v16, 16  ;;  %v5643_v41 = vor.u32 %v6371_v12, %v5642_v11  ;;  %1077 = vst [vmem:[#allocation2 + $0x228] sm:$0xf] %v5179_v31  ;;  %v776_v15 = vld [vmem:[%s6793_s9 + $0x64] sm:$0xf] }
  0xab   : > { %1571 = vst [vmem:[#allocation2 + $0x1e4] sm:$0xf] %v1309_v46  ;;  %v908_v19 = vrot.slane %v776_v15, 5  ;;  %v775_v23 = vld [vmem:[%s6793_s9 + $0x60] sm:$0xe] }
  0xac   : > { %v1313_v42 = vrot.slane %v1311_v32, 4  ;;  %v6375_v32 = vld [vmem:[#allocation2 + $0x1b4] sm:$0xf] }
  0xb1   : > { %v4203_v33 = vpop.f32.mrf.mxu1 }
  0xb2   : > { %v7155_v38 = vadd.f32 %v7144_v13, %v4203_v33  ;;  %v1314_v33 = vshll.u32 %v5217_v16, 16  ;;  %v6381_v0 = vld [vmem:[#allocation2 + $0x1e0] sm:$0xf0] }
  0xb3   : > { %v7157_v39 = vpop.f32.mrf.mxu0 }
  0xb4   : > { %4291 = vmatmul.bf16.gmra.mxu1 %v5603_v28  ;;  %4380 = vmatmul.bf16.gmra.mxu2 %v5607_v29  ;;  %v5219_v28 = vld [vmem:[%s6793_s9 + $0x68] sm:$0x1]  ;;  %v494_v29 = vsel %vm6940_vm3, %v489_v18, %v493_v5  ;;  %v1316_v46 = vrot.slane %v1314_v33, 5  ;;  %v515_v18 = vshll.u32 %v278_v6, 16  ;;  %v5672_v33 = vld [vmem:[#allocation2 + $0x1d4] sm:$0xf0] }
  0xb5   : > { %4469 = vmatmul.bf16.gmra.mxu3 %v5611_v34  ;;  %734 = vst [vmem:[#allocation2 + $0x220] sm:$0xf] %v494_v29  ;;  %v1320_v34 = vshll.u32 %v5218_v21, 16  ;;  %v1330_v36 = vshll.u32 %v5219_v28, 16  ;;  %v777_v28 = vld [vmem:[%s6793_s9 + $0x68] sm:$0x1] }
  0xb6   : > { %4558 = vmatmul.bf16.gmra.mxu0 %v5615_v35  ;;  %v1324_v35 = vshrl.u32 %v5218_v21, 16  ;;  %v1317_v57 = vor.u32 %v1316_v46, %v1313_v42  ;;  %v517_v27 = vrot.slane %v515_v18, 5  ;;  %v5220_v29 = vld [vmem:[%s6793_s9 + $0x6c] sm:$0xf]  ;;  %v6376_v42 = vld [vmem:[#allocation2 + $0x1bc] sm:$0xf] }
  0xb7   : > { %v4223_v54 = vpop.f32.mrf.mxu2  ;;  %v1322_v47 = vrot.slane %v1320_v34, 5  ;;  %v1332_v53 = vrot.slane %v1330_v36, 5  ;;  %v910_v36 = vrot.slane %v908_v19, 4 }
  0xb8   : > { %v7172_v58 = vadd.f32 %v7144_v13, %v4223_v54  ;;  %v4243_v60 = vpop.f32.mrf.mxu3  ;;  %v1326_v48 = vrot.slane %v1324_v35, 4  ;;  %v276_v54 = vld [vmem:[%s6793_s9 + $0x60] sm:$0xf]  ;;  %v1318_v3 = vrot.slane %v1317_v57, 4  ;;  %v5156_v35 = vrot.slane %v775_v23, 9 }
  0xb9   : > { %v7177_v1 = vadd.f32 %v7144_v13, %v4243_v60  ;;  %v4205_v2 = vpop.f32.mrf.mxu1  ;;  %v496_v62 = vshrl.u32 %v276_v54, 16  ;;  %v499_v63 = vshll.u32 %v276_v54, 16  ;;  %v5221_v54 = vld [vmem:[%s6793_s9 + $0x70] sm:$0xf]  ;;  %v5222_v57 = vld [vmem:[%s6793_s9 + $0x74] sm:$0x1] }
  0xba   : > { %v7183_v7 = vadd.f32 %v7144_v13, %v4205_v2  ;;  %v1327_v60 = vor.u32 %v1326_v48, %v1322_v47  ;;  %v509_v2 = vshrl.u32 %v277_v61, 16  ;;  %v1323_v11 = vsel %vm6940_vm3, %v1318_v3, %v1322_v47  ;;  %v5181_v48 = vld [vmem:[%s6793_s9 + $0x70] sm:$0xf] }
  0xbb   : > { %v7185_v8 = vpop.f32.mrf.mxu0  ;;  %v498_v5 = vrot.slane %v496_v62, 4  ;;  %v501_v9 = vrot.slane %v499_v63, 5  ;;  %1572 = vst [vmem:[#allocation2 + $0x208] sm:$0xf] %v1323_v11  ;;  %v911_v47 = vrot.slane %v777_v28, 5  ;;  %v1338_v62 = vshll.u32 %v5220_v29, 16 }
  0xbc   : > { %v1328_v4 = vrot.slane %v1327_v60, 4  ;;  %v511_v14 = vrot.slane %v509_v2, 4  ;;  %v1344_v63 = vshll.u32 %v5221_v54, 16  ;;  %v1348_v2 = vshrl.u32 %v5221_v54, 16  ;;  %1079 = vst [vmem:[#allocation2 + $0x270] sm:$0xf] %v5181_v48 }
  0xbd   : > { %v502_v17 = vor.u32 %v501_v9, %v498_v5  ;;  %v912_v60 = vsel %vm6954_vm5, %v910_v36, %v911_v47  ;;  %v1354_v3 = vshll.u32 %v5222_v57, 16  ;;  %v5675_v5 = vor.u32 %v6375_v32, %v5672_v33  ;;  %v280_v23 = vld [vmem:[%s6793_s9 + $0x70] sm:$0xf]  ;;  %v281_v48 = vld [vmem:[%s6793_s9 + $0x74] sm:$0x1] }
  0xbe   : > { %v1333_v12 = vsel %vm6940_vm3, %v1328_v4, %v1332_v53  ;;  %v512_v22 = vor.u32 %v511_v14, %v507_v10  ;;  %v909_v53 = vsel %vm6954_vm5, %v5156_v35, %v908_v19  ;;  %1011 = vst [vmem:[#allocation2 + $0x26c] sm:$0xf] %v912_v60  ;;  %v1340_v6 = vrot.slane %v1338_v62, 5  ;;  %v779_v62 = vld [vmem:[%s6793_s9 + $0x70] sm:$0xf] }
  0xbf   : > { %v4225_v37 = vpop.f32.mrf.mxu2  ;;  %1573 = vst [vmem:[#allocation2 + $0x22c] sm:$0xf] %v1333_v12  ;;  %v503_v26 = vrot.slane %v502_v17, 4  ;;  %v1346_v9 = vrot.slane %v1344_v63, 5  ;;  %v1350_v15 = vrot.slane %v1348_v2, 4  ;;  %v529_v33 = vshll.u32 %v280_v23, 16 }
  0xc0   : > { %v7204_v43 = vadd.f32 %v7144_v13, %v4225_v37  ;;  %v4245_v45 = vpop.f32.mrf.mxu3  ;;  %v513_v34 = vrot.slane %v512_v22, 4  ;;  %v5180_v37 = vld [vmem:[%s6793_s9 + $0x6c] sm:$0xf]  ;;  %1010 = vst [vmem:[#allocation2 + $0x248] sm:$0xf] %v909_v53  ;;  %v539_v53 = vshll.u32 %v281_v48, 16 }
  0xc1   : > { %v7207_v49 = vadd.f32 %v7144_v13, %v4245_v45  ;;  %v4208_v50 = vpop.f32.mrf.mxu1  ;;  %v5680_v45 = vld [vmem:[#allocation2 + $0x1dc] sm:$0xf0]  ;;  %v508_v46 = vsel %vm6940_vm3, %v503_v26, %v507_v10  ;;  %1078 = vst [vmem:[#allocation2 + $0x24c] sm:$0xf] %v5180_v37  ;;  %v279_v22 = vld [vmem:[%s6793_s9 + $0x6c] sm:$0xf] }
  0xc2   : > { %v7211_v55 = vadd.f32 %v7144_v13, %v4208_v50  ;;  %v1335_v50 = vshrl.u32 %v5220_v29, 16  ;;  %735 = vst [vmem:[#allocation2 + $0x244] sm:$0xf] %v508_v46  ;;  %v5683_v14 = vor.u32 %v6376_v42, %v5680_v45  ;;  %v520_v28 = vshrl.u32 %v279_v22, 16  ;;  %v6524_v42 = vld [vmem:[%s8129_s1 + $0x1d8] sm:$0xff] }
  0xc3   : > { %v7213_v56 = vpop.f32.mrf.mxu0  ;;  %v523_v29 = vshll.u32 %v279_v22, 16  ;;  %v531_v45 = vrot.slane %v529_v33, 5  ;;  %4801 = vmatpush.bf16.msra.mxu3 %v6524_v42  ;;  %v6389_v22 = vld [vmem:[#allocation2 + $0x220] sm:$0xf0]  ;;  %v5722_v33 = vld [vmem:[#allocation2 + $0x208] sm:$0xf] }
  0xc4   : > { %4296 = vmatmul.bf16.gmra.mxu1 %v5639_v40  ;;  %4385 = vmatmul.bf16.gmra.mxu2 %v5643_v41  ;;  %v5678_v40 = vld [vmem:[#allocation2 + $0x1b8] sm:$0xf]  ;;  %v6380_v41 = vld [vmem:[#allocation2 + $0x1d8] sm:$0xf0]  ;;  %v1337_v61 = vrot.slane %v1335_v50, 4  ;;  %v522_v36 = vrot.slane %v520_v28, 4 }
  0xc5   : > { %4474 = vmatmul.bf16.gmra.mxu3 %v5647_v51  ;;  %v5686_v51 = vld [vmem:[#allocation2 + $0x1c0] sm:$0xf]  ;;  %v5679_v12 = vor.u32 %v6380_v41, %v5678_v40  ;;  %v525_v37 = vrot.slane %v523_v29, 5  ;;  %v6516_v40 = vld [vmem:[%s8129_s1 + $0x198] sm:$0xff] }
  0xc6   : > { %4563 = vmatmul.bf16.gmra.mxu0 %v5651_v52  ;;  %v518_v52 = vsel %vm6940_vm3, %v513_v34, %v517_v27  ;;  %v5687_v18 = vor.u32 %v6381_v0, %v5686_v51  ;;  %v1341_v19 = vor.u32 %v1340_v6, %v1337_v61  ;;  %v1351_v27 = vor.u32 %v1350_v15, %v1346_v9  ;;  %v778_v61 = vld [vmem:[%s6793_s9 + $0x6c] sm:$0xe]  ;;  %v6532_v15 = vld [vmem:[%s8129_s1 + $0x218] sm:$0xff] }
  0xc7   : > { %v4228_v16 = vpop.f32.mrf.mxu2  ;;  %736 = vst [vmem:[#allocation2 + $0x268] sm:$0xf] %v518_v52  ;;  %v533_v34 = vshrl.u32 %v280_v23, 16  ;;  %v526_v50 = vor.u32 %v525_v37, %v522_v36  ;;  %4712 = vmatpush.bf16.msra.mxu2 %v6516_v40  ;;  %v6385_v23 = vld [vmem:[#allocation2 + $0x204] sm:$0xf]  ;;  %4890 = vmatpush.bf16.msra.mxu0 %v6532_v15 }
  0xc8   : > { %v7223_v20 = vadd.f32 %v7144_v13, %v4228_v16  ;;  %v4248_v21 = vpop.f32.mrf.mxu3  ;;  %v1342_v32 = vrot.slane %v1341_v19, 4  ;;  %v1352_v35 = vrot.slane %v1351_v27, 4  ;;  %v5716_v27 = vld [vmem:[#allocation2 + $0x224] sm:$0xf0]  ;;  %v5182_v29 = vld [vmem:[%s6793_s9 + $0x78] sm:$0xf] }
  0xc9   : > { %v7227_v24 = vadd.f32 %v7144_v13, %v4248_v21  ;;  %v4210_v25 = vpop.f32.mrf.mxu1  ;;  %v1356_v21 = vrot.slane %v1354_v3, 5  ;;  %v535_v46 = vrot.slane %v533_v34, 4  ;;  %v527_v60 = vrot.slane %v526_v50, 4  ;;  %v5224_v36 = vld [vmem:[%s6793_s9 + $0x7c] sm:$0xf] }
  0xca   : > { %v7232_v30 = vadd.f32 %v7144_v13, %v4210_v25  ;;  %v1347_v41 = vsel %vm6940_vm3, %v1342_v32, %v1346_v9  ;;  %v541_v3 = vrot.slane %v539_v53, 5  ;;  %v5223_v32 = vld [vmem:[%s6793_s9 + $0x78] sm:$0xf]  ;;  %v5183_v40 = vld [vmem:[%s6793_s9 + $0x7c] sm:$0xf] }
  0xcb   : > { %v7234_v31 = vpop.f32.mrf.mxu0  ;;  %v1357_v47 = vsel %vm6940_vm3, %v1352_v35, %v1356_v21  ;;  %1574 = vst [vmem:[#allocation2 + $0x250] sm:$0xf] %v1347_v41  ;;  %v536_v52 = vor.u32 %v535_v46, %v531_v45  ;;  %v5714_v21 = vld [vmem:[#allocation2 + $0x200] sm:$0xf]  ;;  %v1359_v37 = vshrl.u32 %v5223_v32, 16 }
  0xcc   : > { %1575 = vst [vmem:[#allocation2 + $0x274] sm:$0xf] %v1357_v47  ;;  %v5225_v41 = vld [vmem:[%s6793_s9 + $0x80] sm:$0x1]  ;;  %v6390_v42 = vld [vmem:[#allocation2 + $0x228] sm:$0xf0] }
  0xcd   : > { %v537_v2 = vrot.slane %v536_v52, 4  ;;  %1080 = vst [vmem:[#allocation2 + $0x294] sm:$0xf] %v5182_v29  ;;  %v1361_v46 = vrot.slane %v1359_v37, 4  ;;  %v1362_v47 = vshll.u32 %v5223_v32, 16  ;;  %v1372_v52 = vshrl.u32 %v5224_v36, 16 }
  0xce   : > { %v1378_v53 = vshll.u32 %v5225_v41, 16  ;;  %1081 = vst [vmem:[#allocation2 + $0x2b8] sm:$0xf] %v5183_v40 }
  0xcf   : > { %v4230_v4 = vpop.f32.mrf.mxu2  ;;  %v542_v28 = vsel %vm6940_vm3, %v537_v2, %v541_v3 }
  0xd0   : > { %v7249_v10 = vadd.f32 %v7144_v13, %v4230_v4  ;;  %v4250_v11 = vpop.f32.mrf.mxu3  ;;  %v780_v4 = vld [vmem:[%s6793_s9 + $0x74] sm:$0x1]  ;;  %738 = vst [vmem:[#allocation2 + $0x2b0] sm:$0xf] %v542_v28 }
  0xd1   : > { %v7252_v16 = vadd.f32 %v7144_v13, %v4250_v11  ;;  %v4213_v17 = vpop.f32.mrf.mxu1  ;;  %v6384_v11 = vld [vmem:[#allocation2 + $0x1fc] sm:$0xf]  ;;  %v918_v19 = vrot.slane %v780_v4, 5  ;;  %v5723_v4 = vor.u32 %v6390_v42, %v5722_v33 }
  0xd2   : > { %v7257_v25 = vadd.f32 %v7144_v13, %v4213_v17  ;;  %v532_v17 = vsel %vm6940_vm3, %v527_v60, %v531_v45 }
  0xd3   : > { %v7259_v26 = vpop.f32.mrf.mxu0  ;;  %737 = vst [vmem:[#allocation2 + $0x28c] sm:$0xf] %v532_v17 }
  0xd4   : > { %4301 = vmatmul.bf16.gmra.mxu1 %v5675_v5  ;;  %4390 = vmatmul.bf16.gmra.mxu2 %v5679_v12  ;;  %v5157_v5 = vrot.slane %v778_v61, 9  ;;  %v5708_v12 = vld [vmem:[#allocation2 + $0x21c] sm:$0xf0]  ;;  %v5715_v61 = vor.u32 %v6389_v22, %v5714_v21 }
  0xd5   : > { %4479 = vmatmul.bf16.gmra.mxu3 %v5683_v14  ;;  %v6508_v14 = vld [vmem:[%s8129_s1 + $0x158] sm:$0xff]  ;;  %v5711_v50 = vor.u32 %v6384_v11, %v5708_v12  ;;  %v1374_v11 = vrot.slane %v1372_v52, 4 }
  0xd6   : > { %4568 = vmatmul.bf16.gmra.mxu0 %v5687_v18  ;;  %v915_v18 = vrot.slane %v779_v62, 5  ;;  %4623 = vmatpush.bf16.msra.mxu1 %v6508_v14  ;;  %v5719_v62 = vor.u32 %v6385_v23, %v5716_v27  ;;  %v282_v12 = vld [vmem:[%s6793_s9 + $0x78] sm:$0xf]  ;;  %v1380_v23 = vrot.slane %v1378_v53, 5 }
  0xd7   : > { %v4233_v51 = vpop.f32.mrf.mxu2  ;;  %v547_v21 = vshll.u32 %v282_v12, 16 }
  0xd8   : > { %v7273_v54 = vadd.f32 %v7144_v13, %v4233_v51  ;;  %v4253_v57 = vpop.f32.mrf.mxu3  ;;  %v916_v34 = vsel %vm6954_vm5, %v5157_v5, %v915_v18  ;;  %v917_v35 = vrot.slane %v915_v18, 4  ;;  %v1368_v51 = vshll.u32 %v5224_v36, 16  ;;  %v283_v18 = vld [vmem:[%s6793_s9 + $0x7c] sm:$0xf] }
  0xd9   : > { %v7278_v63 = vadd.f32 %v7144_v13, %v4253_v57  ;;  %v4215_v0 = vpop.f32.mrf.mxu1  ;;  %1012 = vst [vmem:[#allocation2 + $0x290] sm:$0xf] %v916_v34  ;;  %v553_v27 = vshll.u32 %v283_v18, 16  ;;  %v557_v28 = vshrl.u32 %v283_v18, 16  ;;  %v549_v33 = vrot.slane %v547_v21, 5 }
  0xda   : > { %v7282_v6 = vadd.f32 %v7144_v13, %v4215_v0  ;;  %v919_v45 = vsel %vm6954_vm5, %v917_v35, %v918_v19  ;;  %v1364_v0 = vrot.slane %v1362_v47, 5  ;;  %v1370_v5 = vrot.slane %v1368_v51, 5  ;;  %v284_v35 = vld [vmem:[%s6793_s9 + $0x80] sm:$0x1]  ;;  %v6393_v18 = vld [vmem:[#allocation2 + $0x244] sm:$0xf] }
  0xdb   : > { %v7284_v9 = vpop.f32.mrf.mxu0  ;;  %1013 = vst [vmem:[#allocation2 + $0x2b4] sm:$0xf] %v919_v45  ;;  %v544_v19 = vshrl.u32 %v282_v12, 16  ;;  %v555_v36 = vrot.slane %v553_v27, 5  ;;  %v559_v41 = vrot.slane %v557_v28, 4  ;;  %v563_v42 = vshll.u32 %v284_v35, 16 }
  0xdc   : > { %v1365_v17 = vor.u32 %v1364_v0, %v1361_v46  ;;  %v1375_v22 = vor.u32 %v1374_v11, %v1370_v5  ;;  %v782_v45 = vld [vmem:[%s6793_s9 + $0x7c] sm:$0xf]  ;;  %v5227_v11 = vld [vmem:[%s6793_s9 + $0x88] sm:$0xf]  ;;  %v5184_v27 = vld [vmem:[%s6793_s9 + $0x84] sm:$0xf] }
  0xdd   : > { %v546_v32 = vrot.slane %v544_v19, 4  ;;  %v5744_v19 = vld [vmem:[#allocation2 + $0x264] sm:$0xf0]  ;;  %1082 = vst [vmem:[#allocation2 + $0x2dc] sm:$0xf] %v5184_v27 }
  0xde   : > { %v1366_v29 = vrot.slane %v1365_v17, 4  ;;  %v1376_v34 = vrot.slane %v1375_v22, 4  ;;  %v5750_v28 = vld [vmem:[#allocation2 + $0x248] sm:$0xf] }
  0xdf   : > { %v4235_v48 = vpop.f32.mrf.mxu2  ;;  %v550_v40 = vor.u32 %v549_v33, %v546_v32  ;;  %v6394_v32 = vld [vmem:[#allocation2 + $0x24c] sm:$0xf]  ;;  %v5752_v33 = vld [vmem:[#allocation2 + $0x26c] sm:$0xf0] }
  0xe0   : > { %v7306_v57 = vadd.f32 %v7144_v13, %v4235_v48  ;;  %v4255_v60 = vpop.f32.mrf.mxu3  ;;  %v1371_v37 = vsel %vm6940_vm3, %v1366_v29, %v1370_v5  ;;  %v1381_v47 = vsel %vm6940_vm3, %v1376_v34, %v1380_v23  ;;  %v781_v48 = vld [vmem:[%s6793_s9 + $0x78] sm:$0xe]  ;;  %v922_v5 = vrot.slane %v782_v45, 5  ;;  %v6398_v29 = vld [vmem:[#allocation2 + $0x268] sm:$0xf0] }
  0xe1   : > { %v7309_v2 = vadd.f32 %v7144_v13, %v4255_v60  ;;  %v4218_v3 = vpop.f32.mrf.mxu1  ;;  %1576 = vst [vmem:[#allocation2 + $0x298] sm:$0xf] %v1371_v37  ;;  %v551_v53 = vrot.slane %v550_v40, 4  ;;  %v560_v60 = vor.u32 %v559_v41, %v555_v36  ;;  %v5228_v37 = vld [vmem:[%s6793_s9 + $0x8c] sm:$0x1]  ;;  %v1392_v45 = vshll.u32 %v5227_v11, 16 }
  0xe2   : > { %v7313_v14 = vadd.f32 %v7144_v13, %v4218_v3  ;;  %1577 = vst [vmem:[#allocation2 + $0x2bc] sm:$0xf] %v1381_v47  ;;  %v565_v3 = vrot.slane %v563_v42, 5  ;;  %v924_v35 = vrot.slane %v922_v5, 4  ;;  %v5758_v41 = vld [vmem:[#allocation2 + $0x250] sm:$0xf] }
  0xe3   : > { %8138 = vst [vmem:[#allocation6_spill] sm:$0xff] %v7309_v2  ;;  %v7315_v15 = vpop.f32.mrf.mxu0  ;;  %v556_v21 = vsel %vm6940_vm3, %v551_v53, %v555_v36  ;;  %v561_v22 = vrot.slane %v560_v60, 4  ;;  %v1402_v53 = vshll.u32 %v5228_v37, 16  ;;  %v6399_v60 = vld [vmem:[#allocation2 + $0x270] sm:$0xf0] }
  0xe4   : > { %4306 = vmatmul.bf16.gmra.mxu1 %v5711_v50  ;;  %4395 = vmatmul.bf16.gmra.mxu2 %v5715_v61  ;;  %v5226_v50 = vld [vmem:[%s6793_s9 + $0x84] sm:$0xf]  ;;  %v783_v61 = vld [vmem:[%s6793_s9 + $0x80] sm:$0x1]  ;;  %739 = vst [vmem:[#allocation2 + $0x2d4] sm:$0xf] %v556_v21 }
  0xe5   : > { %4484 = vmatmul.bf16.gmra.mxu3 %v5719_v62  ;;  %v925_v23 = vrot.slane %v783_v61, 5  ;;  %v1383_v40 = vshrl.u32 %v5226_v50, 16  ;;  %v566_v42 = vsel %vm6940_vm3, %v561_v22, %v565_v3  ;;  %v1386_v36 = vshll.u32 %v5226_v50, 16 }
  0xe6   : > { %4573 = vmatmul.bf16.gmra.mxu0 %v5723_v4  ;;  %v5158_v4 = vrot.slane %v781_v48, 9  ;;  %740 = vst [vmem:[#allocation2 + $0x2f8] sm:$0xf] %v566_v42  ;;  %v5185_v48 = vld [vmem:[%s6793_s9 + $0x88] sm:$0xf]  ;;  %v5747_v50 = vor.u32 %v6393_v18, %v5744_v19  ;;  %v5751_v22 = vor.u32 %v6398_v29, %v5750_v28  ;;  %v1404_v42 = vrot.slane %v1402_v53, 5 }
  0xe7   : > { %v4238_v46 = vpop.f32.mrf.mxu2  ;;  %v926_v47 = vsel %vm6954_vm5, %v924_v35, %v925_v23  ;;  %v1388_v61 = vrot.slane %v1386_v36, 5  ;;  %v5755_v23 = vor.u32 %v6394_v32, %v5752_v33  ;;  %1083 = vst [vmem:[#allocation2 + $0x300] sm:$0xf] %v5185_v48  ;;  %v285_v36 = vld [vmem:[%s6793_s9 + $0x84] sm:$0xf]  ;;  %v6515_v53 = vld [vmem:[%s8129_s1 + $0x190] sm:$0xff] }
  0xe8   : > { %v7327_v51 = vadd.f32 %v7144_v13, %v4238_v46  ;;  %v4258_v52 = vpop.f32.mrf.mxu3  ;;  %v923_v34 = vsel %vm6954_vm5, %v5158_v4, %v922_v5  ;;  %v1396_v46 = vshrl.u32 %v5227_v11, 16  ;;  %1015 = vst [vmem:[#allocation2 + $0x2fc] sm:$0xf] %v926_v47  ;;  %v4184_v4 = vadd.f32 %v7144_v13, %v7157_v39  ;;  %v286_v18 = vld [vmem:[%s6793_s9 + $0x88] sm:$0xf]  ;;  %4713 = vmatpush.bf16.msra.mxu2 %v6515_v53 }
  0xe9   : > { %v7331_v62 = vadd.f32 %v7144_v13, %v4258_v52  ;;  %v4220_v0 = vpop.f32.mrf.mxu1  ;;  %1014 = vst [vmem:[#allocation2 + $0x2d8] sm:$0xf] %v923_v34  ;;  %v1385_v52 = vrot.slane %v1383_v40, 4  ;;  %v5759_v40 = vor.u32 %v6399_v60, %v5758_v41  ;;  %v571_v47 = vshll.u32 %v285_v36, 16  ;;  %v5780_v53 = vld [vmem:[#allocation2 + $0x2ac] sm:$0xf0] }
  0xea   : > { %v7335_v12 = vadd.f32 %v7144_v13, %v4220_v0  ;;  %v1394_v0 = vrot.slane %v1392_v45, 5  ;;  %v1398_v5 = vrot.slane %v1396_v46, 4  ;;  %v568_v46 = vshrl.u32 %v285_v36, 16 }
  0xeb   : > { %8139 = vst [vmem:[#allocation7_spill] sm:$0xff] %v7331_v62  ;;  %v7337_v17 = vpop.f32.mrf.mxu0  ;;  %v1389_v34 = vor.u32 %v1388_v61, %v1385_v52  ;;  %v577_v29 = vshll.u32 %v286_v18, 16  ;;  %v581_v32 = vshrl.u32 %v286_v18, 16  ;;  %v573_v48 = vrot.slane %v571_v47, 5  ;;  %v5229_v52 = vld [vmem:[%s6793_s9 + $0x90] sm:$0xf] }
  0xec   : > { %v1399_v39 = vor.u32 %v1398_v5, %v1394_v0  ;;  %v570_v41 = vrot.slane %v568_v46, 4  ;;  %v6523_v61 = vld [vmem:[%s8129_s1 + $0x1d0] sm:$0xff]  ;;  %v1410_v36 = vshll.u32 %v5229_v52, 16  ;;  %v786_v47 = vld [vmem:[%s6793_s9 + $0x8c] sm:$0x1] }
  0xed   : > { %v1390_v45 = vrot.slane %v1389_v34, 4  ;;  %4802 = vmatpush.bf16.msra.mxu3 %v6523_v61  ;;  %v583_v5 = vrot.slane %v581_v32, 4  ;;  %v5186_v61 = vld [vmem:[%s6793_s9 + $0x90] sm:$0xf] }
  0xee   : > { %v1400_v28 = vrot.slane %v1399_v39, 4  ;;  %v784_v39 = vld [vmem:[%s6793_s9 + $0x84] sm:$0xe]  ;;  %1084 = vst [vmem:[#allocation2 + $0x324] sm:$0xf] %v5186_v61 }
  0xef   : > { %v4240_v3 = vpop.f32.mrf.mxu2  ;;  %v1395_v33 = vsel %vm6940_vm3, %v1390_v45, %v1394_v0  ;;  %v287_v0 = vld [vmem:[%s6793_s9 + $0x8c] sm:$0x1]  ;;  %v288_v62 = vld [vmem:[%s6793_s9 + $0x90] sm:$0xf] }
  0xf0   : > { %v7353_v11 = vadd.f32 %v7144_v13, %v4240_v3  ;;  %v4260_v21 = vpop.f32.mrf.mxu3  ;;  %v1405_v60 = vsel %vm6940_vm3, %v1400_v28, %v1404_v42  ;;  %1578 = vst [vmem:[#allocation2 + $0x2e0] sm:$0xf] %v1395_v33  ;;  %v785_v42 = vld [vmem:[%s6793_s9 + $0x88] sm:$0xf]  ;;  %v5159_v28 = vrot.slane %v784_v39, 9 }
  0xf1   : > { %v7356_v35 = vadd.f32 %v7144_v13, %v4260_v21  ;;  %v4272_v37 = vpop.f32.mrf.mxu1  ;;  %1579 = vst [vmem:[#allocation2 + $0x304] sm:$0xf] %v1405_v60  ;;  %v587_v21 = vshll.u32 %v287_v0, 16  ;;  %v929_v33 = vrot.slane %v785_v42, 5  ;;  %v932_v60 = vrot.slane %v786_v47, 5 }
  0xf2   : > { %v4273_v19 = vadd.f32 %v4272_v37, %v4184_v4  ;;  %v574_v4 = vor.u32 %v573_v48, %v570_v41  ;;  %v6402_v48 = vld [vmem:[#allocation2 + $0x28c] sm:$0xf]  ;;  %v5786_v0 = vld [vmem:[#allocation2 + $0x290] sm:$0xf]  ;;  %v6408_v39 = vld [vmem:[#allocation2 + $0x2b8] sm:$0xf0] }
  0xf3   : > { %8140 = vst [vmem:[#allocation8_spill] sm:$0xff] %v7356_v35  ;;  %v7360_v27 = vpop.f32.mrf.mxu0  ;;  %v589_v46 = vrot.slane %v587_v21, 5  ;;  %v931_v21 = vrot.slane %v929_v33, 4  ;;  %v5231_v47 = vld [vmem:[%s6793_s9 + $0x98] sm:$0x1] }
  0xf4   : > { %4311 = vmatmul.bf16.gmra.mxu1 %v5747_v50  ;;  %4400 = vmatmul.bf16.gmra.mxu2 %v5751_v22  ;;  %v579_v50 = vrot.slane %v577_v29, 5  ;;  %v1407_v22 = vshrl.u32 %v5229_v52, 16 }
  0xf5   : > { %4489 = vmatmul.bf16.gmra.mxu3 %v5755_v23  ;;  %v4186_v23 = vadd.f32 %v7144_v13, %v7185_v8  ;;  %v6507_v8 = vld [vmem:[%s8129_s1 + $0x150] sm:$0xff] }
  0xf6   : > { %4578 = vmatmul.bf16.gmra.mxu0 %v5759_v40  ;;  %v575_v40 = vrot.slane %v574_v4, 4  ;;  %v584_v45 = vor.u32 %v583_v5, %v579_v50  ;;  %v6407_v4 = vld [vmem:[#allocation2 + $0x2b0] sm:$0xf0]  ;;  %v930_v5 = vsel %vm6954_vm5, %v5159_v28, %v929_v33  ;;  %4624 = vmatpush.bf16.msra.mxu1 %v6507_v8  ;;  %v1409_v28 = vrot.slane %v1407_v22, 4 }
  0xf7   : > { %v4361_v3 = vpop.f32.mrf.mxu2  ;;  %1016 = vst [vmem:[#allocation2 + $0x320] sm:$0xf] %v930_v5  ;;  %v1412_v33 = vrot.slane %v1410_v36, 5  ;;  %v4189_v8 = vadd.f32 %v7144_v13, %v7213_v56  ;;  %v289_v13 = vld [vmem:[%s6793_s9 + $0x94] sm:$0xf] }
  0xf8   : > { %v4362_v34 = vadd.f32 %v4361_v3, %v4273_v19  ;;  %v4450_v37 = vpop.f32.mrf.mxu3  ;;  %v6531_v19 = vld [vmem:[%s8129_s1 + $0x210] sm:$0xff]  ;;  %v580_v52 = vsel %vm6940_vm3, %v575_v40, %v579_v50  ;;  %v585_v3 = vrot.slane %v584_v45, 4 }
  0xf9   : > { %v4274_v18 = vpop.f32.mrf.mxu1  ;;  %741 = vst [vmem:[#allocation2 + $0x31c] sm:$0xf] %v580_v52  ;;  %4891 = vmatpush.bf16.msra.mxu0 %v6531_v19  ;;  %v5230_v50 = vld [vmem:[%s6793_s9 + $0x94] sm:$0xf]  ;;  %v1413_v61 = vor.u32 %v1412_v33, %v1409_v28 }
  0xfa   : > { %v4451_v29 = vadd.f32 %v4450_v37, %v4362_v34  ;;  %v4275_v32 = vadd.f32 %v4274_v18, %v4186_v23  ;;  %v6403_v23 = vld [vmem:[#allocation2 + $0x294] sm:$0xf]  ;;  %v5788_v34 = vld [vmem:[#allocation2 + $0x2b4] sm:$0xf0]  ;;  %v590_v42 = vsel %vm6940_vm3, %v585_v3, %v589_v46  ;;  %v933_v18 = vsel %vm6954_vm5, %v931_v21, %v932_v60 }
  0xfb   : > { %v7379_v41 = vpop.f32.mrf.mxu0  ;;  %v5794_v37 = vld [vmem:[#allocation2 + $0x298] sm:$0xf]  ;;  %v5187_v45 = vld [vmem:[%s6793_s9 + $0x94] sm:$0xf]  ;;  %742 = vst [vmem:[#allocation2 + $0x340] sm:$0xf] %v590_v42  ;;  %v5787_v60 = vor.u32 %v6407_v4, %v5786_v0  ;;  %v5791_v22 = vor.u32 %v6403_v23, %v5788_v34 }
  0xfc   : > { %v7394_v40 = vadd.f32 %v7360_v27, %v4451_v29  ;;  %v1416_v52 = vshll.u32 %v5230_v50, 16  ;;  %v5783_v27 = vor.u32 %v6402_v48, %v5780_v53  ;;  %1017 = vst [vmem:[#allocation2 + $0x344] sm:$0xf] %v933_v18  ;;  %v1420_v29 = vshrl.u32 %v5230_v50, 16 }
  0xfd   : > { %v1426_v46 = vshll.u32 %v5231_v47, 16  ;;  %1085 = vst [vmem:[#allocation2 + $0x348] sm:$0xf] %v5187_v45  ;;  %v5795_v36 = vor.u32 %v6408_v39, %v5794_v37  ;;  %v1414_v53 = vrot.slane %v1413_v61, 4  ;;  %v592_v50 = vshrl.u32 %v288_v62, 16 }
  0xfe   : > { %8141 = vst [vmem:[#allocation9_spill] sm:$0xff] %v7394_v40  ;;  %v1418_v21 = vrot.slane %v1416_v52, 5  ;;  %v1422_v40 = vrot.slane %v1420_v29, 4  ;;  %v595_v18 = vshll.u32 %v288_v62, 16  ;;  %v601_v0 = vshll.u32 %v289_v13, 16 }
  0xff   : > { %v4363_v19 = vpop.f32.mrf.mxu2  ;;  %v1428_v35 = vrot.slane %v1426_v46, 5  ;;  %v605_v4 = vshrl.u32 %v289_v13, 16  ;;  %v594_v34 = vrot.slane %v592_v50, 4  ;;  %v290_v62 = vld [vmem:[%s6793_s9 + $0x98] sm:$0x1] }
 0x100   : > { %v4364_v3 = vadd.f32 %v4363_v19, %v4275_v32  ;;  %v4452_v5 = vpop.f32.mrf.mxu3  ;;  %v1423_v32 = vor.u32 %v1422_v40, %v1418_v21  ;;  %v1419_v23 = vsel %vm6940_vm3, %v1414_v53, %v1418_v21  ;;  %v597_v45 = vrot.slane %v595_v18, 5  ;;  %v787_v19 = vld [vmem:[%s6793_s9 + $0x90] sm:$0xe]  ;;  %v5233_v13 = vld [vmem:[%s6793_s9 + $0xa0] sm:$0xf] }
 0x101   : > { %v4277_v42 = vpop.f32.mrf.mxu1  ;;  %1580 = vst [vmem:[#allocation2 + $0x328] sm:$0xf] %v1419_v23  ;;  %v603_v40 = vrot.slane %v601_v0, 5  ;;  %v607_v47 = vrot.slane %v605_v4, 4  ;;  %v5816_v0 = vld [vmem:[#allocation2 + $0x2f4] sm:$0xf0] }
 0x102   : > { %v4453_v56 = vadd.f32 %v4452_v5, %v4364_v3  ;;  %v4278_v2 = vadd.f32 %v4277_v42, %v4189_v8  ;;  %v1424_v39 = vrot.slane %v1423_v32, 4  ;;  %v598_v52 = vor.u32 %v597_v45, %v594_v34  ;;  %v5822_v4 = vld [vmem:[#allocation2 + $0x2d8] sm:$0xf]  ;;  %v6416_v23 = vld [vmem:[#allocation2 + $0x2f8] sm:$0xf0] }
 0x103   : > { %v7406_v48 = vpop.f32.mrf.mxu0  ;;  %v611_v8 = vshll.u32 %v290_v62, 16  ;;  %v608_v5 = vor.u32 %v607_v47, %v603_v40  ;;  %v5234_v62 = vld [vmem:[%s6793_s9 + $0xa4] sm:$0x1] }
 0x104   : > { %4316 = vmatmul.bf16.gmra.mxu1 %v5783_v27  ;;  %4405 = vmatmul.bf16.gmra.mxu2 %v5787_v60  ;;  %v7411_v37 = vadd.f32 %v7379_v41, %v4453_v56  ;;  %v1429_v33 = vsel %vm6940_vm3, %v1424_v39, %v1428_v35  ;;  %v5232_v41 = vld [vmem:[%s6793_s9 + $0x9c] sm:$0xf]  ;;  %v7421_v27 = vld [vmem:[%s8130_s2] ss:$0 sm:$0xff]  ;;  %v788_v60 = vld [vmem:[%s6793_s9 + $0x94] sm:$0xf] }
 0x105   : > { %4494 = vmatmul.bf16.gmra.mxu3 %v5791_v22  ;;  %v4191_v29 = vadd.f32 %v7421_v27, %v7234_v31  ;;  %1581 = vst [vmem:[#allocation2 + $0x34c] sm:$0xf] %v1429_v33  ;;  %v789_v35 = vld [vmem:[%s6793_s9 + $0x98] sm:$0x1]  ;;  %v599_v21 = vrot.slane %v598_v52, 4  ;;  %v613_v42 = vrot.slane %v611_v8, 5 }
 0x106   : > { %4583 = vmatmul.bf16.gmra.mxu0 %v5795_v36  ;;  %v5160_v22 = vrot.slane %v787_v19, 9  ;;  %v936_v36 = vrot.slane %v788_v60, 5  ;;  %v609_v32 = vrot.slane %v608_v5, 4  ;;  %v939_v18 = vrot.slane %v789_v35, 5  ;;  %v5188_v31 = vld [vmem:[%s6793_s9 + $0x9c] sm:$0xf] }
 0x107   : > { %v4366_v28 = vpop.f32.mrf.mxu2  ;;  %v604_v34 = vsel %vm6940_vm3, %v599_v21, %v603_v40  ;;  %1086 = vst [vmem:[#allocation2 + $0x36c] sm:$0xf] %v5188_v31  ;;  %v1431_v47 = vshrl.u32 %v5232_v41, 16  ;;  %v5824_v33 = vld [vmem:[#allocation2 + $0x2fc] sm:$0xf0]  ;;  %v1444_v60 = vshrl.u32 %v5233_v13, 16  ;;  %v5823_v31 = vor.u32 %v6416_v23, %v5822_v4 }
 0x108   : > { %v4367_v46 = vadd.f32 %v4366_v28, %v4278_v2  ;;  %v4455_v3 = vpop.f32.mrf.mxu3  ;;  %v6411_v2 = vld [vmem:[#allocation2 + $0x2d4] sm:$0xf]  ;;  %v937_v39 = vsel %vm6954_vm5, %v5160_v22, %v936_v36  ;;  %v938_v45 = vrot.slane %v936_v36, 4  ;;  %v6412_v28 = vld [vmem:[#allocation2 + $0x2dc] sm:$0xf]  ;;  %v614_v8 = vsel %vm6940_vm3, %v609_v32, %v613_v42 }
 0x109   : > { %v4279_v61 = vpop.f32.mrf.mxu1  ;;  %v5830_v52 = vld [vmem:[#allocation2 + $0x2e0] sm:$0xf]  ;;  %743 = vst [vmem:[#allocation2 + $0x364] sm:$0xf] %v604_v34  ;;  %v1433_v5 = vrot.slane %v1431_v47, 4  ;;  %v1450_v35 = vshll.u32 %v5234_v62, 16  ;;  %v4194_v42 = vadd.f32 %v7421_v27, %v7259_v26  ;;  %v5819_v32 = vor.u32 %v6411_v2, %v5816_v0 }
 0x10a   : > { %v4456_v56 = vadd.f32 %v4455_v3, %v4367_v46  ;;  %v4280_v53 = vadd.f32 %v4279_v61, %v4191_v29  ;;  %v5189_v19 = vld [vmem:[%s6793_s9 + $0xa0] sm:$0xf]  ;;  %v1434_v29 = vshll.u32 %v5232_v41, 16  ;;  %v1440_v46 = vshll.u32 %v5233_v13, 16  ;;  %744 = vst [vmem:[#allocation2 + $0x388] sm:$0xf] %v614_v8 }
 0x10b   : > { %v4546_v50 = vpop.f32.mrf.mxu0  ;;  %v940_v40 = vsel %vm6954_vm5, %v938_v45, %v939_v18  ;;  %v6417_v61 = vld [vmem:[#allocation2 + $0x300] sm:$0xf0]  ;;  %1018 = vst [vmem:[#allocation2 + $0x368] sm:$0xf] %v937_v39  ;;  %v5827_v34 = vor.u32 %v6412_v28, %v5824_v33  ;;  %v1452_v62 = vrot.slane %v1450_v35, 5  ;;  %v6514_v33 = vld [vmem:[%s8129_s1 + $0x188] sm:$0xff] }
 0x10c   : > { %v7438_v3 = vadd.f32 %v7406_v48, %v4456_v56  ;;  %v1436_v21 = vrot.slane %v1434_v29, 5  ;;  %v1442_v22 = vrot.slane %v1440_v46, 5  ;;  %1019 = vst [vmem:[#allocation2 + $0x38c] sm:$0xf] %v940_v40  ;;  %v1446_v48 = vrot.slane %v1444_v60, 4  ;;  %4714 = vmatpush.bf16.msra.mxu2 %v6514_v33 }
 0x10d   : > { %1087 = vst [vmem:[#allocation2 + $0x390] sm:$0xf] %v5189_v19  ;;  %v5831_v45 = vor.u32 %v6417_v61, %v5830_v52  ;;  %v291_v47 = vld [vmem:[%s6793_s9 + $0x9c] sm:$0xf]  ;;  %v292_v8 = vld [vmem:[%s6793_s9 + $0xa0] sm:$0xf] }
 0x10e   : > { %8142 = vst [vmem:[#allocation10_spill] sm:$0xff] %v7438_v3  ;;  %v1437_v18 = vor.u32 %v1436_v21, %v1433_v5  ;;  %v1447_v39 = vor.u32 %v1446_v48, %v1442_v22  ;;  %v616_v40 = vshrl.u32 %v291_v47, 16  ;;  %v619_v60 = vshll.u32 %v291_v47, 16  ;;  %v6522_v19 = vld [vmem:[%s8129_s1 + $0x1c8] sm:$0xff] }
 0x10f   : > { %v4368_v41 = vpop.f32.mrf.mxu2  ;;  %v625_v2 = vshll.u32 %v292_v8, 16  ;;  %v629_v0 = vshrl.u32 %v292_v8, 16  ;;  %4803 = vmatpush.bf16.msra.mxu3 %v6522_v19 }
 0x110   : > { %v4369_v36 = vadd.f32 %v4368_v41, %v4280_v53  ;;  %v4457_v56 = vpop.f32.mrf.mxu3  ;;  %v1438_v3 = vrot.slane %v1437_v18, 4  ;;  %v1448_v53 = vrot.slane %v1447_v39, 4  ;;  %v618_v23 = vrot.slane %v616_v40, 4  ;;  %v6425_v40 = vld [vmem:[#allocation2 + $0x340] sm:$0xf0] }
 0x111   : > { %v4282_v13 = vpop.f32.mrf.mxu1  ;;  %v621_v35 = vrot.slane %v619_v60, 5  ;;  %v627_v61 = vrot.slane %v625_v2, 5  ;;  %v631_v21 = vrot.slane %v629_v0, 4  ;;  %v6530_v60 = vld [vmem:[%s8129_s1 + $0x208] sm:$0xff] }
 0x112   : > { %v4458_v29 = vadd.f32 %v4457_v56, %v4369_v36  ;;  %v4283_v46 = vadd.f32 %v4282_v13, %v4194_v42  ;;  %v1443_v4 = vsel %vm6940_vm3, %v1438_v3, %v1442_v22  ;;  %v1453_v52 = vsel %vm6940_vm3, %v1448_v53, %v1452_v62  ;;  %v7461_v3 = vld [vmem:[%s6793_s9 + $0xa8] sm:$0xf]  ;;  %v790_v36 = vld [vmem:[%s6793_s9 + $0x9c] sm:$0xe]  ;;  %v791_v56 = vld [vmem:[%s6793_s9 + $0xa0] sm:$0xf]  ;;  %4892 = vmatpush.bf16.msra.mxu0 %v6530_v60 }
 0x113   : > { %v7446_v26 = vpop.f32.mrf.mxu0  ;;  %1582 = vst [vmem:[#allocation2 + $0x370] sm:$0xf] %v1443_v4  ;;  %v4196_v22 = vadd.f32 %v7421_v27, %v7284_v9  ;;  %v622_v18 = vor.u32 %v621_v35, %v618_v23  ;;  %v632_v13 = vor.u32 %v631_v21, %v627_v61  ;;  %v943_v39 = vrot.slane %v791_v56, 5  ;;  %v6420_v9 = vld [vmem:[#allocation2 + $0x31c] sm:$0xf]  ;;  %v6506_v53 = vld [vmem:[%s8129_s1 + $0x148] sm:$0xff] }
 0x114   : > { %4321 = vmatmul.bf16.gmra.mxu1 %v5819_v32  ;;  %4410 = vmatmul.bf16.gmra.mxu2 %v5823_v31  ;;  %v7450_v28 = vadd.f32 %v4546_v50, %v4458_v29  ;;  %1583 = vst [vmem:[#allocation2 + $0x394] sm:$0xf] %v1453_v52  ;;  %v293_v50 = vld [vmem:[%s6793_s9 + $0xa4] sm:$0x1]  ;;  %v1455_v32 = vshrl.u32 %v7461_v3, 16 }
 0x115   : > { %4499 = vmatmul.bf16.gmra.mxu3 %v5827_v34  ;;  %v635_v48 = vshll.u32 %v293_v50, 16  ;;  %v792_v34 = vld [vmem:[%s6793_s9 + $0xa4] sm:$0x1]  ;;  %v5852_v29 = vld [vmem:[#allocation2 + $0x33c] sm:$0xf0]  ;;  %v623_v23 = vrot.slane %v622_v18, 4  ;;  %4625 = vmatpush.bf16.msra.mxu1 %v6506_v53 }
 0x116   : > { %4588 = vmatmul.bf16.gmra.mxu0 %v5831_v45  ;;  %v5161_v45 = vrot.slane %v790_v36, 9  ;;  %v946_v0 = vrot.slane %v792_v34, 5  ;;  %v5190_v4 = vld [vmem:[%s6793_s9 + $0xa8] sm:$0xf]  ;;  %v633_v33 = vrot.slane %v632_v13, 4  ;;  %v945_v19 = vrot.slane %v943_v39, 4 }
 0x117   : > { %v4371_v5 = vpop.f32.mrf.mxu2  ;;  %v637_v2 = vrot.slane %v635_v48, 5  ;;  %v5236_v50 = vld [vmem:[%s6793_s9 + $0xac] sm:$0xf]  ;;  %v5860_v35 = vld [vmem:[#allocation2 + $0x344] sm:$0xf0]  ;;  %v628_v48 = vsel %vm6940_vm3, %v623_v23, %v627_v61  ;;  %v1457_v18 = vrot.slane %v1455_v32, 4  ;;  %v5855_v61 = vor.u32 %v6420_v9, %v5852_v29 }
 0x118   : > { %v4372_v42 = vadd.f32 %v4371_v5, %v4283_v46  ;;  %v4460_v41 = vpop.f32.mrf.mxu3  ;;  %v5858_v46 = vld [vmem:[#allocation2 + $0x320] sm:$0xf]  ;;  %v944_v52 = vsel %vm6954_vm5, %v5161_v45, %v943_v39  ;;  %v6421_v5 = vld [vmem:[#allocation2 + $0x324] sm:$0xf]  ;;  %v5866_v21 = vld [vmem:[#allocation2 + $0x328] sm:$0xf]  ;;  %v947_v56 = vsel %vm6954_vm5, %v945_v19, %v946_v0 }
 0x119   : > { %v4284_v31 = vpop.f32.mrf.mxu1  ;;  %1020 = vst [vmem:[#allocation2 + $0x3b0] sm:$0xf] %v944_v52  ;;  %v638_v36 = vsel %vm6940_vm3, %v633_v33, %v637_v2  ;;  %v1458_v13 = vshll.u32 %v7461_v3, 16  ;;  %v1464_v34 = vshll.u32 %v5236_v50, 16  ;;  %v1468_v45 = vshrl.u32 %v5236_v50, 16 }
 0x11a   : > { %v4461_v62 = vadd.f32 %v4460_v41, %v4372_v42  ;;  %v4285_v47 = vadd.f32 %v4284_v31, %v4196_v22  ;;  %v5237_v22 = vld [vmem:[%s6793_s9 + $0xb0] sm:$0x1]  ;;  %v6426_v41 = vld [vmem:[#allocation2 + $0x348] sm:$0xf0]  ;;  %1088 = vst [vmem:[#allocation2 + $0x3b4] sm:$0xf] %v5190_v4  ;;  %v5863_v3 = vor.u32 %v6421_v5, %v5860_v35 }
 0x11b   : > { %v7470_v8 = vpop.f32.mrf.mxu0  ;;  %v5191_v31 = vld [vmem:[%s6793_s9 + $0xac] sm:$0xf]  ;;  %745 = vst [vmem:[#allocation2 + $0x3ac] sm:$0xf] %v628_v48  ;;  %v1474_v53 = vshll.u32 %v5237_v22, 16  ;;  %v1460_v0 = vrot.slane %v1458_v13, 5  ;;  %v5867_v33 = vor.u32 %v6426_v41, %v5866_v21 }
 0x11c   : > { %v7484_v42 = vadd.f32 %v7446_v26, %v4461_v62  ;;  %v4199_v26 = vadd.f32 %v7421_v27, %v7315_v15  ;;  %v5859_v62 = vor.u32 %v6425_v40, %v5858_v46  ;;  %746 = vst [vmem:[#allocation2 + $0x3d0] sm:$0xf] %v638_v36  ;;  %v1466_v4 = vrot.slane %v1464_v34, 5  ;;  %v294_v19 = vld [vmem:[%s6793_s9 + $0xa8] sm:$0xf] }
 0x11d   : > { %1021 = vst [vmem:[#allocation2 + $0x3d4] sm:$0xf] %v947_v56  ;;  %v1470_v32 = vrot.slane %v1468_v45, 4  ;;  %v1476_v52 = vrot.slane %v1474_v53, 5  ;;  %v1461_v29 = vor.u32 %v1460_v0, %v1457_v18  ;;  %v640_v40 = vshrl.u32 %v294_v19, 16 }
 0x11e   : > { %1089 = vst [vmem:[#allocation2 + $0x3d8] sm:$0xf] %v5191_v31  ;;  %v643_v22 = vshll.u32 %v294_v19, 16  ;;  %v296_v41 = vld [vmem:[%s6793_s9 + $0xb0] sm:$0x1]  ;;  %v4201_v53 = vadd.f32 %v7421_v27, %v7337_v17 }
 0x11f   : > { %v4373_v39 = vpop.f32.mrf.mxu2  ;;  %v1471_v46 = vor.u32 %v1470_v32, %v1466_v4  ;;  %v1462_v5 = vrot.slane %v1461_v29, 4  ;;  %v642_v56 = vrot.slane %v640_v40, 4  ;;  %v5238_v32 = vld [vmem:[%s6793_s9 + $0xb4] sm:$0xf]  ;;  %v6429_v27 = vld [vmem:[#allocation2 + $0x364] sm:$0xf] }
 0x120   : > { %v4374_v60 = vadd.f32 %v4373_v39, %v4285_v47  ;;  %v4462_v2 = vpop.f32.mrf.mxu3  ;;  %v295_v47 = vld [vmem:[%s6793_s9 + $0xac] sm:$0xf]  ;;  %v645_v31 = vrot.slane %v643_v22, 5  ;;  %v5192_v17 = vld [vmem:[%s6793_s9 + $0xb4] sm:$0xf] }
 0x121   : > { %v4287_v23 = vpop.f32.mrf.mxu1  ;;  %v649_v48 = vshll.u32 %v295_v47, 16  ;;  %v653_v36 = vshrl.u32 %v295_v47, 16  ;;  %v1472_v35 = vrot.slane %v1471_v46, 4  ;;  %v1467_v18 = vsel %vm6940_vm3, %v1462_v5, %v1466_v4  ;;  %v793_v4 = vld [vmem:[%s6793_s9 + $0xa8] sm:$0xe] }
 0x122   : > { %v4463_v15 = vadd.f32 %v4462_v2, %v4374_v60  ;;  %v4288_v50 = vadd.f32 %v4287_v23, %v4199_v26  ;;  %v794_v26 = vld [vmem:[%s6793_s9 + $0xac] sm:$0xf]  ;;  %1584 = vst [vmem:[#allocation2 + $0x3b8] sm:$0xf] %v1467_v18  ;;  %v5162_v19 = vrot.slane %v793_v4, 9 }
 0x123   : > { %v7497_v9 = vpop.f32.mrf.mxu0  ;;  %v1477_v13 = vsel %vm6940_vm3, %v1472_v35, %v1476_v52  ;;  %v651_v34 = vrot.slane %v649_v48, 5  ;;  %v655_v45 = vrot.slane %v653_v36, 4  ;;  %v795_v52 = vld [vmem:[%s6793_s9 + $0xb0] sm:$0x1]  ;;  %v5894_v22 = vld [vmem:[#allocation2 + $0x368] sm:$0xf] }
 0x124   : > { %4326 = vmatmul.bf16.gmra.mxu1 %v5855_v61  ;;  %4415 = vmatmul.bf16.gmra.mxu2 %v5859_v62  ;;  %v7501_v21 = vadd.f32 %v7470_v8, %v4463_v15  ;;  %v646_v8 = vor.u32 %v645_v31, %v642_v56  ;;  %v659_v61 = vshll.u32 %v296_v41, 16  ;;  %v950_v62 = vrot.slane %v794_v26, 5  ;;  %1585 = vst [vmem:[#allocation2 + $0x3dc] sm:$0xf] %v1477_v13  ;;  %v6434_v48 = vld [vmem:[#allocation2 + $0x388] sm:$0xf0] }
 0x125   : > { %4504 = vmatmul.bf16.gmra.mxu3 %v5863_v3  ;;  %v656_v0 = vor.u32 %v655_v45, %v651_v34  ;;  %v953_v35 = vrot.slane %v795_v52, 5  ;;  %v5193_v41 = vld [vmem:[%s6793_s9 + $0xb8] sm:$0xf]  ;;  %1090 = vst [vmem:[#allocation2 + $0x3fc] sm:$0xf] %v5192_v17  ;;  %v1479_v31 = vshrl.u32 %v5238_v32, 16 }
 0x126   : > { %4593 = vmatmul.bf16.gmra.mxu0 %v5867_v33  ;;  %v647_v3 = vrot.slane %v646_v8, 4  ;;  %v661_v33 = vrot.slane %v659_v61, 5  ;;  %v952_v40 = vrot.slane %v950_v62, 4  ;;  %v951_v5 = vsel %vm6954_vm5, %v5162_v19, %v950_v62  ;;  %v5239_v56 = vld [vmem:[%s6793_s9 + $0xb8] sm:$0xf] }
 0x127   : > { %v4376_v39 = vpop.f32.mrf.mxu2  ;;  %v657_v47 = vrot.slane %v656_v0, 4  ;;  %v6430_v18 = vld [vmem:[#allocation2 + $0x36c] sm:$0xf]  ;;  %v5896_v13 = vld [vmem:[#allocation2 + $0x38c] sm:$0xf0]  ;;  %v1482_v8 = vshll.u32 %v5238_v32, 16  ;;  %v5895_v19 = vor.u32 %v6434_v48, %v5894_v22 }
 0x128   : > { %v4377_v60 = vadd.f32 %v4376_v39, %v4288_v50  ;;  %v4465_v2 = vpop.f32.mrf.mxu3  ;;  %v5888_v50 = vld [vmem:[#allocation2 + $0x384] sm:$0xf0]  ;;  %v652_v36 = vsel %vm6940_vm3, %v647_v3, %v651_v34  ;;  %v5902_v45 = vld [vmem:[#allocation2 + $0x370] sm:$0xf]  ;;  %v5240_v39 = vld [vmem:[%s6793_s9 + $0xbc] sm:$0x1]  ;;  %v954_v62 = vsel %vm6954_vm5, %v952_v40, %v953_v35  ;;  %v5899_v40 = vor.u32 %v6430_v18, %v5896_v13 }
 0x129   : > { %v4289_v23 = vpop.f32.mrf.mxu1  ;;  %v662_v26 = vsel %vm6940_vm3, %v657_v47, %v661_v33  ;;  %747 = vst [vmem:[#allocation2 + $0x3f4] sm:$0xf] %v652_v36  ;;  %v1488_v61 = vshll.u32 %v5239_v56, 16  ;;  %v6435_v0 = vld [vmem:[#allocation2 + $0x390] sm:$0xf0]  ;;  %v1484_v4 = vrot.slane %v1482_v8, 5 }
 0x12a   : > { %v4466_v15 = vadd.f32 %v4465_v2, %v4377_v60  ;;  %v4290_v29 = vadd.f32 %v4289_v23, %v4201_v53  ;;  %748 = vst [vmem:[#allocation2 + $0x418] sm:$0xf] %v662_v26  ;;  %v1481_v53 = vrot.slane %v1479_v31, 4  ;;  %v1492_v60 = vshrl.u32 %v5239_v56, 16  ;;  %v297_v56 = vld [vmem:[%s6793_s9 + $0xb4] sm:$0xf] }
 0x12b   : > { %v4556_v46 = vpop.f32.mrf.mxu0  ;;  %v1498_v2 = vshll.u32 %v5240_v39, 16  ;;  %1022 = vst [vmem:[#allocation2 + $0x3f8] sm:$0xf] %v951_v5  ;;  %v1490_v23 = vrot.slane %v1488_v61, 5  ;;  %v5903_v17 = vor.u32 %v6435_v0, %v5902_v45  ;;  %v298_v5 = vld [vmem:[%s6793_s9 + $0xb8] sm:$0xf] }
 0x12c   : > { %v7525_v34 = vadd.f32 %v7497_v9, %v4466_v15  ;;  %1023 = vst [vmem:[#allocation2 + $0x41c] sm:$0xf] %v954_v62  ;;  %v1494_v32 = vrot.slane %v1492_v60, 4  ;;  %v5891_v9 = vor.u32 %v6429_v27, %v5888_v50  ;;  %v1485_v15 = vor.u32 %v1484_v4, %v1481_v53  ;;  %v6521_v45 = vld [vmem:[%s8129_s1 + $0x1c0] sm:$0xff] }
 0x12d   : > { %1091 = vst [vmem:[#allocation2 + $0x420] sm:$0xf] %v5193_v41  ;;  %v1500_v35 = vrot.slane %v1498_v2, 5  ;;  %v664_v61 = vshrl.u32 %v297_v56, 16  ;;  %v667_v27 = vshll.u32 %v297_v56, 16  ;;  %v673_v50 = vshll.u32 %v298_v5, 16  ;;  %4804 = vmatpush.bf16.msra.mxu3 %v6521_v45 }
 0x12e   : > { %v1495_v36 = vor.u32 %v1494_v32, %v1490_v23  ;;  %v1486_v8 = vrot.slane %v1485_v15, 4  ;;  %v677_v22 = vshrl.u32 %v298_v5, 16  ;;  %v7547_v62 = vld [vmem:[%s6793_s9 + $0xc0] sm:$0xf]  ;;  %v796_v32 = vld [vmem:[%s6793_s9 + $0xb4] sm:$0xe] }
 0x12f   : > { %v4378_v3 = vpop.f32.mrf.mxu2  ;;  %v666_v41 = vrot.slane %v664_v61, 4  ;;  %v669_v60 = vrot.slane %v667_v27, 5  ;;  %v675_v2 = vrot.slane %v673_v50, 5  ;;  %v6438_v5 = vld [vmem:[#allocation2 + $0x3ac] sm:$0xf]  ;;  %v6505_v61 = vld [vmem:[%s8129_s1 + $0x140] sm:$0xff] }
 0x130   : > { %v4379_v33 = vadd.f32 %v4378_v3, %v4290_v29  ;;  %v4467_v52 = vpop.f32.mrf.mxu3  ;;  %v1496_v29 = vrot.slane %v1495_v36, 4  ;;  %v1491_v48 = vsel %vm6940_vm3, %v1486_v8, %v1490_v23  ;;  %v679_v0 = vrot.slane %v677_v22, 4  ;;  %v6443_v8 = vld [vmem:[#allocation2 + $0x3d0] sm:$0xf0]  ;;  %v5194_v22 = vld [vmem:[%s6793_s9 + $0xc0] sm:$0xf]  ;;  %4626 = vmatpush.bf16.msra.mxu1 %v6505_v61 }
 0x131   : > { %v4292_v47 = vpop.f32.mrf.mxu1  ;;  %1586 = vst [vmem:[#allocation2 + $0x400] sm:$0xf] %v1491_v48  ;;  %v6439_v45 = vld [vmem:[#allocation2 + $0x3b4] sm:$0xf] }
 0x132   : > { %v4468_v31 = vadd.f32 %v4467_v52, %v4379_v33  ;;  %v4293_v26 = vadd.f32 %v4292_v47, %v7155_v38  ;;  %v6513_v38 = vld [vmem:[%s8129_s1 + $0x180] sm:$0xff]  ;;  %v1501_v13 = vsel %vm6940_vm3, %v1496_v29, %v1500_v35  ;;  %v797_v33 = vld [vmem:[%s6793_s9 + $0xb8] sm:$0xf]  ;;  %v1503_v52 = vshrl.u32 %v7547_v62, 16  ;;  %v798_v47 = vld [vmem:[%s6793_s9 + $0xbc] sm:$0x1] }
 0x133   : > { %v7532_v39 = vpop.f32.mrf.mxu0  ;;  %1587 = vst [vmem:[#allocation2 + $0x424] sm:$0xf] %v1501_v13  ;;  %4715 = vmatpush.bf16.msra.mxu2 %v6513_v38  ;;  %v680_v15 = vor.u32 %v679_v0, %v675_v2  ;;  %v6529_v29 = vld [vmem:[%s8129_s1 + $0x200] sm:$0xff]  ;;  %v960_v50 = vrot.slane %v798_v47, 5 }
 0x134   : > { %4331 = vmatmul.bf16.gmra.mxu1 %v5891_v9  ;;  %4420 = vmatmul.bf16.gmra.mxu2 %v5895_v19  ;;  %v7536_v18 = vadd.f32 %v4556_v46, %v4468_v31  ;;  %v299_v46 = vld [vmem:[%s6793_s9 + $0xbc] sm:$0x1]  ;;  %v670_v19 = vor.u32 %v669_v60, %v666_v41  ;;  %v5924_v31 = vld [vmem:[#allocation2 + $0x3cc] sm:$0xf0]  ;;  %v5242_v13 = vld [vmem:[%s6793_s9 + $0xc4] sm:$0xf] }
 0x135   : > { %4509 = vmatmul.bf16.gmra.mxu3 %v5899_v40  ;;  %v683_v3 = vshll.u32 %v299_v46, 16  ;;  %v5163_v40 = vrot.slane %v796_v32, 9  ;;  %v681_v41 = vrot.slane %v680_v15, 4  ;;  %v5932_v46 = vld [vmem:[#allocation2 + $0x3d4] sm:$0xf0]  ;;  %4893 = vmatpush.bf16.msra.mxu0 %v6529_v29  ;;  %v1512_v15 = vshll.u32 %v5242_v13, 16 }
 0x136   : > { %4598 = vmatmul.bf16.gmra.mxu0 %v5903_v17  ;;  %v957_v17 = vrot.slane %v797_v33, 5  ;;  %v671_v48 = vrot.slane %v670_v19, 4  ;;  %v5243_v60 = vld [vmem:[%s6793_s9 + $0xc8] sm:$0x1]  ;;  %v5195_v33 = vld [vmem:[%s6793_s9 + $0xc4] sm:$0xf] }
 0x137   : > { %v4381_v53 = vpop.f32.mrf.mxu2  ;;  %v685_v27 = vrot.slane %v683_v3, 5  ;;  %1092 = vst [vmem:[#allocation2 + $0x444] sm:$0xf] %v5194_v22  ;;  %v1506_v19 = vshll.u32 %v7547_v62, 16  ;;  %v1516_v47 = vshrl.u32 %v5242_v13, 16 }
 0x138   : > { %v4382_v4 = vadd.f32 %v4381_v53, %v4293_v26  ;;  %v4470_v23 = vpop.f32.mrf.mxu3  ;;  %v5930_v26 = vld [vmem:[#allocation2 + $0x3b0] sm:$0xf]  ;;  %v959_v38 = vrot.slane %v957_v17, 4  ;;  %v5938_v53 = vld [vmem:[#allocation2 + $0x3b8] sm:$0xf] }
 0x139   : > { %v4294_v9 = vpop.f32.mrf.mxu1  ;;  %v686_v3 = vsel %vm6940_vm3, %v681_v41, %v685_v27  ;;  %v1508_v29 = vrot.slane %v1506_v19, 5  ;;  %v1514_v27 = vrot.slane %v1512_v15, 5  ;;  %1093 = vst [vmem:[#allocation2 + $0x468] sm:$0xf] %v5195_v33  ;;  %v5340_v41 = vld [vmem:[%s6793_s9 + $0x18] sm:$0xf] }
 0x13a   : > { %v4471_v36 = vadd.f32 %v4470_v23, %v4382_v4  ;;  %v4295_v35 = vadd.f32 %v4294_v9, %v7183_v7  ;;  %v958_v7 = vsel %vm6954_vm5, %v5163_v40, %v957_v17  ;;  %v6444_v4 = vld [vmem:[#allocation2 + $0x3d8] sm:$0xf0]  ;;  %v676_v23 = vsel %vm6940_vm3, %v671_v48, %v675_v2  ;;  %750 = vst [vmem:[#allocation2 + $0x460] sm:$0xf] %v686_v3 }
 0x13b   : > { %v4561_v56 = vpop.f32.mrf.mxu0  ;;  %1024 = vst [vmem:[#allocation2 + $0x440] sm:$0xf] %v958_v7  ;;  %v961_v32 = vsel %vm6954_vm5, %v959_v38, %v960_v50  ;;  %v1505_v9 = vrot.slane %v1503_v52, 4  ;;  %v5927_v40 = vor.u32 %v6438_v5, %v5924_v31  ;;  %v5931_v17 = vor.u32 %v6443_v8, %v5930_v26 }
 0x13c   : > { %v7567_v0 = vadd.f32 %v7532_v39, %v4471_v36  ;;  %749 = vst [vmem:[#allocation2 + $0x43c] sm:$0xf] %v676_v23  ;;  %v1522_v2 = vshll.u32 %v5243_v60, 16  ;;  %v1518_v50 = vrot.slane %v1516_v47, 4  ;;  %v5935_v48 = vor.u32 %v6439_v45, %v5932_v46  ;;  %v5245_v46 = vld [vmem:[%s6793_s9 + $0x10] sm:$0xf] }
 0x13d   : > { %1025 = vst [vmem:[#allocation2 + $0x464] sm:$0xf] %v961_v32  ;;  %v5939_v52 = vor.u32 %v6444_v4, %v5938_v53  ;;  %v1509_v26 = vor.u32 %v1508_v29, %v1505_v9  ;;  %v1979_v60 = vshrl.u32 %v5340_v41, 16  ;;  %v1982_v53 = vshll.u32 %v5340_v41, 16  ;;  %v5244_v9 = vld [vmem:[%s6793_s9 + $0xc] sm:$0xe] }
 0x13e   : > { %v1524_v62 = vrot.slane %v1522_v2, 5  ;;  %v1519_v8 = vor.u32 %v1518_v50, %v1514_v27  ;;  %v1688_v3 = vrot.slane %v5245_v46, 5  ;;  %v5246_v47 = vld [vmem:[%s6793_s9 + $0x14] sm:$0x1]  ;;  %v5968_v46 = vld [vmem:[#allocation2 + $0x41c] sm:$0xf0] }
 0x13f   : > { %v4383_v39 = vpop.f32.mrf.mxu2  ;;  %v1510_v38 = vrot.slane %v1509_v26, 4  ;;  %v1984_v41 = vrot.slane %v1982_v53, 5  ;;  %v6452_v26 = vld [vmem:[#allocation2 + $0x418] sm:$0xf0] }
 0x140   : > { %v4384_v36 = vadd.f32 %v4383_v39, %v4295_v35  ;;  %v4472_v61 = vpop.f32.mrf.mxu3  ;;  %v5341_v35 = vld [vmem:[%s6793_s9 + $0x1c] sm:$0xf]  ;;  %v1520_v13 = vrot.slane %v1519_v8, 4  ;;  %v1981_v39 = vrot.slane %v1979_v60, 4  ;;  %v1690_v2 = vrot.slane %v1688_v3, 4 }
 0x141   : > { %v4297_v22 = vpop.f32.mrf.mxu1  ;;  %v1988_v4 = vshll.u32 %v5341_v35, 16  ;;  %v1992_v32 = vshrl.u32 %v5341_v35, 16  ;;  %v6448_v60 = vld [vmem:[#allocation2 + $0x3fc] sm:$0xf] }
 0x142   : > { %v4473_v7 = vadd.f32 %v4472_v61, %v4384_v36  ;;  %v4298_v5 = vadd.f32 %v4297_v22, %v7211_v55  ;;  %v1515_v55 = vsel %vm6940_vm3, %v1510_v38, %v1514_v27  ;;  %v1525_v23 = vsel %vm6940_vm3, %v1520_v13, %v1524_v62  ;;  %v5388_v61 = vld [vmem:[%s6793_s9 + $0x18] sm:$0xe]  ;;  %v6447_v22 = vld [vmem:[#allocation2 + $0x3f4] sm:$0xf]  ;;  %v5309_v62 = vld [vmem:[%s6793_s9 + $0x1c] sm:$0xf] }
 0x143   : > { %v4564_v31 = vpop.f32.mrf.mxu0  ;;  %1588 = vst [vmem:[#allocation2 + $0x448] sm:$0xf] %v1515_v55  ;;  %v1691_v36 = vrot.slane %v5246_v47, 5  ;;  %v1994_v38 = vrot.slane %v1992_v32, 4  ;;  %v1985_v55 = vor.u32 %v1984_v41, %v1981_v39  ;;  %v6453_v47 = vld [vmem:[#allocation2 + $0x420] sm:$0xf0]  ;;  %v5971_v41 = vor.u32 %v6448_v60, %v5968_v46 }
 0x144   : > { %4336 = vmatmul.bf16.gmra.mxu1 %v5927_v40  ;;  %4425 = vmatmul.bf16.gmra.mxu2 %v5931_v17  ;;  %v7580_v45 = vadd.f32 %v4561_v56, %v4473_v7  ;;  %v5342_v56 = vld [vmem:[%s6793_s9 + $0x20] sm:$0x1]  ;;  %1589 = vst [vmem:[#allocation2 + $0x46c] sm:$0xf] %v1525_v23  ;;  %v5292_v17 = vrot.slane %v5244_v9, 9  ;;  %v1990_v7 = vrot.slane %v1988_v4, 5 }
 0x145   : > { %4514 = vmatmul.bf16.gmra.mxu3 %v5935_v48  ;;  %v5960_v48 = vld [vmem:[#allocation2 + $0x414] sm:$0xf0]  ;;  %v1692_v35 = vsel %vm6954_vm5, %v1690_v2, %v1691_v36  ;;  %v1998_v13 = vshll.u32 %v5342_v56, 16  ;;  %v5390_v23 = vld [vmem:[%s6793_s9 + $0x20] sm:$0x1] }
 0x146   : > { %4603 = vmatmul.bf16.gmra.mxu0 %v5939_v52  ;;  %v5308_v52 = vld [vmem:[%s6793_s9 + $0x18] sm:$0xf]  ;;  %v1689_v8 = vsel %vm6954_vm5, %v5292_v17, %v1688_v3  ;;  %v5974_v9 = vld [vmem:[#allocation2 + $0x400] sm:$0xf]  ;;  %1831 = vst [vmem:[#allocation2 + $0x38] sm:$0xf] %v1692_v35  ;;  %v5963_v17 = vor.u32 %v6447_v22, %v5960_v48 }
 0x147   : > { %v4386_v33 = vpop.f32.mrf.mxu2  ;;  %1898 = vst [vmem:[#allocation2 + $0x18] sm:$0xf] %v5308_v52  ;;  %v2000_v3 = vrot.slane %v1998_v13, 5  ;;  %v5344_v22 = vld [vmem:[%s6793_s9 + $0x28] sm:$0xf] }
 0x148   : > { %v4387_v19 = vadd.f32 %v4386_v33, %v4298_v5  ;;  %v4475_v15 = vpop.f32.mrf.mxu3  ;;  %v5966_v5 = vld [vmem:[#allocation2 + $0x3f8] sm:$0xf]  ;;  %1830 = vst [vmem:[#allocation2 + $0x14] sm:$0xf] %v1689_v8  ;;  %v5436_v33 = vrot.slane %v5388_v61, 9  ;;  %v5975_v8 = vor.u32 %v6453_v47, %v5974_v9  ;;  %v2012_v13 = vshll.u32 %v5344_v22, 16 }
 0x149   : > { %v4299_v40 = vpop.f32.mrf.mxu1  ;;  %1899 = vst [vmem:[#allocation2 + $0x3c] sm:$0xf] %v5309_v62  ;;  %v5967_v61 = vor.u32 %v6452_v26, %v5966_v5 }
 0x14a   : > { %v4476_v29 = vadd.f32 %v4475_v15, %v4387_v19  ;;  %v4300_v27 = vadd.f32 %v4299_v40, %v7232_v30  ;;  %v5389_v30 = vld [vmem:[%s6793_s9 + $0x1c] sm:$0xf]  ;;  %v1995_v19 = vor.u32 %v1994_v38, %v1990_v7  ;;  %v2527_v15 = vrot.slane %v5390_v23, 5  ;;  %v5343_v38 = vld [vmem:[%s6793_s9 + $0x24] sm:$0xf] }
 0x14b   : > { %v4566_v50 = vpop.f32.mrf.mxu0  ;;  %v2524_v53 = vrot.slane %v5389_v30, 5  ;;  %v1986_v40 = vrot.slane %v1985_v55, 4  ;;  %v2006_v26 = vshll.u32 %v5343_v38, 16  ;;  %v2016_v30 = vshrl.u32 %v5344_v22, 16  ;;  %v5248_v23 = vld [vmem:[%s6793_s9 + $0x1c] sm:$0xf] }
 0x14c   : > { %v7600_v4 = vadd.f32 %v4564_v31, %v4476_v29  ;;  %v1996_v2 = vrot.slane %v1995_v19, 4  ;;  %v2014_v9 = vrot.slane %v2012_v13, 5  ;;  %v6456_v22 = vld [vmem:[#allocation2 + $0x43c] sm:$0xf] }
 0x14d   : > { %v2525_v32 = vsel %vm6954_vm5, %v5436_v33, %v2524_v53  ;;  %v2526_v56 = vrot.slane %v2524_v53, 4  ;;  %v1991_v29 = vsel %vm6940_vm3, %v1986_v40, %v1990_v7  ;;  %v2003_v7 = vshrl.u32 %v5343_v38, 16  ;;  %v5311_v38 = vld [vmem:[%s6793_s9 + $0x28] sm:$0xf] }
 0x14e   : > { %2666 = vst [vmem:[#allocation2 + $0x20] sm:$0xf] %v2525_v32  ;;  %v2001_v35 = vsel %vm6940_vm3, %v1996_v2, %v2000_v3  ;;  %v2008_v46 = vrot.slane %v2006_v26, 5  ;;  %v1695_v33 = vrot.slane %v5248_v23, 5  ;;  %v5247_v3 = vld [vmem:[%s6793_s9 + $0x18] sm:$0xe] }
 0x14f   : > { %v4388_v39 = vpop.f32.mrf.mxu2  ;;  %v2528_v52 = vsel %vm6954_vm5, %v2526_v56, %v2527_v15  ;;  %2394 = vst [vmem:[#allocation2 + $0x1c] sm:$0xf] %v1991_v29  ;;  %v2005_v60 = vrot.slane %v2003_v7, 4  ;;  %v5249_v15 = vld [vmem:[%s6793_s9 + $0x20] sm:$0x1]  ;;  %v2018_v47 = vrot.slane %v2016_v30, 4 }
 0x150   : > { %v4389_v31 = vadd.f32 %v4388_v39, %v4300_v27  ;;  %v4477_v36 = vpop.f32.mrf.mxu3  ;;  %2395 = vst [vmem:[#allocation2 + $0x40] sm:$0xf] %v2001_v35  ;;  %v5293_v39 = vrot.slane %v5247_v3, 9  ;;  %v5391_v29 = vld [vmem:[%s6793_s9 + $0x24] sm:$0xe] }
 0x151   : > { %v4302_v62 = vpop.f32.mrf.mxu1  ;;  %2667 = vst [vmem:[#allocation2 + $0x44] sm:$0xf] %v2528_v52  ;;  %v2009_v53 = vor.u32 %v2008_v46, %v2005_v60  ;;  %v5310_v35 = vld [vmem:[%s6793_s9 + $0x24] sm:$0xf]  ;;  %v5392_v30 = vld [vmem:[%s6793_s9 + $0x28] sm:$0xf] }
 0x152   : > { %v4478_v48 = vadd.f32 %v4477_v36, %v4389_v31  ;;  %v4303_v27 = vadd.f32 %v4302_v62, %v7257_v25  ;;  %v5345_v25 = vld [vmem:[%s6793_s9 + $0x2c] sm:$0x1]  ;;  %v2019_v36 = vor.u32 %v2018_v47, %v2014_v9  ;;  %v6461_v7 = vld [vmem:[#allocation2 + $0x460] sm:$0xf0]  ;;  %v6004_v46 = vld [vmem:[#allocation2 + $0x464] sm:$0xf0] }
 0x153   : > { %v4569_v5 = vpop.f32.mrf.mxu0  ;;  %v2022_v40 = vshll.u32 %v5345_v25, 16  ;;  %v2010_v31 = vrot.slane %v2009_v53, 4  ;;  %v6457_v60 = vld [vmem:[#allocation2 + $0x444] sm:$0xf]  ;;  %v5393_v23 = vld [vmem:[%s6793_s9 + $0x2c] sm:$0x1] }
 0x154   : > { %4341 = vmatmul.bf16.gmra.mxu1 %v5963_v17  ;;  %4430 = vmatmul.bf16.gmra.mxu2 %v5967_v61  ;;  %v7613_v55 = vadd.f32 %v4566_v50, %v4478_v48  ;;  %v1697_v50 = vrot.slane %v1695_v33, 4  ;;  %v1698_v17 = vrot.slane %v5249_v15, 5  ;;  %v5996_v48 = vld [vmem:[#allocation2 + $0x45c] sm:$0xf0]  ;;  %v2020_v13 = vrot.slane %v2019_v36, 4 }
 0x155   : > { %4519 = vmatmul.bf16.gmra.mxu3 %v5971_v41  ;;  %v2024_v61 = vrot.slane %v2022_v40, 5  ;;  %v5437_v25 = vrot.slane %v5391_v29, 9  ;;  %1900 = vst [vmem:[#allocation2 + $0x60] sm:$0xf] %v5310_v35  ;;  %v2534_v15 = vrot.slane %v5393_v23, 5 }
 0x156   : > { %4608 = vmatmul.bf16.gmra.mxu0 %v5975_v8  ;;  %v1696_v8 = vsel %vm6954_vm5, %v5293_v39, %v1695_v33  ;;  %v1699_v26 = vsel %vm6954_vm5, %v1697_v50, %v1698_v17  ;;  %v2531_v33 = vrot.slane %v5392_v30, 5  ;;  %v6462_v47 = vld [vmem:[#allocation2 + $0x468] sm:$0xf0]  ;;  %1901 = vst [vmem:[#allocation2 + $0x84] sm:$0xf] %v5311_v38 }
 0x157   : > { %v4391_v19 = vpop.f32.mrf.mxu2  ;;  %1832 = vst [vmem:[#allocation2 + $0x5c] sm:$0xf] %v1696_v8  ;;  %v2025_v3 = vsel %vm6940_vm3, %v2020_v13, %v2024_v61  ;;  %v5346_v61 = vld [vmem:[%s6793_s9 + $0x30] sm:$0xf]  ;;  %v5347_v29 = vld [vmem:[%s6793_s9 + $0x34] sm:$0xf] }
 0x158   : > { %v4392_v32 = vadd.f32 %v4391_v19, %v4303_v27  ;;  %v4480_v56 = vpop.f32.mrf.mxu3  ;;  %v6002_v27 = vld [vmem:[#allocation2 + $0x440] sm:$0xf]  ;;  %1833 = vst [vmem:[#allocation2 + $0x80] sm:$0xf] %v1699_v26  ;;  %v6010_v19 = vld [vmem:[#allocation2 + $0x448] sm:$0xf]  ;;  %v2532_v40 = vsel %vm6954_vm5, %v5437_v25, %v2531_v33 }
 0x159   : > { %v4304_v2 = vpop.f32.mrf.mxu1  ;;  %v6003_v50 = vor.u32 %v6461_v7, %v6002_v27  ;;  %2397 = vst [vmem:[#allocation2 + $0x88] sm:$0xf] %v2025_v3  ;;  %v6011_v36 = vor.u32 %v6462_v47, %v6010_v19  ;;  %v2030_v38 = vshll.u32 %v5346_v61, 16  ;;  %v5251_v26 = vld [vmem:[%s6793_s9 + $0x28] sm:$0xf]  ;;  %v2040_v13 = vshrl.u32 %v5347_v29, 16 }
 0x15a   : > { %v4481_v52 = vadd.f32 %v4480_v56, %v4392_v32  ;;  %v4305_v62 = vadd.f32 %v4304_v2, %v7282_v6  ;;  %v2015_v6 = vsel %vm6940_vm3, %v2010_v31, %v2014_v9  ;;  %v2533_v32 = vrot.slane %v2531_v33, 4  ;;  %2668 = vst [vmem:[#allocation2 + $0x68] sm:$0xf] %v2532_v40  ;;  %v5252_v23 = vld [vmem:[%s6793_s9 + $0x2c] sm:$0x1] }
 0x15b   : > { %v4571_v41 = vpop.f32.mrf.mxu0  ;;  %2396 = vst [vmem:[#allocation2 + $0x64] sm:$0xf] %v2015_v6  ;;  %v6007_v31 = vor.u32 %v6457_v60, %v6004_v46  ;;  %v2032_v27 = vrot.slane %v2030_v38, 5  ;;  %v1702_v30 = vrot.slane %v5251_v26, 5  ;;  %v5250_v6 = vld [vmem:[%s6793_s9 + $0x24] sm:$0xe] }
 0x15c   : > { %v7631_v53 = vadd.f32 %v4569_v5, %v4481_v52  ;;  %v5999_v5 = vor.u32 %v6456_v22, %v5996_v48  ;;  %v2535_v17 = vsel %vm6954_vm5, %v2533_v32, %v2534_v15  ;;  %v2036_v22 = vshll.u32 %v5347_v29, 16  ;;  %v5472_v29 = vld [vmem:[#allocation2 + $0x34] sm:$0xf0]  ;;  %v5486_v26 = vld [vmem:[#allocation2 + $0x20] sm:$0xf] }
 0x15d   : > { %2669 = vst [vmem:[#allocation2 + $0x8c] sm:$0xf] %v2535_v17  ;;  %v5294_v3 = vrot.slane %v5250_v6, 9  ;;  %v1705_v47 = vrot.slane %v5252_v23, 5  ;;  %v2042_v32 = vrot.slane %v2040_v13, 4 }
 0x15e   : > { %v2038_v25 = vrot.slane %v2036_v22, 5  ;;  %v6329_v23 = vld [vmem:[#allocation2 + $0x40] sm:$0xf0] }
 0x15f   : > { %v4393_v9 = vpop.f32.mrf.mxu2  ;;  %v1703_v17 = vsel %vm6954_vm5, %v5294_v3, %v1702_v30 }
 0x160   : > { %v4394_v56 = vadd.f32 %v4393_v9, %v4305_v62  ;;  %v4482_v39 = vpop.f32.mrf.mxu3  ;;  %v2027_v62 = vshrl.u32 %v5346_v61, 16  ;;  %v6323_v61 = vld [vmem:[#allocation2 + $0x14] sm:$0xf]  ;;  %1834 = vst [vmem:[#allocation2 + $0xa4] sm:$0xf] %v1703_v17  ;;  %v2043_v22 = vor.u32 %v2042_v32, %v2038_v25 }
 0x161   : > { %v4307_v2 = vpop.f32.mrf.mxu1  ;;  %v5350_v17 = vld [vmem:[%s6793_s9 + $0x40] sm:$0xf] }
 0x162   : > { %v4483_v52 = vadd.f32 %v4482_v39, %v4394_v56  ;;  %v4308_v8 = vadd.f32 %v4307_v2, %v7313_v14  ;;  %v2029_v48 = vrot.slane %v2027_v62, 4  ;;  %v5348_v14 = vld [vmem:[%s6793_s9 + $0x38] sm:$0x1]  ;;  %v5395_v56 = vld [vmem:[%s6793_s9 + $0x34] sm:$0xf]  ;;  %v2044_v6 = vrot.slane %v2043_v22, 4 }
 0x163   : > { %v4574_v35 = vpop.f32.mrf.mxu0  ;;  %v2046_v9 = vshll.u32 %v5348_v14, 16  ;;  %v5312_v2 = vld [vmem:[%s6793_s9 + $0x30] sm:$0xf]  ;;  %v2064_v22 = vshrl.u32 %v5350_v17, 16 }
 0x164   : > { %4346 = vmatmul.bf16.gmra.mxu1 %v5999_v5  ;;  %4435 = vmatmul.bf16.gmra.mxu2 %v6003_v50  ;;  %v7642_v7 = vadd.f32 %v4571_v41, %v4483_v52  ;;  %v2033_v60 = vor.u32 %v2032_v27, %v2029_v48  ;;  %v1704_v41 = vrot.slane %v1702_v30, 4  ;;  %v5478_v52 = vld [vmem:[#allocation2 + $0x18] sm:$0xf]  ;;  %v6324_v27 = vld [vmem:[#allocation2 + $0x1c] sm:$0xf]  ;;  %v2538_v30 = vrot.slane %v5395_v56, 5 }
 0x165   : > { %4524 = vmatmul.bf16.gmra.mxu3 %v6007_v31  ;;  %v5313_v31 = vld [vmem:[%s6793_s9 + $0x34] sm:$0xf]  ;;  %v5396_v48 = vld [vmem:[%s6793_s9 + $0x38] sm:$0x1]  ;;  %1902 = vst [vmem:[#allocation2 + $0xa8] sm:$0xf] %v5312_v2  ;;  %v5487_v56 = vor.u32 %v6329_v23, %v5486_v26 }
 0x166   : > { %4613 = vmatmul.bf16.gmra.mxu0 %v6011_v36  ;;  %v2034_v40 = vrot.slane %v2033_v60, 4  ;;  %v5394_v36 = vld [vmem:[%s6793_s9 + $0x30] sm:$0xe]  ;;  %v1706_v62 = vsel %vm6954_vm5, %v1704_v41, %v1705_v47  ;;  %v2541_v14 = vrot.slane %v5396_v48, 5  ;;  %1903 = vst [vmem:[#allocation2 + $0xcc] sm:$0xf] %v5313_v31 }
 0x167   : > { %v4396_v46 = vpop.f32.mrf.mxu2  ;;  %1835 = vst [vmem:[#allocation2 + $0xc8] sm:$0xf] %v1706_v62  ;;  %v5438_v13 = vrot.slane %v5394_v36, 9  ;;  %v5253_v26 = vld [vmem:[%s6793_s9 + $0x30] sm:$0xe] }
 0x168   : > { %v4397_v33 = vadd.f32 %v4396_v46, %v4308_v8  ;;  %v4485_v19 = vpop.f32.mrf.mxu3  ;;  %v6328_v8 = vld [vmem:[#allocation2 + $0x38] sm:$0xf0]  ;;  %v2039_v38 = vsel %vm6940_vm3, %v2034_v40, %v2038_v25  ;;  %v5480_v46 = vld [vmem:[#allocation2 + $0x3c] sm:$0xf0]  ;;  %v2540_v25 = vrot.slane %v2538_v30, 4 }
 0x169   : > { %v4309_v15 = vpop.f32.mrf.mxu1  ;;  %2398 = vst [vmem:[#allocation2 + $0xac] sm:$0xf] %v2039_v38  ;;  %v5479_v47 = vor.u32 %v6328_v8, %v5478_v52  ;;  %v5254_v38 = vld [vmem:[%s6793_s9 + $0x34] sm:$0xf] }
 0x16a   : > { %v4486_v39 = vadd.f32 %v4485_v19, %v4397_v33  ;;  %v4310_v5 = vadd.f32 %v4309_v15, %v7335_v12  ;;  %v2048_v12 = vrot.slane %v2046_v9, 5  ;;  %v2539_v33 = vsel %vm6954_vm5, %v5438_v13, %v2538_v30  ;;  %v5255_v13 = vld [vmem:[%s6793_s9 + $0x38] sm:$0x1] }
 0x16b   : > { %v4576_v50 = vpop.f32.mrf.mxu0  ;;  %v2542_v40 = vsel %vm6954_vm5, %v2540_v25, %v2541_v14  ;;  %v5483_v9 = vor.u32 %v6324_v27, %v5480_v46  ;;  %2670 = vst [vmem:[#allocation2 + $0xb0] sm:$0xf] %v2539_v33  ;;  %v1712_v33 = vrot.slane %v5255_v13, 5  ;;  %v6338_v13 = vld [vmem:[#allocation2 + $0x88] sm:$0xf0] }
 0x16c   : > { %v7660_v60 = vadd.f32 %v4574_v35, %v4486_v39  ;;  %v2049_v3 = vsel %vm6940_vm3, %v2044_v6, %v2048_v12  ;;  %v5475_v35 = vor.u32 %v6323_v61, %v5472_v29  ;;  %v5349_v39 = vld [vmem:[%s6793_s9 + $0x3c] sm:$0xf]  ;;  %2671 = vst [vmem:[#allocation2 + $0xd4] sm:$0xf] %v2542_v40  ;;  %v2060_v29 = vshll.u32 %v5350_v17, 16 }
 0x16d   : > { %2399 = vst [vmem:[#allocation2 + $0xd0] sm:$0xf] %v2049_v3  ;;  %v2054_v61 = vshll.u32 %v5349_v39, 16  ;;  %v1709_v12 = vrot.slane %v5254_v38, 5  ;;  %v5295_v6 = vrot.slane %v5253_v26, 9 }
 0x16e   : > { %v2062_v30 = vrot.slane %v2060_v29, 5  ;;  %v5508_v17 = vld [vmem:[#allocation2 + $0x7c] sm:$0xf0]  ;;  %v5516_v38 = vld [vmem:[#allocation2 + $0x84] sm:$0xf0] }
 0x16f   : > { %v4398_v19 = vpop.f32.mrf.mxu2  ;;  %v2056_v8 = vrot.slane %v2054_v61, 5  ;;  %v1710_v40 = vsel %vm6954_vm5, %v5295_v6, %v1709_v12 }
 0x170   : > { %v4399_v41 = vadd.f32 %v4398_v19, %v4310_v5  ;;  %v4487_v15 = vpop.f32.mrf.mxu3  ;;  %v2051_v5 = vshrl.u32 %v5349_v39, 16  ;;  %v2066_v19 = vrot.slane %v2064_v22, 4  ;;  %v6332_v39 = vld [vmem:[#allocation2 + $0x5c] sm:$0xf]  ;;  %1836 = vst [vmem:[#allocation2 + $0xec] sm:$0xf] %v1710_v40 }
 0x171   : > { %v4312_v32 = vpop.f32.mrf.mxu1  ;;  %v5353_v40 = vld [vmem:[%s6793_s9 + $0x4c] sm:$0xf] }
 0x172   : > { %v4488_v2 = vadd.f32 %v4487_v15, %v4399_v41  ;;  %v4313_v31 = vadd.f32 %v4312_v32, %v7172_v58  ;;  %v2053_v52 = vrot.slane %v2051_v5, 4  ;;  %v5351_v58 = vld [vmem:[%s6793_s9 + $0x44] sm:$0x1]  ;;  %v5398_v41 = vld [vmem:[%s6793_s9 + $0x40] sm:$0xf]  ;;  %v2067_v29 = vor.u32 %v2066_v19, %v2062_v30 }
 0x173   : > { %v4579_v36 = vpop.f32.mrf.mxu0  ;;  %v2070_v3 = vshll.u32 %v5351_v58, 16  ;;  %v5314_v32 = vld [vmem:[%s6793_s9 + $0x3c] sm:$0xf] }
 0x174   : > { %4627 = vmatmul.bf16.vlgmr.msra.gmra.mxu1 %v5475_v35  ;;  %4716 = vmatmul.bf16.vlgmr.msra.gmra.mxu2 %v5479_v47  ;;  %v7671_v62 = vadd.f32 %v4576_v50, %v4488_v2  ;;  %v2057_v48 = vor.u32 %v2056_v8, %v2053_v52  ;;  %v1711_v50 = vrot.slane %v1709_v12, 4  ;;  %v5514_v2 = vld [vmem:[#allocation2 + $0x60] sm:$0xf]  ;;  %v5399_v52 = vld [vmem:[%s6793_s9 + $0x44] sm:$0x1]  ;;  %v2545_v12 = vrot.slane %v5398_v41, 5 }
 0x175   : > { %4805 = vmatmul.bf16.vlgmr.msra.gmra.mxu3 %v5483_v9  ;;  %v5315_v9 = vld [vmem:[%s6793_s9 + $0x40] sm:$0xf]  ;;  %v6333_v8 = vld [vmem:[#allocation2 + $0x64] sm:$0xf]  ;;  %v2548_v58 = vrot.slane %v5399_v52, 5  ;;  %v2068_v26 = vrot.slane %v2067_v29, 4 }
 0x176   : > { %4894 = vmatmul.bf16.vlgmr.msra.gmra.mxu0 %v5487_v56  ;;  %v2058_v25 = vrot.slane %v2057_v48, 4  ;;  %v5397_v56 = vld [vmem:[%s6793_s9 + $0x3c] sm:$0xe]  ;;  %v1713_v5 = vsel %vm6954_vm5, %v1711_v50, %v1712_v33  ;;  %1904 = vst [vmem:[#allocation2 + $0xf0] sm:$0xf] %v5314_v32  ;;  %v2088_v29 = vshrl.u32 %v5353_v40, 16 }
 0x177   : > { %v4401_v27 = vpop.f32.mrf.mxu2  ;;  %1837 = vst [vmem:[#allocation2 + $0x110] sm:$0xf] %v1713_v5  ;;  %v5439_v22 = vrot.slane %v5397_v56, 9 }
 0x178   : > { %v4402_v14 = vadd.f32 %v4401_v27, %v4313_v31  ;;  %v4490_v46 = vpop.f32.mrf.mxu3  ;;  %v6337_v31 = vld [vmem:[#allocation2 + $0x80] sm:$0xf0]  ;;  %v2063_v61 = vsel %vm6940_vm3, %v2058_v25, %v2062_v30  ;;  %v5522_v27 = vld [vmem:[#allocation2 + $0x68] sm:$0xf]  ;;  %1905 = vst [vmem:[#allocation2 + $0x114] sm:$0xf] %v5315_v9 }
 0x179   : > { %v4314_v23 = vpop.f32.mrf.mxu1  ;;  %v2547_v30 = vrot.slane %v2545_v12, 4  ;;  %2400 = vst [vmem:[#allocation2 + $0xf4] sm:$0xf] %v2063_v61  ;;  %v5515_v33 = vor.u32 %v6337_v31, %v5514_v2  ;;  %v5523_v41 = vor.u32 %v6338_v13, %v5522_v27  ;;  %v5257_v61 = vld [vmem:[%s6793_s9 + $0x40] sm:$0xf] }
 0x17a   : > { %v4491_v15 = vadd.f32 %v4490_v46, %v4402_v14  ;;  %v4315_v35 = vadd.f32 %v4314_v23, %v7204_v43  ;;  %v2072_v43 = vrot.slane %v2070_v3, 5  ;;  %v2546_v14 = vsel %vm6954_vm5, %v5439_v22, %v2545_v12  ;;  %v5258_v22 = vld [vmem:[%s6793_s9 + $0x44] sm:$0x1] }
 0x17b   : > { %v4581_v47 = vpop.f32.mrf.mxu0  ;;  %v2549_v25 = vsel %vm6954_vm5, %v2547_v30, %v2548_v58  ;;  %v5519_v3 = vor.u32 %v6333_v8, %v5516_v38  ;;  %2672 = vst [vmem:[#allocation2 + $0xf8] sm:$0xf] %v2546_v14  ;;  %v5256_v38 = vld [vmem:[%s6793_s9 + $0x3c] sm:$0xe]  ;;  %v1719_v14 = vrot.slane %v5258_v22, 5 }
 0x17c   : > { %v7689_v48 = vadd.f32 %v4579_v36, %v4491_v15  ;;  %v2073_v6 = vsel %vm6940_vm3, %v2068_v26, %v2072_v43  ;;  %v5511_v36 = vor.u32 %v6332_v39, %v5508_v17  ;;  %v5352_v15 = vld [vmem:[%s6793_s9 + $0x48] sm:$0xf]  ;;  %2673 = vst [vmem:[#allocation2 + $0x11c] sm:$0xf] %v2549_v25  ;;  %v2084_v17 = vshll.u32 %v5353_v40, 16 }
 0x17d   : > { %2401 = vst [vmem:[#allocation2 + $0x118] sm:$0xf] %v2073_v6  ;;  %v2078_v39 = vshll.u32 %v5352_v15, 16  ;;  %v1716_v43 = vrot.slane %v5257_v61, 5  ;;  %v5296_v26 = vrot.slane %v5256_v38, 9 }
 0x17e   : > { %v2086_v12 = vrot.slane %v2084_v17, 5  ;;  %v5544_v40 = vld [vmem:[#allocation2 + $0xc4] sm:$0xf0]  ;;  %v5552_v61 = vld [vmem:[#allocation2 + $0xcc] sm:$0xf0] }
 0x17f   : > { %v4403_v46 = vpop.f32.mrf.mxu2  ;;  %v2080_v31 = vrot.slane %v2078_v39, 5  ;;  %v1717_v25 = vsel %vm6954_vm5, %v5296_v26, %v1716_v43  ;;  %v6347_v22 = vld [vmem:[#allocation2 + $0xd0] sm:$0xf0] }
 0x180   : > { %v4404_v50 = vadd.f32 %v4403_v46, %v4315_v35  ;;  %v4492_v23 = vpop.f32.mrf.mxu3  ;;  %v2075_v35 = vshrl.u32 %v5352_v15, 16  ;;  %v2090_v46 = vrot.slane %v2088_v29, 4  ;;  %v6341_v15 = vld [vmem:[#allocation2 + $0xa4] sm:$0xf]  ;;  %1838 = vst [vmem:[#allocation2 + $0x134] sm:$0xf] %v1717_v25 }
 0x181   : > { %v4317_v19 = vpop.f32.mrf.mxu1  ;;  %v5356_v25 = vld [vmem:[%s6793_s9 + $0x58] sm:$0xf] }
 0x182   : > { %v4493_v32 = vadd.f32 %v4492_v23, %v4404_v50  ;;  %v4318_v9 = vadd.f32 %v4317_v19, %v7223_v20  ;;  %v2077_v2 = vrot.slane %v2075_v35, 4  ;;  %v5354_v20 = vld [vmem:[%s6793_s9 + $0x50] sm:$0x1]  ;;  %v5401_v50 = vld [vmem:[%s6793_s9 + $0x4c] sm:$0xf]  ;;  %v2091_v17 = vor.u32 %v2090_v46, %v2086_v12 }
 0x183   : > { %v4584_v56 = vpop.f32.mrf.mxu0  ;;  %v2094_v6 = vshll.u32 %v5354_v20, 16  ;;  %v5316_v19 = vld [vmem:[%s6793_s9 + $0x48] sm:$0xf] }
 0x184   : > { %4632 = vmatmul.bf16.gmra.mxu1 %v5511_v36  ;;  %4721 = vmatmul.bf16.gmra.mxu2 %v5515_v33  ;;  %v7700_v5 = vadd.f32 %v4581_v47, %v4493_v32  ;;  %v2081_v52 = vor.u32 %v2080_v31, %v2077_v2  ;;  %v1718_v47 = vrot.slane %v1716_v43, 4  ;;  %v5550_v32 = vld [vmem:[#allocation2 + $0xa8] sm:$0xf]  ;;  %v5402_v2 = vld [vmem:[%s6793_s9 + $0x50] sm:$0x1]  ;;  %v2552_v43 = vrot.slane %v5401_v50, 5 }
 0x185   : > { %4810 = vmatmul.bf16.gmra.mxu3 %v5519_v3  ;;  %v5317_v3 = vld [vmem:[%s6793_s9 + $0x4c] sm:$0xf]  ;;  %v2555_v20 = vrot.slane %v5402_v2, 5  ;;  %1906 = vst [vmem:[#allocation2 + $0x138] sm:$0xf] %v5316_v19  ;;  %v2092_v38 = vrot.slane %v2091_v17, 4 }
 0x186   : > { %4899 = vmatmul.bf16.gmra.mxu0 %v5523_v41  ;;  %v2082_v30 = vrot.slane %v2081_v52, 4  ;;  %v5400_v41 = vld [vmem:[%s6793_s9 + $0x48] sm:$0xe]  ;;  %v1720_v35 = vsel %vm6954_vm5, %v1718_v47, %v1719_v14  ;;  %v6342_v31 = vld [vmem:[#allocation2 + $0xac] sm:$0xf]  ;;  %v2112_v17 = vshrl.u32 %v5356_v25, 16 }
 0x187   : > { %v4406_v8 = vpop.f32.mrf.mxu2  ;;  %1839 = vst [vmem:[#allocation2 + $0x158] sm:$0xf] %v1720_v35  ;;  %v5440_v29 = vrot.slane %v5400_v41, 9 }
 0x188   : > { %v4407_v58 = vadd.f32 %v4406_v8, %v4318_v9  ;;  %v4495_v27 = vpop.f32.mrf.mxu3  ;;  %v6346_v9 = vld [vmem:[#allocation2 + $0xc8] sm:$0xf0]  ;;  %v2087_v39 = vsel %vm6940_vm3, %v2082_v30, %v2086_v12  ;;  %v5558_v8 = vld [vmem:[#allocation2 + $0xb0] sm:$0xf]  ;;  %1907 = vst [vmem:[#allocation2 + $0x15c] sm:$0xf] %v5317_v3 }
 0x189   : > { %v4319_v13 = vpop.f32.mrf.mxu1  ;;  %v2554_v12 = vrot.slane %v2552_v43, 4  ;;  %2402 = vst [vmem:[#allocation2 + $0x13c] sm:$0xf] %v2087_v39  ;;  %v5551_v14 = vor.u32 %v6346_v9, %v5550_v32  ;;  %v5559_v50 = vor.u32 %v6347_v22, %v5558_v8  ;;  %v5260_v39 = vld [vmem:[%s6793_s9 + $0x4c] sm:$0xf] }
 0x18a   : > { %v4496_v23 = vadd.f32 %v4495_v27, %v4407_v58  ;;  %v4320_v36 = vadd.f32 %v4319_v13, %v7249_v10  ;;  %v2096_v10 = vrot.slane %v2094_v6, 5  ;;  %v2553_v58 = vsel %vm6954_vm5, %v5440_v29, %v2552_v43  ;;  %v5261_v29 = vld [vmem:[%s6793_s9 + $0x50] sm:$0x1] }
 0x18b   : > { %v4586_v33 = vpop.f32.mrf.mxu0  ;;  %v2556_v30 = vsel %vm6954_vm5, %v2554_v12, %v2555_v20  ;;  %v5555_v6 = vor.u32 %v6342_v31, %v5552_v61  ;;  %2674 = vst [vmem:[#allocation2 + $0x140] sm:$0xf] %v2553_v58  ;;  %v5259_v61 = vld [vmem:[%s6793_s9 + $0x48] sm:$0xe]  ;;  %v1726_v58 = vrot.slane %v5261_v29, 5 }
 0x18c   : > { %v7718_v52 = vadd.f32 %v4584_v56, %v4496_v23  ;;  %v2097_v26 = vsel %vm6940_vm3, %v2092_v38, %v2096_v10  ;;  %v5547_v56 = vor.u32 %v6341_v15, %v5544_v40  ;;  %v5355_v23 = vld [vmem:[%s6793_s9 + $0x54] sm:$0xf]  ;;  %2675 = vst [vmem:[#allocation2 + $0x164] sm:$0xf] %v2556_v30  ;;  %v2108_v40 = vshll.u32 %v5356_v25, 16 }
 0x18d   : > { %2403 = vst [vmem:[#allocation2 + $0x160] sm:$0xf] %v2097_v26  ;;  %v2102_v15 = vshll.u32 %v5355_v23, 16  ;;  %v1723_v10 = vrot.slane %v5260_v39, 5  ;;  %v5297_v38 = vrot.slane %v5259_v61, 9 }
 0x18e   : > { %v2110_v43 = vrot.slane %v2108_v40, 5  ;;  %v5580_v25 = vld [vmem:[#allocation2 + $0x10c] sm:$0xf0]  ;;  %v5588_v39 = vld [vmem:[#allocation2 + $0x114] sm:$0xf0] }
 0x18f   : > { %v4408_v27 = vpop.f32.mrf.mxu2  ;;  %v2104_v9 = vrot.slane %v2102_v15, 5  ;;  %v1724_v30 = vsel %vm6954_vm5, %v5297_v38, %v1723_v10  ;;  %v6356_v29 = vld [vmem:[#allocation2 + $0x118] sm:$0xf0] }
 0x190   : > { %v4409_v47 = vadd.f32 %v4408_v27, %v4320_v36  ;;  %v4497_v13 = vpop.f32.mrf.mxu3  ;;  %v2099_v36 = vshrl.u32 %v5355_v23, 16  ;;  %v2114_v27 = vrot.slane %v2112_v17, 4  ;;  %v6350_v23 = vld [vmem:[#allocation2 + $0xec] sm:$0xf]  ;;  %1840 = vst [vmem:[#allocation2 + $0x17c] sm:$0xf] %v1724_v30 }
 0x191   : > { %v4322_v46 = vpop.f32.mrf.mxu1  ;;  %v5359_v30 = vld [vmem:[%s6793_s9 + $0x64] sm:$0xf] }
 0x192   : > { %v4498_v19 = vadd.f32 %v4497_v13, %v4409_v47  ;;  %v4323_v3 = vadd.f32 %v4322_v46, %v7273_v54  ;;  %v2101_v32 = vrot.slane %v2099_v36, 4  ;;  %v5357_v54 = vld [vmem:[%s6793_s9 + $0x5c] sm:$0x1]  ;;  %v5404_v47 = vld [vmem:[%s6793_s9 + $0x58] sm:$0xf]  ;;  %v2115_v40 = vor.u32 %v2114_v27, %v2110_v43 }
 0x193   : > { %v4589_v41 = vpop.f32.mrf.mxu0  ;;  %v2118_v26 = vshll.u32 %v5357_v54, 16  ;;  %v5318_v46 = vld [vmem:[%s6793_s9 + $0x54] sm:$0xf] }
 0x194   : > { %4637 = vmatmul.bf16.gmra.mxu1 %v5547_v56  ;;  %4726 = vmatmul.bf16.gmra.mxu2 %v5551_v14  ;;  %v7729_v35 = vadd.f32 %v4586_v33, %v4498_v19  ;;  %v2105_v2 = vor.u32 %v2104_v9, %v2101_v32  ;;  %v1725_v33 = vrot.slane %v1723_v10, 4  ;;  %v5586_v19 = vld [vmem:[#allocation2 + $0xf0] sm:$0xf]  ;;  %v5405_v32 = vld [vmem:[%s6793_s9 + $0x5c] sm:$0x1]  ;;  %v2559_v10 = vrot.slane %v5404_v47, 5 }
 0x195   : > { %4815 = vmatmul.bf16.gmra.mxu3 %v5555_v6  ;;  %v5319_v6 = vld [vmem:[%s6793_s9 + $0x58] sm:$0xf]  ;;  %v6351_v9 = vld [vmem:[#allocation2 + $0xf4] sm:$0xf]  ;;  %v2562_v54 = vrot.slane %v5405_v32, 5  ;;  %v2116_v61 = vrot.slane %v2115_v40, 4 }
 0x196   : > { %4904 = vmatmul.bf16.gmra.mxu0 %v5559_v50  ;;  %v2106_v12 = vrot.slane %v2105_v2, 4  ;;  %v5403_v50 = vld [vmem:[%s6793_s9 + $0x54] sm:$0xe]  ;;  %v1727_v36 = vsel %vm6954_vm5, %v1725_v33, %v1726_v58  ;;  %1908 = vst [vmem:[#allocation2 + $0x180] sm:$0xf] %v5318_v46  ;;  %v2136_v40 = vshrl.u32 %v5359_v30, 16 }
 0x197   : > { %v4411_v31 = vpop.f32.mrf.mxu2  ;;  %1841 = vst [vmem:[#allocation2 + $0x1a0] sm:$0xf] %v1727_v36  ;;  %v5441_v17 = vrot.slane %v5403_v50, 9 }
 0x198   : > { %v4412_v20 = vadd.f32 %v4411_v31, %v4323_v3  ;;  %v4500_v8 = vpop.f32.mrf.mxu3  ;;  %v6355_v3 = vld [vmem:[#allocation2 + $0x110] sm:$0xf0]  ;;  %v2111_v15 = vsel %vm6940_vm3, %v2106_v12, %v2110_v43  ;;  %v5594_v31 = vld [vmem:[#allocation2 + $0xf8] sm:$0xf]  ;;  %1909 = vst [vmem:[#allocation2 + $0x1a4] sm:$0xf] %v5319_v6 }
 0x199   : > { %v4324_v22 = vpop.f32.mrf.mxu1  ;;  %v2561_v43 = vrot.slane %v2559_v10, 4  ;;  %2404 = vst [vmem:[#allocation2 + $0x184] sm:$0xf] %v2111_v15  ;;  %v5587_v58 = vor.u32 %v6355_v3, %v5586_v19  ;;  %v5595_v47 = vor.u32 %v6356_v29, %v5594_v31  ;;  %v5263_v15 = vld [vmem:[%s6793_s9 + $0x58] sm:$0xf] }
 0x19a   : > { %v4501_v13 = vadd.f32 %v4500_v8, %v4412_v20  ;;  %v4325_v56 = vadd.f32 %v4324_v22, %v7306_v57  ;;  %v2120_v57 = vrot.slane %v2118_v26, 5  ;;  %v2560_v20 = vsel %vm6954_vm5, %v5441_v17, %v2559_v10  ;;  %v5264_v17 = vld [vmem:[%s6793_s9 + $0x5c] sm:$0x1] }
 0x19b   : > { %v4591_v14 = vpop.f32.mrf.mxu0  ;;  %v2563_v12 = vsel %vm6954_vm5, %v2561_v43, %v2562_v54  ;;  %v5591_v26 = vor.u32 %v6351_v9, %v5588_v39  ;;  %2676 = vst [vmem:[#allocation2 + $0x188] sm:$0xf] %v2560_v20  ;;  %v5262_v39 = vld [vmem:[%s6793_s9 + $0x54] sm:$0xe]  ;;  %v1733_v20 = vrot.slane %v5264_v17, 5 }
 0x19c   : > { %v7747_v2 = vadd.f32 %v4589_v41, %v4501_v13  ;;  %v2121_v38 = vsel %vm6940_vm3, %v2116_v61, %v2120_v57  ;;  %v5583_v41 = vor.u32 %v6350_v23, %v5580_v25  ;;  %v5358_v13 = vld [vmem:[%s6793_s9 + $0x60] sm:$0xf]  ;;  %2677 = vst [vmem:[#allocation2 + $0x1ac] sm:$0xf] %v2563_v12  ;;  %v2132_v25 = vshll.u32 %v5359_v30, 16 }
 0x19d   : > { %2405 = vst [vmem:[#allocation2 + $0x1a8] sm:$0xf] %v2121_v38  ;;  %v2126_v23 = vshll.u32 %v5358_v13, 16  ;;  %v1730_v57 = vrot.slane %v5263_v15, 5  ;;  %v5298_v61 = vrot.slane %v5262_v39, 9 }
 0x19e   : > { %v2134_v10 = vrot.slane %v2132_v25, 5  ;;  %v5616_v30 = vld [vmem:[#allocation2 + $0x154] sm:$0xf0]  ;;  %v5624_v15 = vld [vmem:[#allocation2 + $0x15c] sm:$0xf0] }
 0x19f   : > { %v4413_v8 = vpop.f32.mrf.mxu2  ;;  %v2128_v3 = vrot.slane %v2126_v23, 5  ;;  %v1731_v12 = vsel %vm6954_vm5, %v5298_v61, %v1730_v57  ;;  %v6365_v17 = vld [vmem:[#allocation2 + $0x160] sm:$0xf0] }
 0x1a0   : > { %v4414_v33 = vadd.f32 %v4413_v8, %v4325_v56  ;;  %v4502_v22 = vpop.f32.mrf.mxu3  ;;  %v2123_v56 = vshrl.u32 %v5358_v13, 16  ;;  %v2138_v8 = vrot.slane %v2136_v40, 4  ;;  %v6359_v13 = vld [vmem:[#allocation2 + $0x134] sm:$0xf]  ;;  %1842 = vst [vmem:[#allocation2 + $0x1c4] sm:$0xf] %v1731_v12 }
 0x1a1   : > { %v4327_v27 = vpop.f32.mrf.mxu1  ;;  %v5362_v12 = vld [vmem:[%s6793_s9 + $0x70] sm:$0xf] }
 0x1a2   : > { %v4503_v46 = vadd.f32 %v4502_v22, %v4414_v33  ;;  %v4328_v6 = vadd.f32 %v4327_v27, %v7327_v51  ;;  %v2125_v19 = vrot.slane %v2123_v56, 4  ;;  %v5360_v51 = vld [vmem:[%s6793_s9 + $0x68] sm:$0x1]  ;;  %v5407_v33 = vld [vmem:[%s6793_s9 + $0x64] sm:$0xf]  ;;  %v2139_v25 = vor.u32 %v2138_v8, %v2134_v10 }
 0x1a3   : > { %v4594_v50 = vpop.f32.mrf.mxu0  ;;  %v2142_v38 = vshll.u32 %v5360_v51, 16  ;;  %v5320_v27 = vld [vmem:[%s6793_s9 + $0x60] sm:$0xf] }
 0x1a4   : > { %4642 = vmatmul.bf16.gmra.mxu1 %v5583_v41  ;;  %4731 = vmatmul.bf16.gmra.mxu2 %v5587_v58  ;;  %v7758_v36 = vadd.f32 %v4591_v14, %v4503_v46  ;;  %v2129_v32 = vor.u32 %v2128_v3, %v2125_v19  ;;  %v1732_v14 = vrot.slane %v1730_v57, 4  ;;  %v5622_v46 = vld [vmem:[#allocation2 + $0x138] sm:$0xf]  ;;  %v5408_v19 = vld [vmem:[%s6793_s9 + $0x68] sm:$0x1]  ;;  %v2566_v57 = vrot.slane %v5407_v33, 5 }
 0x1a5   : > { %4820 = vmatmul.bf16.gmra.mxu3 %v5591_v26  ;;  %v5321_v26 = vld [vmem:[%s6793_s9 + $0x64] sm:$0xf]  ;;  %v6360_v3 = vld [vmem:[#allocation2 + $0x13c] sm:$0xf]  ;;  %v2569_v51 = vrot.slane %v5408_v19, 5  ;;  %v2140_v39 = vrot.slane %v2139_v25, 4 }
 0x1a6   : > { %4909 = vmatmul.bf16.gmra.mxu0 %v5595_v47  ;;  %v2130_v43 = vrot.slane %v2129_v32, 4  ;;  %v5406_v47 = vld [vmem:[%s6793_s9 + $0x60] sm:$0xe]  ;;  %v1734_v56 = vsel %vm6954_vm5, %v1732_v14, %v1733_v20  ;;  %1910 = vst [vmem:[#allocation2 + $0x1c8] sm:$0xf] %v5320_v27  ;;  %v2160_v25 = vshrl.u32 %v5362_v12, 16 }
 0x1a7   : > { %v4416_v9 = vpop.f32.mrf.mxu2  ;;  %1843 = vst [vmem:[#allocation2 + $0x1e8] sm:$0xf] %v1734_v56  ;;  %v5442_v40 = vrot.slane %v5406_v47, 9 }
 0x1a8   : > { %v4417_v54 = vadd.f32 %v4416_v9, %v4328_v6  ;;  %v4505_v31 = vpop.f32.mrf.mxu3  ;;  %v6364_v6 = vld [vmem:[#allocation2 + $0x158] sm:$0xf0]  ;;  %v2135_v23 = vsel %vm6940_vm3, %v2130_v43, %v2134_v10  ;;  %v5630_v9 = vld [vmem:[#allocation2 + $0x140] sm:$0xf]  ;;  %1911 = vst [vmem:[#allocation2 + $0x1ec] sm:$0xf] %v5321_v26 }
 0x1a9   : > { %v4329_v29 = vpop.f32.mrf.mxu1  ;;  %v2568_v10 = vrot.slane %v2566_v57, 4  ;;  %2406 = vst [vmem:[#allocation2 + $0x1cc] sm:$0xf] %v2135_v23  ;;  %v5623_v20 = vor.u32 %v6364_v6, %v5622_v46  ;;  %v5631_v33 = vor.u32 %v6365_v17, %v5630_v9  ;;  %v5266_v23 = vld [vmem:[%s6793_s9 + $0x64] sm:$0xf] }
 0x1aa   : > { %v4506_v22 = vadd.f32 %v4505_v31, %v4417_v54  ;;  %v4330_v41 = vadd.f32 %v4329_v29, %v7353_v11  ;;  %v2144_v11 = vrot.slane %v2142_v38, 5  ;;  %v2567_v54 = vsel %vm6954_vm5, %v5442_v40, %v2566_v57  ;;  %v5267_v40 = vld [vmem:[%s6793_s9 + $0x68] sm:$0x1] }
 0x1ab   : > { %v4596_v58 = vpop.f32.mrf.mxu0  ;;  %v2570_v43 = vsel %vm6954_vm5, %v2568_v10, %v2569_v51  ;;  %v5627_v38 = vor.u32 %v6360_v3, %v5624_v15  ;;  %2678 = vst [vmem:[#allocation2 + $0x1d0] sm:$0xf] %v2567_v54  ;;  %v5265_v15 = vld [vmem:[%s6793_s9 + $0x60] sm:$0xe]  ;;  %v1740_v54 = vrot.slane %v5267_v40, 5 }
 0x1ac   : > { %v7776_v32 = vadd.f32 %v4594_v50, %v4506_v22  ;;  %v2145_v61 = vsel %vm6940_vm3, %v2140_v39, %v2144_v11  ;;  %v5619_v50 = vor.u32 %v6359_v13, %v5616_v30  ;;  %v5361_v22 = vld [vmem:[%s6793_s9 + $0x6c] sm:$0xf]  ;;  %2679 = vst [vmem:[#allocation2 + $0x1f4] sm:$0xf] %v2570_v43  ;;  %v2156_v30 = vshll.u32 %v5362_v12, 16 }
 0x1ad   : > { %2407 = vst [vmem:[#allocation2 + $0x1f0] sm:$0xf] %v2145_v61  ;;  %v2150_v13 = vshll.u32 %v5361_v22, 16  ;;  %v1737_v11 = vrot.slane %v5266_v23, 5  ;;  %v5299_v39 = vrot.slane %v5265_v15, 9 }
 0x1ae   : > { %v2158_v57 = vrot.slane %v2156_v30, 5  ;;  %v5652_v12 = vld [vmem:[#allocation2 + $0x19c] sm:$0xf0]  ;;  %v5660_v23 = vld [vmem:[#allocation2 + $0x1a4] sm:$0xf0] }
 0x1af   : > { %v4418_v31 = vpop.f32.mrf.mxu2  ;;  %v2152_v6 = vrot.slane %v2150_v13, 5  ;;  %v1738_v43 = vsel %vm6954_vm5, %v5299_v39, %v1737_v11  ;;  %v6374_v40 = vld [vmem:[#allocation2 + $0x1a8] sm:$0xf0] }
 0x1b0   : > { %v4419_v14 = vadd.f32 %v4418_v31, %v4330_v41  ;;  %v4507_v29 = vpop.f32.mrf.mxu3  ;;  %v2147_v41 = vshrl.u32 %v5361_v22, 16  ;;  %v2162_v31 = vrot.slane %v2160_v25, 4  ;;  %v6368_v22 = vld [vmem:[#allocation2 + $0x17c] sm:$0xf]  ;;  %1844 = vst [vmem:[#allocation2 + $0x20c] sm:$0xf] %v1738_v43 }
 0x1b1   : > { %v4332_v8 = vpop.f32.mrf.mxu1  ;;  %v5365_v43 = vld [vmem:[%s6793_s9 + $0x7c] sm:$0xf] }
 0x1b2   : > { %v4508_v27 = vadd.f32 %v4507_v29, %v4419_v14  ;;  %v4333_v26 = vadd.f32 %v4332_v8, %v7177_v1  ;;  %v2149_v46 = vrot.slane %v2147_v41, 4  ;;  %v5363_v1 = vld [vmem:[%s6793_s9 + $0x74] sm:$0x1]  ;;  %v5410_v14 = vld [vmem:[%s6793_s9 + $0x70] sm:$0xf]  ;;  %v2163_v30 = vor.u32 %v2162_v31, %v2158_v57 }
 0x1b3   : > { %v4599_v47 = vpop.f32.mrf.mxu0  ;;  %v2166_v61 = vshll.u32 %v5363_v1, 16  ;;  %v5322_v8 = vld [vmem:[%s6793_s9 + $0x6c] sm:$0xf] }
 0x1b4   : > { %4647 = vmatmul.bf16.gmra.mxu1 %v5619_v50  ;;  %4736 = vmatmul.bf16.gmra.mxu2 %v5623_v20  ;;  %v7787_v56 = vadd.f32 %v4596_v58, %v4508_v27  ;;  %v2153_v19 = vor.u32 %v2152_v6, %v2149_v46  ;;  %v1739_v58 = vrot.slane %v1737_v11, 4  ;;  %v5658_v27 = vld [vmem:[#allocation2 + $0x180] sm:$0xf]  ;;  %v5411_v46 = vld [vmem:[%s6793_s9 + $0x74] sm:$0x1]  ;;  %v2573_v11 = vrot.slane %v5410_v14, 5 }
 0x1b5   : > { %4825 = vmatmul.bf16.gmra.mxu3 %v5627_v38  ;;  %v5323_v38 = vld [vmem:[%s6793_s9 + $0x70] sm:$0xf]  ;;  %v6369_v6 = vld [vmem:[#allocation2 + $0x184] sm:$0xf]  ;;  %v2576_v1 = vrot.slane %v5411_v46, 5  ;;  %v2164_v15 = vrot.slane %v2163_v30, 4 }
 0x1b6   : > { %4914 = vmatmul.bf16.gmra.mxu0 %v5631_v33  ;;  %v2154_v10 = vrot.slane %v2153_v19, 4  ;;  %v5409_v33 = vld [vmem:[%s6793_s9 + $0x6c] sm:$0xe]  ;;  %v1741_v41 = vsel %vm6954_vm5, %v1739_v58, %v1740_v54  ;;  %1912 = vst [vmem:[#allocation2 + $0x210] sm:$0xf] %v5322_v8  ;;  %v2184_v30 = vshrl.u32 %v5365_v43, 16 }
 0x1b7   : > { %v4421_v3 = vpop.f32.mrf.mxu2  ;;  %1845 = vst [vmem:[#allocation2 + $0x230] sm:$0xf] %v1741_v41  ;;  %v5443_v25 = vrot.slane %v5409_v33, 9 }
 0x1b8   : > { %v4422_v51 = vadd.f32 %v4421_v3, %v4333_v26  ;;  %v4510_v9 = vpop.f32.mrf.mxu3  ;;  %v6373_v26 = vld [vmem:[#allocation2 + $0x1a0] sm:$0xf0]  ;;  %v2159_v13 = vsel %vm6940_vm3, %v2154_v10, %v2158_v57  ;;  %v5666_v3 = vld [vmem:[#allocation2 + $0x188] sm:$0xf]  ;;  %1913 = vst [vmem:[#allocation2 + $0x234] sm:$0xf] %v5323_v38 }
 0x1b9   : > { %v4334_v17 = vpop.f32.mrf.mxu1  ;;  %v2575_v57 = vrot.slane %v2573_v11, 4  ;;  %2408 = vst [vmem:[#allocation2 + $0x214] sm:$0xf] %v2159_v13  ;;  %v5659_v54 = vor.u32 %v6373_v26, %v5658_v27  ;;  %v5667_v14 = vor.u32 %v6374_v40, %v5666_v3  ;;  %v5269_v13 = vld [vmem:[%s6793_s9 + $0x70] sm:$0xf] }
 0x1ba   : > { %v4511_v29 = vadd.f32 %v4510_v9, %v4422_v51  ;;  %v4335_v50 = vadd.f32 %v4334_v17, %v7207_v49  ;;  %v2168_v49 = vrot.slane %v2166_v61, 5  ;;  %v2574_v51 = vsel %vm6954_vm5, %v5443_v25, %v2573_v11  ;;  %v5270_v25 = vld [vmem:[%s6793_s9 + $0x74] sm:$0x1] }
 0x1bb   : > { %v4601_v20 = vpop.f32.mrf.mxu0  ;;  %v2577_v10 = vsel %vm6954_vm5, %v2575_v57, %v2576_v1  ;;  %v5663_v61 = vor.u32 %v6369_v6, %v5660_v23  ;;  %2680 = vst [vmem:[#allocation2 + $0x218] sm:$0xf] %v2574_v51  ;;  %v5268_v23 = vld [vmem:[%s6793_s9 + $0x6c] sm:$0xe]  ;;  %v1747_v51 = vrot.slane %v5270_v25, 5 }
 0x1bc   : > { %v7805_v19 = vadd.f32 %v4599_v47, %v4511_v29  ;;  %v2169_v39 = vsel %vm6940_vm3, %v2164_v15, %v2168_v49  ;;  %v5655_v47 = vor.u32 %v6368_v22, %v5652_v12  ;;  %v5364_v29 = vld [vmem:[%s6793_s9 + $0x78] sm:$0xf]  ;;  %2681 = vst [vmem:[#allocation2 + $0x23c] sm:$0xf] %v2577_v10  ;;  %v2180_v12 = vshll.u32 %v5365_v43, 16 }
 0x1bd   : > { %2409 = vst [vmem:[#allocation2 + $0x238] sm:$0xf] %v2169_v39  ;;  %v2174_v22 = vshll.u32 %v5364_v29, 16  ;;  %v1744_v49 = vrot.slane %v5269_v13, 5  ;;  %v5300_v15 = vrot.slane %v5268_v23, 9 }
 0x1be   : > { %v2182_v11 = vrot.slane %v2180_v12, 5  ;;  %v5688_v43 = vld [vmem:[#allocation2 + $0x1e4] sm:$0xf0]  ;;  %v5696_v13 = vld [vmem:[#allocation2 + $0x1ec] sm:$0xf0] }
 0x1bf   : > { %v4423_v9 = vpop.f32.mrf.mxu2  ;;  %v2176_v26 = vrot.slane %v2174_v22, 5  ;;  %v1745_v10 = vsel %vm6954_vm5, %v5300_v15, %v1744_v49  ;;  %v6383_v25 = vld [vmem:[#allocation2 + $0x1f0] sm:$0xf0] }
 0x1c0   : > { %v4424_v58 = vadd.f32 %v4423_v9, %v4335_v50  ;;  %v4512_v17 = vpop.f32.mrf.mxu3  ;;  %v2171_v50 = vshrl.u32 %v5364_v29, 16  ;;  %v2186_v9 = vrot.slane %v2184_v30, 4  ;;  %v6377_v29 = vld [vmem:[#allocation2 + $0x1c4] sm:$0xf]  ;;  %1846 = vst [vmem:[#allocation2 + $0x254] sm:$0xf] %v1745_v10 }
 0x1c1   : > { %v4337_v31 = vpop.f32.mrf.mxu1  ;;  %v5368_v10 = vld [vmem:[%s6793_s9 + $0x88] sm:$0xf] }
 0x1c2   : > { %v4513_v8 = vadd.f32 %v4512_v17, %v4424_v58  ;;  %v4338_v38 = vadd.f32 %v4337_v31, %v7227_v24  ;;  %v2173_v27 = vrot.slane %v2171_v50, 4  ;;  %v5366_v24 = vld [vmem:[%s6793_s9 + $0x80] sm:$0x1]  ;;  %v5413_v58 = vld [vmem:[%s6793_s9 + $0x7c] sm:$0xf]  ;;  %v2187_v12 = vor.u32 %v2186_v9, %v2182_v11 }
 0x1c3   : > { %v4604_v33 = vpop.f32.mrf.mxu0  ;;  %v2190_v39 = vshll.u32 %v5366_v24, 16  ;;  %v5324_v31 = vld [vmem:[%s6793_s9 + $0x78] sm:$0xf] }
 0x1c4   : > { %4652 = vmatmul.bf16.gmra.mxu1 %v5655_v47  ;;  %4741 = vmatmul.bf16.gmra.mxu2 %v5659_v54  ;;  %v7816_v41 = vadd.f32 %v4601_v20, %v4513_v8  ;;  %v2177_v46 = vor.u32 %v2176_v26, %v2173_v27  ;;  %v1746_v20 = vrot.slane %v1744_v49, 4  ;;  %v5694_v8 = vld [vmem:[#allocation2 + $0x1c8] sm:$0xf]  ;;  %v5414_v27 = vld [vmem:[%s6793_s9 + $0x80] sm:$0x1]  ;;  %v2580_v49 = vrot.slane %v5413_v58, 5 }
 0x1c5   : > { %4830 = vmatmul.bf16.gmra.mxu3 %v5663_v61  ;;  %v5325_v61 = vld [vmem:[%s6793_s9 + $0x7c] sm:$0xf]  ;;  %v6378_v26 = vld [vmem:[#allocation2 + $0x1cc] sm:$0xf]  ;;  %v2583_v24 = vrot.slane %v5414_v27, 5  ;;  %v2188_v23 = vrot.slane %v2187_v12, 4 }
 0x1c6   : > { %4919 = vmatmul.bf16.gmra.mxu0 %v5667_v14  ;;  %v2178_v57 = vrot.slane %v2177_v46, 4  ;;  %v5412_v14 = vld [vmem:[%s6793_s9 + $0x78] sm:$0xe]  ;;  %v1748_v50 = vsel %vm6954_vm5, %v1746_v20, %v1747_v51  ;;  %1914 = vst [vmem:[#allocation2 + $0x258] sm:$0xf] %v5324_v31  ;;  %v2208_v12 = vshrl.u32 %v5368_v10, 16 }
 0x1c7   : > { %v4426_v6 = vpop.f32.mrf.mxu2  ;;  %1847 = vst [vmem:[#allocation2 + $0x278] sm:$0xf] %v1748_v50  ;;  %v5444_v30 = vrot.slane %v5412_v14, 9 }
 0x1c8   : > { %v4427_v1 = vadd.f32 %v4426_v6, %v4338_v38  ;;  %v4515_v3 = vpop.f32.mrf.mxu3  ;;  %v6382_v38 = vld [vmem:[#allocation2 + $0x1e8] sm:$0xf0]  ;;  %v2183_v22 = vsel %vm6940_vm3, %v2178_v57, %v2182_v11  ;;  %v5702_v6 = vld [vmem:[#allocation2 + $0x1d0] sm:$0xf]  ;;  %1915 = vst [vmem:[#allocation2 + $0x27c] sm:$0xf] %v5325_v61 }
 0x1c9   : > { %v4339_v40 = vpop.f32.mrf.mxu1  ;;  %v2582_v11 = vrot.slane %v2580_v49, 4  ;;  %2410 = vst [vmem:[#allocation2 + $0x25c] sm:$0xf] %v2183_v22  ;;  %v5695_v51 = vor.u32 %v6382_v38, %v5694_v8  ;;  %v5703_v58 = vor.u32 %v6383_v25, %v5702_v6  ;;  %v5272_v22 = vld [vmem:[%s6793_s9 + $0x7c] sm:$0xf] }
 0x1ca   : > { %v4516_v17 = vadd.f32 %v4515_v3, %v4427_v1  ;;  %v4340_v47 = vadd.f32 %v4339_v40, %v7252_v16  ;;  %v2192_v16 = vrot.slane %v2190_v39, 5  ;;  %v2581_v1 = vsel %vm6954_vm5, %v5444_v30, %v2580_v49  ;;  %v5273_v30 = vld [vmem:[%s6793_s9 + $0x80] sm:$0x1] }
 0x1cb   : > { %v4606_v54 = vpop.f32.mrf.mxu0  ;;  %v2584_v57 = vsel %vm6954_vm5, %v2582_v11, %v2583_v24  ;;  %v5699_v39 = vor.u32 %v6378_v26, %v5696_v13  ;;  %2682 = vst [vmem:[#allocation2 + $0x260] sm:$0xf] %v2581_v1  ;;  %v5271_v13 = vld [vmem:[%s6793_s9 + $0x78] sm:$0xe]  ;;  %v1754_v1 = vrot.slane %v5273_v30, 5 }
 0x1cc   : > { %v7834_v46 = vadd.f32 %v4604_v33, %v4516_v17  ;;  %v2193_v15 = vsel %vm6940_vm3, %v2188_v23, %v2192_v16  ;;  %v5691_v33 = vor.u32 %v6377_v29, %v5688_v43  ;;  %v5367_v17 = vld [vmem:[%s6793_s9 + $0x84] sm:$0xf]  ;;  %2683 = vst [vmem:[#allocation2 + $0x284] sm:$0xf] %v2584_v57  ;;  %v2204_v43 = vshll.u32 %v5368_v10, 16 }
 0x1cd   : > { %2411 = vst [vmem:[#allocation2 + $0x280] sm:$0xf] %v2193_v15  ;;  %v2198_v29 = vshll.u32 %v5367_v17, 16  ;;  %v1751_v16 = vrot.slane %v5272_v22, 5  ;;  %v5301_v23 = vrot.slane %v5271_v13, 9 }
 0x1ce   : > { %v2206_v49 = vrot.slane %v2204_v43, 5  ;;  %v6386_v10 = vld [vmem:[#allocation2 + $0x20c] sm:$0xf]  ;;  %v5738_v30 = vld [vmem:[#allocation2 + $0x218] sm:$0xf] }
 0x1cf   : > { %v4428_v3 = vpop.f32.mrf.mxu2  ;;  %v2200_v38 = vrot.slane %v2198_v29, 5  ;;  %v5417_v22 = vld [vmem:[%s6793_s9 + $0x8c] sm:$0x1] }
 0x1d0   : > { %v4429_v20 = vadd.f32 %v4428_v3, %v4340_v47  ;;  %v4517_v40 = vpop.f32.mrf.mxu3  ;;  %v2195_v47 = vshrl.u32 %v5367_v17, 16  ;;  %v2210_v3 = vrot.slane %v2208_v12, 4  ;;  %v5415_v17 = vld [vmem:[%s6793_s9 + $0x84] sm:$0xe]  ;;  %v6387_v12 = vld [vmem:[#allocation2 + $0x214] sm:$0xf] }
 0x1d1   : > { %v4342_v9 = vpop.f32.mrf.mxu1 }
 0x1d2   : > { %v4518_v31 = vadd.f32 %v4517_v40, %v4429_v20  ;;  %v4343_v61 = vadd.f32 %v4342_v9, %v7278_v63  ;;  %v2197_v8 = vrot.slane %v2195_v47, 4  ;;  %v5369_v63 = vld [vmem:[%s6793_s9 + $0x8c] sm:$0x1]  ;;  %v5416_v20 = vld [vmem:[%s6793_s9 + $0x88] sm:$0xf]  ;;  %v1752_v9 = vsel %vm6954_vm5, %v5301_v23, %v1751_v16 }
 0x1d3   : > { %v4609_v14 = vpop.f32.mrf.mxu0  ;;  %v2214_v15 = vshll.u32 %v5369_v63, 16  ;;  %v6391_v47 = vld [vmem:[#allocation2 + $0x230] sm:$0xf0]  ;;  %1848 = vst [vmem:[#allocation2 + $0x29c] sm:$0xf] %v1752_v9 }
 0x1d4   : > { %4657 = vmatmul.bf16.gmra.mxu1 %v5691_v33  ;;  %4746 = vmatmul.bf16.gmra.mxu2 %v5695_v51  ;;  %v7845_v50 = vadd.f32 %v4606_v54, %v4518_v31  ;;  %v2201_v27 = vor.u32 %v2200_v38, %v2197_v8  ;;  %v1753_v54 = vrot.slane %v1751_v16, 4  ;;  %v8143_v33 = vld [vmem:[#allocation6_spill] sm:$0xff]  ;;  %v5724_v31 = vld [vmem:[#allocation2 + $0x22c] sm:$0xf0]  ;;  %v2211_v8 = vor.u32 %v2210_v3, %v2206_v49  ;;  %v5732_v63 = vld [vmem:[#allocation2 + $0x234] sm:$0xf0] }
 0x1d5   : > { %4835 = vmatmul.bf16.gmra.mxu3 %v5699_v39  ;;  %v5326_v39 = vld [vmem:[%s6793_s9 + $0x84] sm:$0xf]  ;;  %v2216_v38 = vrot.slane %v2214_v15, 5  ;;  %v5445_v16 = vrot.slane %v5415_v17, 9  ;;  %v5370_v9 = vld [vmem:[%s6793_s9 + $0x90] sm:$0xf] }
 0x1d6   : > { %4924 = vmatmul.bf16.gmra.mxu0 %v5703_v58  ;;  %v2202_v11 = vrot.slane %v2201_v27, 4  ;;  %v5327_v58 = vld [vmem:[%s6793_s9 + $0x88] sm:$0xf]  ;;  %v1755_v29 = vsel %vm6954_vm5, %v1753_v54, %v1754_v1  ;;  %v2587_v27 = vrot.slane %v5416_v20, 5  ;;  %1916 = vst [vmem:[#allocation2 + $0x2a0] sm:$0xf] %v5326_v39 }
 0x1d7   : > { %v4431_v26 = vpop.f32.mrf.mxu2  ;;  %1849 = vst [vmem:[#allocation2 + $0x2c0] sm:$0xf] %v1755_v29  ;;  %v5371_v39 = vld [vmem:[%s6793_s9 + $0x94] sm:$0xf]  ;;  %v8144_v17 = vld [vmem:[#allocation7_spill] sm:$0xff] }
 0x1d8   : > { %v4432_v24 = vadd.f32 %v4431_v26, %v4343_v61  ;;  %v4520_v6 = vpop.f32.mrf.mxu3  ;;  %v5730_v61 = vld [vmem:[#allocation2 + $0x210] sm:$0xf]  ;;  %v2207_v43 = vsel %vm6940_vm3, %v2202_v11, %v2206_v49  ;;  %v2590_v26 = vrot.slane %v5417_v22, 5  ;;  %1917 = vst [vmem:[#allocation2 + $0x2c4] sm:$0xf] %v5327_v58  ;;  %v2588_v23 = vsel %vm6954_vm5, %v5445_v16, %v2587_v27 }
 0x1d9   : > { %v4344_v25 = vpop.f32.mrf.mxu1  ;;  %v2589_v49 = vrot.slane %v2587_v27, 4  ;;  %2412 = vst [vmem:[#allocation2 + $0x2a4] sm:$0xf] %v2207_v43  ;;  %v5731_v3 = vor.u32 %v6391_v47, %v5730_v61  ;;  %v2232_v22 = vshrl.u32 %v5371_v39, 16 }
 0x1da   : > { %v4521_v40 = vadd.f32 %v4520_v6, %v4432_v24  ;;  %v4345_v51 = vadd.f32 %v4344_v25, %v8143_v33  ;;  %v2212_v24 = vrot.slane %v2211_v8, 4  ;;  %v6392_v6 = vld [vmem:[#allocation2 + $0x238] sm:$0xf0]  ;;  %2684 = vst [vmem:[#allocation2 + $0x2a8] sm:$0xf] %v2588_v23 }
 0x1db   : > { %v4611_v57 = vpop.f32.mrf.mxu0  ;;  %v2591_v15 = vsel %vm6954_vm5, %v2589_v49, %v2590_v26  ;;  %v5739_v33 = vor.u32 %v6392_v6, %v5738_v30  ;;  %v5274_v26 = vld [vmem:[%s6793_s9 + $0x84] sm:$0xe]  ;;  %v5276_v30 = vld [vmem:[%s6793_s9 + $0x8c] sm:$0x1] }
 0x1dc   : > { %v7863_v13 = vadd.f32 %v4609_v14, %v4521_v40  ;;  %v2217_v25 = vsel %vm6940_vm3, %v2212_v24, %v2216_v38  ;;  %v5727_v14 = vor.u32 %v6386_v10, %v5724_v31  ;;  %v5735_v40 = vor.u32 %v6387_v12, %v5732_v63  ;;  %2685 = vst [vmem:[#allocation2 + $0x2cc] sm:$0xf] %v2591_v15  ;;  %v5275_v38 = vld [vmem:[%s6793_s9 + $0x88] sm:$0xf]  ;;  %v5372_v63 = vld [vmem:[%s6793_s9 + $0x98] sm:$0x1] }
 0x1dd   : > { %2413 = vst [vmem:[#allocation2 + $0x2c8] sm:$0xf] %v2217_v25  ;;  %v2222_v10 = vshll.u32 %v5370_v9, 16  ;;  %v2228_v31 = vshll.u32 %v5371_v39, 16  ;;  %v1758_v12 = vrot.slane %v5275_v38, 5  ;;  %v5302_v49 = vrot.slane %v5274_v26, 9 }
 0x1de   : > { %v1761_v25 = vrot.slane %v5276_v30, 5  ;;  %v5328_v39 = vld [vmem:[%s6793_s9 + $0x90] sm:$0xf] }
 0x1df   : > { %v4433_v54 = vpop.f32.mrf.mxu2  ;;  %v2224_v47 = vrot.slane %v2222_v10, 5  ;;  %v2230_v24 = vrot.slane %v2228_v31, 5  ;;  %v5766_v10 = vld [vmem:[#allocation2 + $0x258] sm:$0xf]  ;;  %v6400_v31 = vld [vmem:[#allocation2 + $0x278] sm:$0xf0] }
 0x1e0   : > { %v4434_v1 = vadd.f32 %v4433_v54, %v4345_v51  ;;  %v4522_v11 = vpop.f32.mrf.mxu3  ;;  %v2219_v51 = vshrl.u32 %v5370_v9, 16  ;;  %v1759_v9 = vsel %vm6954_vm5, %v5302_v49, %v1758_v12  ;;  %1918 = vst [vmem:[#allocation2 + $0x2e8] sm:$0xf] %v5328_v39 }
 0x1e1   : > { %v4347_v20 = vpop.f32.mrf.mxu1  ;;  %1850 = vst [vmem:[#allocation2 + $0x2e4] sm:$0xf] %v1759_v9 }
 0x1e2   : > { %v4523_v58 = vadd.f32 %v4522_v11, %v4434_v1  ;;  %v4348_v29 = vadd.f32 %v4347_v20, %v8144_v17  ;;  %v2221_v61 = vrot.slane %v2219_v51, 4  ;;  %v2234_v11 = vrot.slane %v2232_v22, 4  ;;  %v8145_v20 = vld [vmem:[#allocation8_spill] sm:$0xff]  ;;  %v5760_v51 = vld [vmem:[#allocation2 + $0x274] sm:$0xf0] }
 0x1e3   : > { %v4614_v43 = vpop.f32.mrf.mxu0  ;;  %v5418_v17 = vld [vmem:[%s6793_s9 + $0x90] sm:$0xe] }
 0x1e4   : > { %4662 = vmatmul.bf16.gmra.mxu1 %v5727_v14  ;;  %4751 = vmatmul.bf16.gmra.mxu2 %v5731_v3  ;;  %v7874_v8 = vadd.f32 %v4611_v57, %v4523_v58  ;;  %v2225_v16 = vor.u32 %v2224_v47, %v2221_v61  ;;  %v1760_v57 = vrot.slane %v1758_v12, 4  ;;  %v2238_v14 = vshll.u32 %v5372_v63, 16  ;;  %v5419_v3 = vld [vmem:[%s6793_s9 + $0x94] sm:$0xf]  ;;  %v5420_v63 = vld [vmem:[%s6793_s9 + $0x98] sm:$0x1] }
 0x1e5   : > { %4840 = vmatmul.bf16.gmra.mxu3 %v5735_v40  ;;  %v5329_v58 = vld [vmem:[%s6793_s9 + $0x94] sm:$0xf]  ;;  %v2235_v38 = vor.u32 %v2234_v11, %v2230_v24  ;;  %v5446_v12 = vrot.slane %v5418_v17, 9  ;;  %v2594_v26 = vrot.slane %v5419_v3, 5  ;;  %v2597_v30 = vrot.slane %v5420_v63, 5 }
 0x1e6   : > { %4929 = vmatmul.bf16.gmra.mxu0 %v5739_v33  ;;  %v2226_v1 = vrot.slane %v2225_v16, 4  ;;  %v1762_v61 = vsel %vm6954_vm5, %v1760_v57, %v1761_v25  ;;  %v2240_v22 = vrot.slane %v2238_v14, 5  ;;  %v6396_v16 = vld [vmem:[#allocation2 + $0x25c] sm:$0xf]  ;;  %1919 = vst [vmem:[#allocation2 + $0x30c] sm:$0xf] %v5329_v58  ;;  %v5767_v3 = vor.u32 %v6400_v31, %v5766_v10 }
 0x1e7   : > { %v4436_v27 = vpop.f32.mrf.mxu2  ;;  %1851 = vst [vmem:[#allocation2 + $0x308] sm:$0xf] %v1762_v61  ;;  %v2236_v49 = vrot.slane %v2235_v38, 4  ;;  %v2595_v57 = vsel %vm6954_vm5, %v5446_v12, %v2594_v26  ;;  %v5373_v58 = vld [vmem:[%s6793_s9 + $0x9c] sm:$0xf] }
 0x1e8   : > { %v4437_v6 = vadd.f32 %v4436_v27, %v4348_v29  ;;  %v4525_v23 = vpop.f32.mrf.mxu3  ;;  %v6395_v29 = vld [vmem:[#allocation2 + $0x254] sm:$0xf]  ;;  %v2231_v47 = vsel %vm6940_vm3, %v2226_v1, %v2230_v24  ;;  %v5768_v27 = vld [vmem:[#allocation2 + $0x27c] sm:$0xf0]  ;;  %v2596_v24 = vrot.slane %v2594_v26, 4 }
 0x1e9   : > { %v4349_v54 = vpop.f32.mrf.mxu1  ;;  %v2241_v1 = vsel %vm6940_vm3, %v2236_v49, %v2240_v22  ;;  %2414 = vst [vmem:[#allocation2 + $0x2ec] sm:$0xf] %v2231_v47  ;;  %v5771_v9 = vor.u32 %v6396_v16, %v5768_v27  ;;  %v5374_v17 = vld [vmem:[%s6793_s9 + $0xa0] sm:$0xf]  ;;  %v2246_v47 = vshll.u32 %v5373_v58, 16  ;;  %v8147_v16 = vld [vmem:[#allocation9_spill] sm:$0xff] }
 0x1ea   : > { %v4526_v15 = vadd.f32 %v4525_v23, %v4437_v6  ;;  %v4350_v40 = vadd.f32 %v4349_v54, %v8145_v20  ;;  %v5774_v23 = vld [vmem:[#allocation2 + $0x260] sm:$0xf]  ;;  %v6401_v54 = vld [vmem:[#allocation2 + $0x280] sm:$0xf0]  ;;  %2415 = vst [vmem:[#allocation2 + $0x310] sm:$0xf] %v2241_v1 }
 0x1eb   : > { %v4616_v33 = vpop.f32.mrf.mxu0  ;;  %v5775_v39 = vor.u32 %v6401_v54, %v5774_v23  ;;  %2686 = vst [vmem:[#allocation2 + $0x2f0] sm:$0xf] %v2595_v57  ;;  %v2248_v10 = vrot.slane %v2246_v47, 5  ;;  %v5278_v22 = vld [vmem:[%s6793_s9 + $0x94] sm:$0xf]  ;;  %v2256_v63 = vshrl.u32 %v5374_v17, 16 }
 0x1ec   : > { %v7892_v6 = vadd.f32 %v4614_v43, %v4526_v15  ;;  %v5763_v43 = vor.u32 %v6395_v29, %v5760_v51  ;;  %v2598_v15 = vsel %vm6954_vm5, %v2596_v24, %v2597_v30  ;;  %v2252_v29 = vshll.u32 %v5374_v17, 16  ;;  %v5375_v26 = vld [vmem:[%s6793_s9 + $0xa4] sm:$0x1]  ;;  %v5277_v49 = vld [vmem:[%s6793_s9 + $0x90] sm:$0xe] }
 0x1ed   : > { %2687 = vst [vmem:[#allocation2 + $0x314] sm:$0xf] %v2598_v15  ;;  %v1765_v12 = vrot.slane %v5278_v22, 5  ;;  %v5279_v54 = vld [vmem:[%s6793_s9 + $0x98] sm:$0x1]  ;;  %v2262_v15 = vshll.u32 %v5375_v26, 16 }
 0x1ee   : > { %v2254_v57 = vrot.slane %v2252_v29, 5  ;;  %v5330_v17 = vld [vmem:[%s6793_s9 + $0x9c] sm:$0xf]  ;;  %v5796_v29 = vld [vmem:[#allocation2 + $0x2bc] sm:$0xf0] }
 0x1ef   : > { %v4438_v25 = vpop.f32.mrf.mxu2  ;;  %v1767_v1 = vrot.slane %v1765_v12, 4  ;;  %v6404_v47 = vld [vmem:[#allocation2 + $0x29c] sm:$0xf]  ;;  %v5423_v26 = vld [vmem:[%s6793_s9 + $0xa4] sm:$0x1] }
 0x1f0   : > { %v4439_v11 = vadd.f32 %v4438_v25, %v4350_v40  ;;  %v4527_v14 = vpop.f32.mrf.mxu3  ;;  %v2243_v40 = vshrl.u32 %v5373_v58, 16  ;;  %v5303_v25 = vrot.slane %v5277_v49, 9  ;;  %1920 = vst [vmem:[#allocation2 + $0x330] sm:$0xf] %v5330_v17 }
 0x1f1   : > { %v4628_v20 = vpop.f32.mrf.mxu1 }
 0x1f2   : > { %v4528_v61 = vadd.f32 %v4527_v14, %v4439_v11  ;;  %v2245_v51 = vrot.slane %v2243_v40, 4  ;;  %v4629_v27 = vadd.f32 %v4628_v20, %v8147_v16  ;;  %v1768_v14 = vrot.slane %v5279_v54, 5  ;;  %v5422_v20 = vld [vmem:[%s6793_s9 + $0xa0] sm:$0xf]  ;;  %v5421_v40 = vld [vmem:[%s6793_s9 + $0x9c] sm:$0xe] }
 0x1f3   : > { %v4895_v38 = vpop.f32.mrf.mxu0  ;;  %v1766_v58 = vsel %vm6954_vm5, %v5303_v25, %v1765_v12  ;;  %v5804_v12 = vld [vmem:[#allocation2 + $0x2c4] sm:$0xf0]  ;;  %v5447_v49 = vrot.slane %v5421_v40, 9  ;;  %v2601_v54 = vrot.slane %v5422_v20, 5 }
 0x1f4   : > { %4667 = vmatmul.bf16.gmra.mxu1 %v5763_v43  ;;  %4756 = vmatmul.bf16.gmra.mxu2 %v5767_v3  ;;  %v7902_v31 = vadd.f32 %v4616_v33, %v4528_v61  ;;  %v2249_v30 = vor.u32 %v2248_v10, %v2245_v51  ;;  %v2258_v3 = vrot.slane %v2256_v63, 4  ;;  %v5331_v61 = vld [vmem:[%s6793_s9 + $0xa0] sm:$0xf]  ;;  %v6409_v10 = vld [vmem:[#allocation2 + $0x2c0] sm:$0xf0]  ;;  %v1769_v22 = vsel %vm6954_vm5, %v1767_v1, %v1768_v14 }
 0x1f5   : > { %4845 = vmatmul.bf16.gmra.mxu3 %v5771_v9  ;;  %v5802_v51 = vld [vmem:[#allocation2 + $0x2a0] sm:$0xf]  ;;  %1852 = vst [vmem:[#allocation2 + $0x32c] sm:$0xf] %v1766_v58  ;;  %v6410_v14 = vld [vmem:[#allocation2 + $0x2c8] sm:$0xf0] }
 0x1f6   : > { %8146 = vst [vmem:[#allocation6_spill] sm:$0xff] %v7902_v31  ;;  %4934 = vmatmul.bf16.gmra.mxu0 %v5775_v39  ;;  %v2250_v43 = vrot.slane %v2249_v30, 4  ;;  %v2259_v16 = vor.u32 %v2258_v3, %v2254_v57  ;;  %v2602_v3 = vsel %vm6954_vm5, %v5447_v49, %v2601_v54  ;;  %v5376_v40 = vld [vmem:[%s6793_s9 + $0xa8] sm:$0xf] }
 0x1f7   : > { %v4717_v23 = vpop.f32.mrf.mxu2  ;;  %1853 = vst [vmem:[#allocation2 + $0x350] sm:$0xf] %v1769_v22  ;;  %v5377_v22 = vld [vmem:[%s6793_s9 + $0xac] sm:$0xf] }
 0x1f8   : > { %v4718_v24 = vadd.f32 %v4717_v23, %v4629_v27  ;;  %v4806_v33 = vpop.f32.mrf.mxu3  ;;  %v2255_v63 = vsel %vm6940_vm3, %v2250_v43, %v2254_v57  ;;  %v2264_v27 = vrot.slane %v2262_v15, 5  ;;  %v6405_v23 = vld [vmem:[#allocation2 + $0x2a4] sm:$0xf]  ;;  %v2260_v25 = vrot.slane %v2259_v16, 4  ;;  %1921 = vst [vmem:[#allocation2 + $0x354] sm:$0xf] %v5331_v61 }
 0x1f9   : > { %v4630_v11 = vpop.f32.mrf.mxu1  ;;  %v2603_v43 = vrot.slane %v2601_v54, 4  ;;  %2416 = vst [vmem:[#allocation2 + $0x334] sm:$0xf] %v2255_v63  ;;  %v5807_v17 = vor.u32 %v6405_v23, %v5804_v12  ;;  %v8148_v12 = vld [vmem:[#allocation10_spill] sm:$0xff] }
 0x1fa   : > { %v4807_v9 = vadd.f32 %v4806_v33, %v4718_v24  ;;  %v2604_v24 = vrot.slane %v5423_v26, 5  ;;  %v5810_v33 = vld [vmem:[#allocation2 + $0x2a8] sm:$0xf]  ;;  %v4631_v1 = vadd.f32 %v4630_v11, %v7411_v37  ;;  %v5799_v37 = vor.u32 %v6404_v47, %v5796_v29  ;;  %2688 = vst [vmem:[#allocation2 + $0x338] sm:$0xf] %v2602_v3 }
 0x1fb   : > { %v4897_v39 = vpop.f32.mrf.mxu0  ;;  %v5803_v11 = vor.u32 %v6409_v10, %v5802_v51  ;;  %v5811_v61 = vor.u32 %v6410_v14, %v5810_v33  ;;  %v2276_v26 = vshll.u32 %v5377_v22, 16  ;;  %v2280_v47 = vshrl.u32 %v5377_v22, 16  ;;  %v5282_v14 = vld [vmem:[%s6793_s9 + $0xa4] sm:$0x1] }
 0x1fc   : > { %v4896_v30 = vadd.f32 %v4895_v38, %v4807_v9  ;;  %v2265_v38 = vsel %vm6940_vm3, %v2260_v25, %v2264_v27  ;;  %v2605_v9 = vsel %vm6954_vm5, %v2603_v43, %v2604_v24  ;;  %v2267_v27 = vshrl.u32 %v5376_v40, 16  ;;  %v5378_v24 = vld [vmem:[%s6793_s9 + $0xb0] sm:$0x1] }
 0x1fd   : > { %2417 = vst [vmem:[#allocation2 + $0x358] sm:$0xf] %v2265_v38  ;;  %v2278_v43 = vrot.slane %v2276_v26, 5  ;;  %v6413_v26 = vld [vmem:[#allocation2 + $0x2e4] sm:$0xf] }
 0x1fe   : > { %v4975_v31 = vmax.f32 %v4896_v30, 0.0  ;;  %2689 = vst [vmem:[#allocation2 + $0x35c] sm:$0xf] %v2605_v9  ;;  %v2269_v51 = vrot.slane %v2267_v27, 4  ;;  %v5281_v30 = vld [vmem:[%s6793_s9 + $0xa0] sm:$0xf] }
 0x1ff   : > { %v4719_v57 = vpop.f32.mrf.mxu2  ;;  %v1772_v54 = vrot.slane %v5281_v30, 5  ;;  %v5332_v27 = vld [vmem:[%s6793_s9 + $0xa8] sm:$0xf] }
 0x200   : > { %5007 = vst [vmem:[%s7931_s10] sm:$0xff] %v4975_v31  ;;  %v4720_v15 = vadd.f32 %v4719_v57, %v4631_v1  ;;  %v4808_v20 = vpop.f32.mrf.mxu3  ;;  %v2270_v31 = vshll.u32 %v5376_v40, 16  ;;  %v5280_v1 = vld [vmem:[%s6793_s9 + $0x9c] sm:$0xe] }
 0x201   : > { %v4633_v58 = vpop.f32.mrf.mxu1  ;;  %v5304_v3 = vrot.slane %v5280_v1, 9  ;;  %1922 = vst [vmem:[#allocation2 + $0x378] sm:$0xf] %v5332_v27  ;;  %v5380_v27 = vld [vmem:[%s6793_s9 + $0xb8] sm:$0xf] }
 0x202   : > { %v4809_v63 = vadd.f32 %v4808_v20, %v4720_v15  ;;  %v2272_v10 = vrot.slane %v2270_v31, 5  ;;  %v4634_v49 = vadd.f32 %v4633_v58, %v8148_v12  ;;  %v1774_v15 = vrot.slane %v1772_v54, 4  ;;  %v5333_v31 = vld [vmem:[%s6793_s9 + $0xac] sm:$0xf] }
 0x203   : > { %v4900_v16 = vpop.f32.mrf.mxu0  ;;  %v1775_v20 = vrot.slane %v5282_v14, 5  ;;  %v2286_v58 = vshll.u32 %v5378_v24, 16  ;;  %v1773_v22 = vsel %vm6954_vm5, %v5304_v3, %v1772_v54  ;;  %v5840_v24 = vld [vmem:[#allocation2 + $0x30c] sm:$0xf0]  ;;  %v6419_v3 = vld [vmem:[#allocation2 + $0x310] sm:$0xf0] }
 0x204   : > { %v4898_v29 = vadd.f32 %v4897_v39, %v4809_v63  ;;  %4672 = vmatmul.bf16.gmra.mxu1 %v5799_v37  ;;  %4761 = vmatmul.bf16.gmra.mxu2 %v5803_v11  ;;  %v2273_v33 = vor.u32 %v2272_v10, %v2269_v51  ;;  %v2282_v39 = vrot.slane %v2280_v47, 4  ;;  %v5832_v47 = vld [vmem:[#allocation2 + $0x304] sm:$0xf0]  ;;  %v6418_v51 = vld [vmem:[#allocation2 + $0x308] sm:$0xf0] }
 0x205   : > { %4850 = vmatmul.bf16.gmra.mxu3 %v5807_v17  ;;  %v5424_v17 = vld [vmem:[%s6793_s9 + $0xa8] sm:$0xe]  ;;  %v1776_v63 = vsel %vm6954_vm5, %v1774_v15, %v1775_v20  ;;  %1854 = vst [vmem:[#allocation2 + $0x374] sm:$0xf] %v1773_v22  ;;  %v2288_v30 = vrot.slane %v2286_v58, 5  ;;  %v5835_v58 = vor.u32 %v6413_v26, %v5832_v47  ;;  %v2304_v26 = vshrl.u32 %v5380_v27, 16 }
 0x206   : > { %4939 = vmatmul.bf16.gmra.mxu0 %v5811_v61  ;;  %v4976_v23 = vmax.f32 %v4898_v29, 0.0  ;;  %v2274_v11 = vrot.slane %v2273_v33, 4  ;;  %v2283_v9 = vor.u32 %v2282_v39, %v2278_v43  ;;  %v5838_v29 = vld [vmem:[#allocation2 + $0x2e8] sm:$0xf]  ;;  %1855 = vst [vmem:[#allocation2 + $0x398] sm:$0xf] %v1776_v63 }
 0x207   : > { %v4722_v25 = vpop.f32.mrf.mxu2  ;;  %v5426_v33 = vld [vmem:[%s6793_s9 + $0xb0] sm:$0x1]  ;;  %1923 = vst [vmem:[#allocation2 + $0x39c] sm:$0xf] %v5333_v31  ;;  %v5379_v63 = vld [vmem:[%s6793_s9 + $0xb4] sm:$0xf] }
 0x208   : > { %5008 = vst [vmem:[%s7931_s10 + $0x8] sm:$0xff] %v4976_v23  ;;  %v4723_v57 = vadd.f32 %v4722_v25, %v4634_v49  ;;  %v4811_v38 = vpop.f32.mrf.mxu3  ;;  %v2284_v10 = vrot.slane %v2283_v9, 4  ;;  %v5425_v23 = vld [vmem:[%s6793_s9 + $0xac] sm:$0xf]  ;;  %v2279_v54 = vsel %vm6940_vm3, %v2274_v11, %v2278_v43  ;;  %v5448_v25 = vrot.slane %v5424_v17, 9 }
 0x209   : > { %v4635_v37 = vpop.f32.mrf.mxu1  ;;  %v6414_v49 = vld [vmem:[#allocation2 + $0x2ec] sm:$0xf]  ;;  %v2608_v1 = vrot.slane %v5425_v23, 5  ;;  %v5846_v14 = vld [vmem:[#allocation2 + $0x2f0] sm:$0xf]  ;;  %v2611_v39 = vrot.slane %v5426_v33, 5  ;;  %v5839_v17 = vor.u32 %v6418_v51, %v5838_v29 }
 0x20a   : > { %v4812_v61 = vadd.f32 %v4811_v38, %v4723_v57  ;;  %v4636_v38 = vadd.f32 %v4635_v37, %v7450_v28  ;;  %2418 = vst [vmem:[#allocation2 + $0x37c] sm:$0xf] %v2279_v54  ;;  %v5847_v22 = vor.u32 %v6419_v3, %v5846_v14  ;;  %v2294_v23 = vshll.u32 %v5379_v63, 16 }
 0x20b   : > { %v4902_v40 = vpop.f32.mrf.mxu0  ;;  %v2610_v15 = vrot.slane %v2608_v1, 4  ;;  %v2609_v43 = vsel %vm6954_vm5, %v5448_v25, %v2608_v1  ;;  %v5381_v25 = vld [vmem:[%s6793_s9 + $0xbc] sm:$0x1] }
 0x20c   : > { %v4901_v12 = vadd.f32 %v4900_v16, %v4812_v61  ;;  %v2289_v16 = vsel %vm6940_vm3, %v2284_v10, %v2288_v30  ;;  %v5843_v61 = vor.u32 %v6414_v49, %v5840_v24  ;;  %2690 = vst [vmem:[#allocation2 + $0x380] sm:$0xf] %v2609_v43  ;;  %v2291_v30 = vshrl.u32 %v5379_v63, 16  ;;  %v5284_v49 = vld [vmem:[%s6793_s9 + $0xac] sm:$0xf] }
 0x20d   : > { %v2612_v28 = vsel %vm6954_vm5, %v2610_v15, %v2611_v39  ;;  %2419 = vst [vmem:[#allocation2 + $0x3a0] sm:$0xf] %v2289_v16  ;;  %v2296_v51 = vrot.slane %v2294_v23, 5  ;;  %v1779_v33 = vrot.slane %v5284_v49, 5  ;;  %v5283_v39 = vld [vmem:[%s6793_s9 + $0xa8] sm:$0xe] }
 0x20e   : > { %v4977_v57 = vmax.f32 %v4901_v12, 0.0  ;;  %2691 = vst [vmem:[#allocation2 + $0x3a4] sm:$0xf] %v2612_v28  ;;  %v2300_v12 = vshll.u32 %v5380_v27, 16  ;;  %v2293_v29 = vrot.slane %v2291_v30, 4  ;;  %v5305_v15 = vrot.slane %v5283_v39, 9 }
 0x20f   : > { %v4724_v20 = vpop.f32.mrf.mxu2  ;;  %v5334_v63 = vld [vmem:[%s6793_s9 + $0xb4] sm:$0xf]  ;;  %v5335_v27 = vld [vmem:[%s6793_s9 + $0xb8] sm:$0xf]  ;;  %v5868_v30 = vld [vmem:[#allocation2 + $0x34c] sm:$0xf0] }
 0x210   : > { %5009 = vst [vmem:[%s7931_s10 + $0x10] sm:$0xff] %v4977_v57  ;;  %v4725_v11 = vadd.f32 %v4724_v20, %v4636_v38  ;;  %v4813_v9 = vpop.f32.mrf.mxu3  ;;  %v2297_v1 = vor.u32 %v2296_v51, %v2293_v29  ;;  %v5285_v57 = vld [vmem:[%s6793_s9 + $0xb0] sm:$0x1]  ;;  %v2302_v38 = vrot.slane %v2300_v12, 5  ;;  %v1781_v20 = vrot.slane %v1779_v33, 4 }
 0x211   : > { %v4638_v37 = vpop.f32.mrf.mxu1  ;;  %v1782_v43 = vrot.slane %v5285_v57, 5  ;;  %v5874_v23 = vld [vmem:[#allocation2 + $0x330] sm:$0xf]  ;;  %v6427_v12 = vld [vmem:[#allocation2 + $0x350] sm:$0xf0] }
 0x212   : > { %v4814_v31 = vadd.f32 %v4813_v9, %v4725_v11  ;;  %v4639_v54 = vadd.f32 %v4638_v37, %v7484_v42  ;;  %v2298_v9 = vrot.slane %v2297_v1, 4  ;;  %v5428_v29 = vld [vmem:[%s6793_s9 + $0xb8] sm:$0xf]  ;;  %v6423_v49 = vld [vmem:[#allocation2 + $0x334] sm:$0xf] }
 0x213   : > { %v4905_v10 = vpop.f32.mrf.mxu0  ;;  %v2615_v1 = vrot.slane %v5428_v29, 5  ;;  %1924 = vst [vmem:[#allocation2 + $0x3c0] sm:$0xf] %v5334_v63  ;;  %v5287_v29 = vld [vmem:[%s6793_s9 + $0xb8] sm:$0xf] }
 0x214   : > { %v4903_v47 = vadd.f32 %v4902_v40, %v4814_v31  ;;  %4677 = vmatmul.bf16.gmra.mxu1 %v5835_v58  ;;  %4766 = vmatmul.bf16.gmra.mxu2 %v5839_v17  ;;  %v2306_v40 = vrot.slane %v2304_v26, 4  ;;  %v2310_v58 = vshll.u32 %v5381_v25, 16  ;;  %v5427_v17 = vld [vmem:[%s6793_s9 + $0xb4] sm:$0xe]  ;;  %v6422_v31 = vld [vmem:[#allocation2 + $0x32c] sm:$0xf] }
 0x215   : > { %4855 = vmatmul.bf16.gmra.mxu3 %v5843_v61  ;;  %v1780_v61 = vsel %vm6954_vm5, %v5305_v15, %v1779_v33  ;;  %v5429_v33 = vld [vmem:[%s6793_s9 + $0xbc] sm:$0x1]  ;;  %v5449_v25 = vrot.slane %v5427_v17, 9  ;;  %1925 = vst [vmem:[#allocation2 + $0x3e4] sm:$0xf] %v5335_v27 }
 0x216   : > { %4944 = vmatmul.bf16.gmra.mxu0 %v5847_v22  ;;  %v4978_v24 = vmax.f32 %v4903_v47, 0.0  ;;  %v2307_v42 = vor.u32 %v2306_v40, %v2302_v38  ;;  %v1783_v22 = vsel %vm6954_vm5, %v1781_v20, %v1782_v43  ;;  %1856 = vst [vmem:[#allocation2 + $0x3bc] sm:$0xf] %v1780_v61  ;;  %v2312_v47 = vrot.slane %v2310_v58, 5  ;;  %v5383_v61 = vld [vmem:[%s6793_s9 + $0xc4] sm:$0xf] }
 0x217   : > { %v4727_v14 = vpop.f32.mrf.mxu2  ;;  %1857 = vst [vmem:[#allocation2 + $0x3e0] sm:$0xf] %v1783_v22  ;;  %v2618_v39 = vrot.slane %v5429_v33, 5 }
 0x218   : > { %5010 = vst [vmem:[%s7931_s10 + $0x18] sm:$0xff] %v4978_v24  ;;  %v4728_v3 = vadd.f32 %v4727_v14, %v4639_v54  ;;  %v4816_v16 = vpop.f32.mrf.mxu3  ;;  %v2308_v26 = vrot.slane %v2307_v42, 4  ;;  %v5876_v24 = vld [vmem:[#allocation2 + $0x354] sm:$0xf0]  ;;  %v2303_v54 = vsel %vm6940_vm3, %v2298_v9, %v2302_v38  ;;  %v2616_v38 = vsel %vm6954_vm5, %v5449_v25, %v2615_v1 }
 0x219   : > { %v4640_v11 = vpop.f32.mrf.mxu1  ;;  %v5882_v14 = vld [vmem:[#allocation2 + $0x338] sm:$0xf]  ;;  %2420 = vst [vmem:[#allocation2 + $0x3c4] sm:$0xf] %v2303_v54  ;;  %v5871_v9 = vor.u32 %v6422_v31, %v5868_v30  ;;  %v5875_v42 = vor.u32 %v6427_v12, %v5874_v23  ;;  %v5879_v58 = vor.u32 %v6423_v49, %v5876_v24  ;;  %v2328_v31 = vshrl.u32 %v5383_v61, 16 }
 0x21a   : > { %v4817_v28 = vadd.f32 %v4816_v16, %v4728_v3  ;;  %v4641_v40 = vadd.f32 %v4640_v11, %v7501_v21  ;;  %v6428_v3 = vld [vmem:[#allocation2 + $0x358] sm:$0xf0]  ;;  %v2617_v16 = vrot.slane %v2615_v1, 4  ;;  %2692 = vst [vmem:[#allocation2 + $0x3c8] sm:$0xf] %v2616_v38  ;;  %v1786_v24 = vrot.slane %v5287_v29, 5 }
 0x21b   : > { %v4907_v37 = vpop.f32.mrf.mxu0  ;;  %v5883_v17 = vor.u32 %v6428_v3, %v5882_v14  ;;  %v5384_v54 = vld [vmem:[%s6793_s9 + $0xc8] sm:$0x1]  ;;  %v5286_v1 = vld [vmem:[%s6793_s9 + $0xb4] sm:$0xe]  ;;  %v5288_v14 = vld [vmem:[%s6793_s9 + $0xbc] sm:$0x1] }
 0x21c   : > { %v4906_v51 = vadd.f32 %v4905_v10, %v4817_v28  ;;  %v2313_v10 = vsel %vm6940_vm3, %v2308_v26, %v2312_v47  ;;  %v2619_v21 = vsel %vm6954_vm5, %v2617_v16, %v2618_v39  ;;  %v5382_v28 = vld [vmem:[%s6793_s9 + $0xc0] sm:$0xf]  ;;  %v2324_v47 = vshll.u32 %v5383_v61, 16  ;;  %v5904_v61 = vld [vmem:[#allocation2 + $0x394] sm:$0xf0] }
 0x21d   : > { %2421 = vst [vmem:[#allocation2 + $0x3e8] sm:$0xf] %v2313_v10  ;;  %v2315_v27 = vshrl.u32 %v5382_v28, 16  ;;  %v2318_v26 = vshll.u32 %v5382_v28, 16  ;;  %v5306_v3 = vrot.slane %v5286_v1, 9  ;;  %v1788_v10 = vrot.slane %v1786_v24, 4 }
 0x21e   : > { %v4979_v57 = vmax.f32 %v4906_v51, 0.0  ;;  %2693 = vst [vmem:[#allocation2 + $0x3ec] sm:$0xf] %v2619_v21  ;;  %v2326_v39 = vrot.slane %v2324_v47, 5  ;;  %v1789_v16 = vrot.slane %v5288_v14, 5 }
 0x21f   : > { %v4729_v15 = vpop.f32.mrf.mxu2  ;;  %v2317_v23 = vrot.slane %v2315_v27, 4  ;;  %v2320_v12 = vrot.slane %v2318_v26, 5  ;;  %v1787_v21 = vsel %vm6954_vm5, %v5306_v3, %v1786_v24  ;;  %v6431_v28 = vld [vmem:[#allocation2 + $0x374] sm:$0xf]  ;;  %v6436_v27 = vld [vmem:[#allocation2 + $0x398] sm:$0xf0] }
 0x220   : > { %5011 = vst [vmem:[%s7931_s10 + $0x20] sm:$0xff] %v4979_v57  ;;  %v4730_v20 = vadd.f32 %v4729_v15, %v4641_v40  ;;  %v4818_v43 = vpop.f32.mrf.mxu3  ;;  %v6437_v14 = vld [vmem:[#allocation2 + $0x3a0] sm:$0xf0] }
 0x221   : > { %v4643_v11 = vpop.f32.mrf.mxu1  ;;  %v2321_v33 = vor.u32 %v2320_v12, %v2317_v23  ;;  %1858 = vst [vmem:[#allocation2 + $0x404] sm:$0xf] %v1787_v21  ;;  %v6432_v23 = vld [vmem:[#allocation2 + $0x37c] sm:$0xf]  ;;  %v5912_v12 = vld [vmem:[#allocation2 + $0x39c] sm:$0xf0] }
 0x222   : > { %v4819_v22 = vadd.f32 %v4818_v43, %v4730_v20  ;;  %v4644_v49 = vadd.f32 %v4643_v11, %v7525_v34  ;;  %v2334_v20 = vshll.u32 %v5384_v54, 16  ;;  %v5430_v43 = vld [vmem:[%s6793_s9 + $0xc0] sm:$0xe]  ;;  %v1790_v11 = vsel %vm6954_vm5, %v1788_v10, %v1789_v16 }
 0x223   : > { %v4910_v63 = vpop.f32.mrf.mxu0  ;;  %v2322_v38 = vrot.slane %v2321_v33, 4  ;;  %1859 = vst [vmem:[#allocation2 + $0x428] sm:$0xf] %v1790_v11  ;;  %v5918_v54 = vld [vmem:[#allocation2 + $0x380] sm:$0xf]  ;;  %v5907_v10 = vor.u32 %v6431_v28, %v5904_v61 }
 0x224   : > { %v4908_v30 = vadd.f32 %v4907_v37, %v4819_v22  ;;  %4682 = vmatmul.bf16.gmra.mxu1 %v5871_v9  ;;  %4771 = vmatmul.bf16.gmra.mxu2 %v5875_v42  ;;  %v2330_v37 = vrot.slane %v2328_v31, 4  ;;  %v5910_v22 = vld [vmem:[#allocation2 + $0x378] sm:$0xf]  ;;  %v2336_v47 = vrot.slane %v2334_v20, 5  ;;  %v5431_v31 = vld [vmem:[%s6793_s9 + $0xc4] sm:$0xf] }
 0x225   : > { %4860 = vmatmul.bf16.gmra.mxu3 %v5879_v58  ;;  %v5336_v58 = vld [vmem:[%s6793_s9 + $0xc0] sm:$0xf]  ;;  %v2327_v29 = vsel %vm6940_vm3, %v2322_v38, %v2326_v39  ;;  %v2622_v24 = vrot.slane %v5431_v31, 5  ;;  %v5911_v16 = vor.u32 %v6436_v27, %v5910_v22  ;;  %v5915_v38 = vor.u32 %v6432_v23, %v5912_v12  ;;  %v5385_v20 = vld [vmem:[%s6793_s9 + $0xcc] sm:$0xf] }
 0x226   : > { %4949 = vmatmul.bf16.gmra.mxu0 %v5883_v17  ;;  %v4980_v51 = vmax.f32 %v4908_v30, 0.0  ;;  %v2331_v34 = vor.u32 %v2330_v37, %v2326_v39  ;;  %v5337_v17 = vld [vmem:[%s6793_s9 + $0xc4] sm:$0xf]  ;;  %1926 = vst [vmem:[#allocation2 + $0x408] sm:$0xf] %v5336_v58  ;;  %v2339_v11 = vshrl.u32 %v5385_v20, 16 }
 0x227   : > { %v4732_v25 = vpop.f32.mrf.mxu2  ;;  %1927 = vst [vmem:[#allocation2 + $0x42c] sm:$0xf] %v5337_v17  ;;  %v2624_v37 = vrot.slane %v2622_v24, 4  ;;  %v2342_v58 = vshll.u32 %v5385_v20, 16  ;;  %v5387_v23 = vld [vmem:[%s6793_s9 + $0xd4] sm:$0x1] }
 0x228   : > { %5012 = vst [vmem:[%s7931_s10 + $0x28] sm:$0xff] %v4980_v51  ;;  %v4733_v57 = vadd.f32 %v4732_v25, %v4644_v49  ;;  %v4821_v40 = vpop.f32.mrf.mxu3  ;;  %v2332_v26 = vrot.slane %v2331_v34, 4  ;;  %v5432_v51 = vld [vmem:[%s6793_s9 + $0xc8] sm:$0x1]  ;;  %v5450_v49 = vrot.slane %v5430_v43, 9  ;;  %v5919_v34 = vor.u32 %v6437_v14, %v5918_v54 }
 0x229   : > { %v4645_v15 = vpop.f32.mrf.mxu1  ;;  %v2625_v33 = vrot.slane %v5432_v51, 5  ;;  %2422 = vst [vmem:[#allocation2 + $0x40c] sm:$0xf] %v2327_v29  ;;  %v5386_v43 = vld [vmem:[%s6793_s9 + $0xd0] sm:$0xf]  ;;  %v2341_v22 = vrot.slane %v2339_v11, 4 }
 0x22a   : > { %v4822_v9 = vadd.f32 %v4821_v40, %v4733_v57  ;;  %v4646_v1 = vadd.f32 %v4645_v15, %v7536_v18  ;;  %v2623_v39 = vsel %vm6954_vm5, %v5450_v49, %v2622_v24  ;;  %v2348_v17 = vshll.u32 %v5386_v43, 16  ;;  %v5289_v51 = vld [vmem:[%s6793_s9 + $0xc0] sm:$0xe]  ;;  %v5291_v49 = vld [vmem:[%s6793_s9 + $0xc8] sm:$0x1] }
 0x22b   : > { %v4912_v42 = vpop.f32.mrf.mxu0  ;;  %v2626_v18 = vsel %vm6954_vm5, %v2624_v37, %v2625_v33  ;;  %2694 = vst [vmem:[#allocation2 + $0x410] sm:$0xf] %v2623_v39  ;;  %v2352_v28 = vshrl.u32 %v5386_v43, 16  ;;  %v2344_v27 = vrot.slane %v2342_v58, 5  ;;  %v1796_v14 = vrot.slane %v5291_v49, 5 }
 0x22c   : > { %v4911_v30 = vadd.f32 %v4910_v63, %v4822_v9  ;;  %v2337_v63 = vsel %vm6940_vm3, %v2332_v26, %v2336_v47  ;;  %2695 = vst [vmem:[#allocation2 + $0x434] sm:$0xf] %v2626_v18  ;;  %v5290_v26 = vld [vmem:[%s6793_s9 + $0xc4] sm:$0xf]  ;;  %v2350_v24 = vrot.slane %v2348_v17, 5 }
 0x22d   : > { %2423 = vst [vmem:[#allocation2 + $0x430] sm:$0xf] %v2337_v63  ;;  %v2345_v12 = vor.u32 %v2344_v27, %v2341_v22  ;;  %v5433_v39 = vld [vmem:[%s6793_s9 + $0xcc] sm:$0xe]  ;;  %v5946_v20 = vld [vmem:[#allocation2 + $0x3c0] sm:$0xf] }
 0x22e   : > { %v4981_v25 = vmax.f32 %v4911_v30, 0.0  ;;  %v1793_v30 = vrot.slane %v5290_v26, 5  ;;  %v5338_v18 = vld [vmem:[%s6793_s9 + $0xcc] sm:$0xf]  ;;  %v6445_v43 = vld [vmem:[#allocation2 + $0x3e0] sm:$0xf0] }
 0x22f   : > { %v4734_v57 = vpop.f32.mrf.mxu2  ;;  %v2346_v37 = vrot.slane %v2345_v12, 4  ;;  %v5434_v58 = vld [vmem:[%s6793_s9 + $0xd0] sm:$0xf]  ;;  %v5435_v27 = vld [vmem:[%s6793_s9 + $0xd4] sm:$0x1]  ;;  %v5451_v26 = vrot.slane %v5433_v39, 9 }
 0x230   : > { %5013 = vst [vmem:[%s7931_s10 + $0x30] sm:$0xff] %v4981_v25  ;;  %v4735_v40 = vadd.f32 %v4734_v57, %v4646_v1  ;;  %v4823_v3 = vpop.f32.mrf.mxu3  ;;  %v5307_v25 = vrot.slane %v5289_v51, 9  ;;  %v1795_v1 = vrot.slane %v1793_v30, 4  ;;  %v2358_v57 = vshll.u32 %v5387_v23, 16 }
 0x231   : > { %v4648_v15 = vpop.f32.mrf.mxu1  ;;  %v2351_v22 = vsel %vm6940_vm3, %v2346_v37, %v2350_v24  ;;  %1928 = vst [vmem:[#allocation2 + $0x450] sm:$0xf] %v5338_v18 }
 0x232   : > { %v4824_v9 = vadd.f32 %v4823_v3, %v4735_v40  ;;  %v4649_v31 = vadd.f32 %v4648_v15, %v7567_v0  ;;  %v5339_v15 = vld [vmem:[%s6793_s9 + $0xd0] sm:$0xf]  ;;  %v2360_v11 = vrot.slane %v2358_v57, 5  ;;  %2424 = vst [vmem:[#allocation2 + $0x454] sm:$0xf] %v2351_v22  ;;  %s6537_s9 = sshll.u32 %s6692_s15, 8 }
 0x233   : > { %v4915_v21 = vpop.f32.mrf.mxu0  ;;  %1929 = vst [vmem:[#allocation2 + $0x474] sm:$0xf] %v5339_v15  ;;  %s5054_s19 = scalar_lea.hbm %s8131_s3, %s6537_s9  ;;  %s5040_s15 = scalar_lea.sflag [#allocation4], %s175_s7 }
 0x234   : > { %v4913_v61 = vadd.f32 %v4912_v42, %v4824_v9  ;;  %4687 = vmatmul.bf16.gmra.mxu1 %v5907_v10  ;;  %4776 = vmatmul.bf16.gmra.mxu2 %v5911_v16  ;;  %v2354_v42 = vrot.slane %v2352_v28, 4  ;;  %v1794_v10 = vsel %vm6954_vm5, %v5307_v25, %v1793_v30  ;;  %v1797_v16 = vsel %vm6954_vm5, %v1795_v1, %v1796_v14  ;;  %v6441_v28 = vld [vmem:[#allocation2 + $0x3c4] sm:$0xf]  ;;  %s5057_s23 = sshll.u32 %s5054_s19, 4  ;;  %s5058_s23 = int_to_ptr.hbm [resolvable:$true] %s5057_s23 }
 0x235   : > { %4865 = vmatmul.bf16.gmra.mxu3 %v5915_v38  ;;  %v6440_v38 = vld [vmem:[#allocation2 + $0x3bc] sm:$0xf]  ;;  %1860 = vst [vmem:[#allocation2 + $0x44c] sm:$0xf] %v1794_v10  ;;  %v2632_v30 = vrot.slane %v5435_v27, 5  ;;  %v5947_v25 = vor.u32 %v6445_v43, %v5946_v20  ;;  %s6636_s26 = sshra.s32 %s5058_s23, 4  ;;  %s6637_s26 = int_to_ptr.hbm [resolvable:$true] %s6636_s26 }
 0x236   : > { %4954 = vmatmul.bf16.gmra.mxu0 %v5919_v34  ;;  %v4982_v47 = vmax.f32 %v4913_v61, 0.0  ;;  %v2355_v0 = vor.u32 %v2354_v42, %v2350_v24  ;;  %v5940_v34 = vld [vmem:[#allocation2 + $0x3dc] sm:$0xf0]  ;;  %v5948_v61 = vld [vmem:[#allocation2 + $0x3e4] sm:$0xf0]  ;;  %s6638_s27 = scalar_lea.hbm %s6637_s26, 256  ;;  %p6643_p1 = scmp.lt.s32.totalorder %s6637_s26, %s8131_s3 }
 0x237   : > { %v4737_v29 = vpop.f32.mrf.mxu2  ;;  %1861 = vst [vmem:[#allocation2 + $0x470] sm:$0xf] %v1797_v16  ;;  %v5951_v14 = vor.u32 %v6441_v28, %v5948_v61  ;;  %v5976_v20 = vld [vmem:[#allocation2 + $0x424] sm:$0xf0]  ;;  %v5990_v28 = vld [vmem:[#allocation2 + $0x410] sm:$0xf]  ;;  %p6639_p12 = scmp.ne.s32.totalorder %s6637_s26, %s6638_s27  ;;  %p6644_p2 = scmp.lt.s32.totalorder %s6642_s30, %s6638_s27 }
 0x238   : > { %5014 = vst [vmem:[%s7931_s10 + $0x38] sm:$0xff] %v4982_v47  ;;  %v4738_v54 = vadd.f32 %v4737_v29, %v4649_v31  ;;  %v4826_v33 = vpop.f32.mrf.mxu3  ;;  %v2356_v9 = vrot.slane %v2355_v0, 4  ;;  %v2629_v47 = vrot.slane %v5434_v58, 5  ;;  %v5954_v31 = vld [vmem:[#allocation2 + $0x3c8] sm:$0xf] }
 0x239   : > { %v4650_v63 = vpop.f32.mrf.mxu1  ;;  %v6446_v29 = vld [vmem:[#allocation2 + $0x3e8] sm:$0xf0]  ;;  %v5982_v43 = vld [vmem:[#allocation2 + $0x408] sm:$0xf]  ;;  %p6640_p13 = pnand %p6639_p12, %p6764_p4  ;;  %p6645_p3 = por %p6644_p2, %p6643_p1 }
 0x23a   : > { %v4827_v40 = vadd.f32 %v4826_v33, %v4738_v54  ;;  %v4651_v12 = vadd.f32 %v4650_v63, %v7580_v45  ;;  %v2631_v51 = vrot.slane %v2629_v47, 4  ;;  %v2630_v24 = vsel %vm6954_vm5, %v5451_v26, %v2629_v47 }
 0x23b   : > { %v4917_v3 = vpop.f32.mrf.mxu0  ;;  %v5943_v33 = vor.u32 %v6440_v38, %v5940_v34  ;;  %v5955_v63 = vor.u32 %v6446_v29, %v5954_v31  ;;  %2696 = vst [vmem:[#allocation2 + $0x458] sm:$0xf] %v2630_v24  ;;  %v6449_v34 = vld [vmem:[#allocation2 + $0x404] sm:$0xf]  ;;  %p6641_p0 = pneg %p6640_p13 }
 0x23c   : > { %v4916_v17 = vadd.f32 %v4915_v21, %v4827_v40  ;;  %v2361_v21 = vsel %vm6940_vm3, %v2356_v9, %v2360_v11  ;;  %v2633_v1 = vsel %vm6954_vm5, %v2631_v51, %v2632_v30  ;;  %v6450_v9 = vld [vmem:[#allocation2 + $0x40c] sm:$0xf]  ;;  %v5984_v11 = vld [vmem:[#allocation2 + $0x42c] sm:$0xf0]  ;;  %v5979_v26 = vor.u32 %v6449_v34, %v5976_v20 }
 0x23d   : > { %2425 = vst [vmem:[#allocation2 + $0x478] sm:$0xf] %v2361_v21  ;;  %v5987_v30 = vor.u32 %v6450_v9, %v5984_v11  ;;  %p6646_p5 = pnand %p6645_p3, %p6641_p0 }
 0x23e   : > { %v4983_v23 = vmax.f32 %v4916_v17, 0.0  ;;  %2697 = vst [vmem:[#allocation2 + $0x47c] sm:$0xf] %v2633_v1 }
 0x23f   : > { %v4739_v49 = vpop.f32.mrf.mxu2 }
 0x240   : > { %5015 = vst [vmem:[%s7931_s10 + $0x40] sm:$0xff] %v4983_v23  ;;  %v4740_v42 = vadd.f32 %v4739_v49, %v4651_v12  ;;  %v4828_v54 = vpop.f32.mrf.mxu3 }
 0x241   : > { %v4653_v45 = vpop.f32.mrf.mxu1 }
 0x242   : > { %v4829_v44 = vadd.f32 %v4828_v54, %v4740_v42  ;;  %v4654_v39 = vadd.f32 %v4653_v45, %v7600_v4  ;;  %v6455_v4 = vld [vmem:[#allocation2 + $0x430] sm:$0xf0]  ;;  %v6458_v45 = vld [vmem:[#allocation2 + $0x44c] sm:$0xf] }
 0x243   : > { %v4920_v37 = vpop.f32.mrf.mxu0  ;;  %v5991_v23 = vor.u32 %v6455_v4, %v5990_v28 }
 0x244   : > { %v4918_v0 = vadd.f32 %v4917_v3, %v4829_v44  ;;  %4692 = vmatmul.bf16.gmra.mxu1 %v5943_v33  ;;  %4781 = vmatmul.bf16.gmra.mxu2 %v5947_v25  ;;  %v6454_v3 = vld [vmem:[#allocation2 + $0x428] sm:$0xf0]  ;;  %v6463_v44 = vld [vmem:[#allocation2 + $0x470] sm:$0xf0] }
 0x245   : > { %4870 = vmatmul.bf16.gmra.mxu3 %v5951_v14  ;;  %v5983_v47 = vor.u32 %v6454_v3, %v5982_v43  ;;  %v6012_v14 = vld [vmem:[#allocation2 + $0x46c] sm:$0xf0] }
 0x246   : > { %4959 = vmatmul.bf16.gmra.mxu0 %v5955_v63  ;;  %v4984_v57 = vmax.f32 %v4918_v0, 0.0  ;;  %v6018_v63 = vld [vmem:[#allocation2 + $0x450] sm:$0xf]  ;;  %v6020_v0 = vld [vmem:[#allocation2 + $0x474] sm:$0xf0] }
 0x247   : > { %v4742_v40 = vpop.f32.mrf.mxu2 }
 0x248   : > { %5016 = vst [vmem:[%s7931_s10 + $0x48] sm:$0xff] %v4984_v57  ;;  %v4743_v59 = vadd.f32 %v4742_v40, %v4654_v39  ;;  %v4831_v10 = vpop.f32.mrf.mxu3  ;;  %v6026_v40 = vld [vmem:[#allocation2 + $0x458] sm:$0xf] }
 0x249   : > { %v4655_v16 = vpop.f32.mrf.mxu1 }
 0x24a   : > { %v4832_v18 = vadd.f32 %v4831_v10, %v4743_v59  ;;  %v4656_v17 = vadd.f32 %v4655_v16, %v7613_v55 }
 0x24b   : > { %v4922_v15 = vpop.f32.mrf.mxu0 }
 0x24c   : > { %v4921_v38 = vadd.f32 %v4920_v37, %v4832_v18  ;;  %v6459_v37 = vld [vmem:[#allocation2 + $0x454] sm:$0xf]  ;;  %v6015_v18 = vor.u32 %v6458_v45, %v6012_v14 }
 0x24d   : > { %v6023_v34 = vor.u32 %v6459_v37, %v6020_v0 }
 0x24e   : > { %v4985_v58 = vmax.f32 %v4921_v38, 0.0 }
 0x24f   : > { %v4744_v61 = vpop.f32.mrf.mxu2 }
 0x250   : > { %5017 = vst [vmem:[%s7931_s10 + $0x50] sm:$0xff] %v4985_v58  ;;  %v4745_v22 = vadd.f32 %v4744_v61, %v4656_v17  ;;  %v4833_v27 = vpop.f32.mrf.mxu3 }
 0x251   : > { %v4658_v31 = vpop.f32.mrf.mxu1 }
 0x252   : > { %v4834_v12 = vadd.f32 %v4833_v27, %v4745_v22  ;;  %v4659_v51 = vadd.f32 %v4658_v31, %v7631_v53  ;;  %v6464_v53 = vld [vmem:[#allocation2 + $0x478] sm:$0xf0] }
 0x253   : > { %v4925_v29 = vpop.f32.mrf.mxu0  ;;  %v6027_v20 = vor.u32 %v6464_v53, %v6026_v40 }
 0x254   : > { %v4923_v21 = vadd.f32 %v4922_v15, %v4834_v12  ;;  %4697 = vmatmul.bf16.gmra.mxu1 %v5979_v26  ;;  %4786 = vmatmul.bf16.gmra.mxu2 %v5983_v47  ;;  %v6019_v15 = vor.u32 %v6463_v44, %v6018_v63 }
 0x255   : > { %4875 = vmatmul.bf16.gmra.mxu3 %v5987_v30 }
 0x256   : > { %4964 = vmatmul.bf16.gmra.mxu0 %v5991_v23  ;;  %v4986_v55 = vmax.f32 %v4923_v21, 0.0 }
 0x257   : > { %v4747_v49 = vpop.f32.mrf.mxu2 }
 0x258   : > { %5018 = vst [vmem:[%s7931_s10 + $0x58] sm:$0xff] %v4986_v55  ;;  %v4748_v24 = vadd.f32 %v4747_v49, %v4659_v51  ;;  %v4836_v42 = vpop.f32.mrf.mxu3 }
 0x259   : > { %v4660_v54 = vpop.f32.mrf.mxu1 }
 0x25a   : > { %v4837_v33 = vadd.f32 %v4836_v42, %v4748_v24  ;;  %v4661_v39 = vadd.f32 %v4660_v54, %v7642_v7 }
 0x25b   : > { %v4927_v25 = vpop.f32.mrf.mxu0 }
 0x25c   : > { %v4926_v1 = vadd.f32 %v4925_v29, %v4837_v33 }
 0x25e   : > { %v4987_v57 = vmax.f32 %v4926_v1, 0.0 }
 0x25f   : > { %v4749_v59 = vpop.f32.mrf.mxu2 }
 0x260   : > { %5019 = vst [vmem:[%s7931_s10 + $0x60] sm:$0xff] %v4987_v57  ;;  %v4750_v10 = vadd.f32 %v4749_v59, %v4661_v39  ;;  %v4838_v16 = vpop.f32.mrf.mxu3 }
 0x261   : > { %v4663_v38 = vpop.f32.mrf.mxu1 }
 0x262   : > { %v4839_v43 = vadd.f32 %v4838_v16, %v4750_v10  ;;  %v4664_v11 = vadd.f32 %v4663_v38, %v7660_v60 }
 0x263   : > { %v4930_v3 = vpop.f32.mrf.mxu0 }
 0x264   : > { %v4928_v9 = vadd.f32 %v4927_v25, %v4839_v43  ;;  %4702 = vmatmul.bf16.gmra.mxu1 %v6015_v18  ;;  %4791 = vmatmul.bf16.gmra.mxu2 %v6019_v15 }
 0x265   : > { %4880 = vmatmul.bf16.gmra.mxu3 %v6023_v34 }
 0x266   : > { %4969 = vmatmul.bf16.gmra.mxu0 %v6027_v20  ;;  %v4988_v7 = vmax.f32 %v4928_v9, 0.0 }
 0x267   : > { %v4752_v58 = vpop.f32.mrf.mxu2 }
 0x268   : > { %5020 = vst [vmem:[%s7931_s10 + $0x68] sm:$0xff] %v4988_v7  ;;  %v4753_v17 = vadd.f32 %v4752_v58, %v4664_v11  ;;  %v4841_v28 = vpop.f32.mrf.mxu3 }
 0x269   : > { %v4665_v4 = vpop.f32.mrf.mxu1 }
 0x26a   : > { %v4842_v61 = vadd.f32 %v4841_v28, %v4753_v17  ;;  %v4666_v47 = vadd.f32 %v4665_v4, %v7671_v62 }
 0x26b   : > { %v4932_v22 = vpop.f32.mrf.mxu0 }
 0x26c   : > { %v4931_v27 = vadd.f32 %v4930_v3, %v4842_v61 }
 0x26e   : > { %v4989_v26 = vmax.f32 %v4931_v27, 0.0 }
 0x26f   : > { %v4754_v31 = vpop.f32.mrf.mxu2 }
 0x270   : > { %5021 = vst [vmem:[%s7931_s10 + $0x70] sm:$0xff] %v4989_v26  ;;  %v4755_v30 = vadd.f32 %v4754_v31, %v4666_v47  ;;  %v4843_v23 = vpop.f32.mrf.mxu3 }
 0x271   : > { %v4668_v12 = vpop.f32.mrf.mxu1 }
 0x272   : > { %v4844_v29 = vadd.f32 %v4843_v23, %v4755_v30  ;;  %v4669_v51 = vadd.f32 %v4668_v12, %v7689_v48 }
 0x273   : > { %v4935_v60 = vpop.f32.mrf.mxu0 }
 0x274   : > { %v4933_v21 = vadd.f32 %v4932_v22, %v4844_v29 }
 0x276   : > { %v4990_v55 = vmax.f32 %v4933_v21, 0.0 }
 0x277   : > { %v4757_v49 = vpop.f32.mrf.mxu2 }
 0x278   : > { %5022 = vst [vmem:[%s7931_s10 + $0x78] sm:$0xff] %v4990_v55  ;;  %v4758_v24 = vadd.f32 %v4757_v49, %v4669_v51  ;;  %v4846_v42 = vpop.f32.mrf.mxu3 }
 0x279   : > { %v4670_v54 = vpop.f32.mrf.mxu1 }
 0x27a   : > { %v4847_v33 = vadd.f32 %v4846_v42, %v4758_v24  ;;  %v4671_v45 = vadd.f32 %v4670_v54, %v7700_v5 }
 0x27b   : > { %v4937_v62 = vpop.f32.mrf.mxu0 }
 0x27c   : > { %v4936_v25 = vadd.f32 %v4935_v60, %v4847_v33 }
 0x27e   : > { %v4991_v1 = vmax.f32 %v4936_v25, 0.0 }
 0x27f   : > { %v4759_v14 = vpop.f32.mrf.mxu2 }
 0x280   : > { %5023 = vst [vmem:[%s7931_s10 + $0x80] sm:$0xff] %v4991_v1  ;;  %v4760_v63 = vadd.f32 %v4759_v14, %v4671_v45  ;;  %v4848_v44 = vpop.f32.mrf.mxu3 }
 0x281   : > { %v4673_v37 = vpop.f32.mrf.mxu1 }
 0x282   : > { %v4849_v0 = vadd.f32 %v4848_v44, %v4760_v63  ;;  %v4674_v40 = vadd.f32 %v4673_v37, %v7718_v52 }
 0x283   : > { %v4940_v48 = vpop.f32.mrf.mxu0 }
 0x284   : > { %v4938_v57 = vadd.f32 %v4937_v62, %v4849_v0 }
 0x286   : > { %v4992_v39 = vmax.f32 %v4938_v57, 0.0 }
 0x287   : > { %v4762_v53 = vpop.f32.mrf.mxu2 }
 0x288   : > { %5024 = vst [vmem:[%s7931_s10 + $0x88] sm:$0xff] %v4992_v39  ;;  %v4763_v59 = vadd.f32 %v4762_v53, %v4674_v40  ;;  %v4851_v10 = vpop.f32.mrf.mxu3 }
 0x289   : > { %v4675_v16 = vpop.f32.mrf.mxu1 }
 0x28a   : > { %v4852_v18 = vadd.f32 %v4851_v10, %v4763_v59  ;;  %v4676_v34 = vadd.f32 %v4675_v16, %v7729_v35 }
 0x28b   : > { %v4942_v5 = vpop.f32.mrf.mxu0 }
 0x28c   : > { %v4941_v15 = vadd.f32 %v4940_v48, %v4852_v18 }
 0x28e   : > { %v4993_v38 = vmax.f32 %v4941_v15, 0.0 }
 0x28f   : > { %v4764_v20 = vpop.f32.mrf.mxu2 }
 0x290   : > { %5025 = vst [vmem:[%s7931_s10 + $0x90] sm:$0xff] %v4993_v38  ;;  %v4765_v43 = vadd.f32 %v4764_v20, %v4676_v34  ;;  %v4853_v3 = vpop.f32.mrf.mxu3 }
 0x291   : > { %v4678_v9 = vpop.f32.mrf.mxu1 }
 0x292   : > { %v4854_v7 = vadd.f32 %v4853_v3, %v4765_v43  ;;  %v4679_v17 = vadd.f32 %v4678_v9, %v7747_v2 }
 0x293   : > { %v4945_v52 = vpop.f32.mrf.mxu0 }
 0x294   : > { %v4943_v11 = vadd.f32 %v4942_v5, %v4854_v7 }
 0x296   : > { %v4994_v58 = vmax.f32 %v4943_v11, 0.0 }
 0x297   : > { %v4767_v28 = vpop.f32.mrf.mxu2 }
 0x298   : > { %5026 = vst [vmem:[%s7931_s10 + $0x98] sm:$0xff] %v4994_v58  ;;  %v4768_v4 = vadd.f32 %v4767_v28, %v4679_v17  ;;  %v4856_v61 = vpop.f32.mrf.mxu3 }
 0x299   : > { %v4680_v22 = vpop.f32.mrf.mxu1 }
 0x29a   : > { %v4857_v27 = vadd.f32 %v4856_v61, %v4768_v4  ;;  %v4681_v31 = vadd.f32 %v4680_v22, %v7758_v36 }
 0x29b   : > { %v4947_v35 = vpop.f32.mrf.mxu0 }
 0x29c   : > { %v4946_v26 = vadd.f32 %v4945_v52, %v4857_v27 }
 0x29e   : > { %v4995_v47 = vmax.f32 %v4946_v26, 0.0 }
 0x29f   : > { %v4769_v30 = vpop.f32.mrf.mxu2 }
 0x2a0   : > { %5027 = vst [vmem:[%s7931_s10 + $0xa0] sm:$0xff] %v4995_v47  ;;  %v4770_v23 = vadd.f32 %v4769_v30, %v4681_v31  ;;  %v4858_v12 = vpop.f32.mrf.mxu3 }
 0x2a1   : > { %v4683_v29 = vpop.f32.mrf.mxu1 }
 0x2a2   : > { %v4859_v60 = vadd.f32 %v4858_v12, %v4770_v23  ;;  %v4684_v51 = vadd.f32 %v4683_v29, %v7776_v32 }
 0x2a3   : > { %v4950_v2 = vpop.f32.mrf.mxu0 }
 0x2a4   : > { %v4948_v21 = vadd.f32 %v4947_v35, %v4859_v60 }
 0x2a6   : > { %v4996_v55 = vmax.f32 %v4948_v21, 0.0 }
 0x2a7   : > { %v4772_v49 = vpop.f32.mrf.mxu2 }
 0x2a8   : > { %5028 = vst [vmem:[%s7931_s10 + $0xa8] sm:$0xff] %v4996_v55  ;;  %v4773_v24 = vadd.f32 %v4772_v49, %v4684_v51  ;;  %v4861_v42 = vpop.f32.mrf.mxu3 }
 0x2a9   : > { %v4685_v54 = vpop.f32.mrf.mxu1 }
 0x2aa   : > { %v4862_v33 = vadd.f32 %v4861_v42, %v4773_v24  ;;  %v4686_v1 = vadd.f32 %v4685_v54, %v7787_v56 }
 0x2ab   : > { %v4952_v36 = vpop.f32.mrf.mxu0 }
 0x2ac   : > { %v4951_v62 = vadd.f32 %v4950_v2, %v4862_v33 }
 0x2ae   : > { %v4997_v25 = vmax.f32 %v4951_v62, 0.0 }
 0x2af   : > { %v4774_v45 = vpop.f32.mrf.mxu2 }
 0x2b0   : > { %5029 = vst [vmem:[%s7931_s10 + $0xb0] sm:$0xff] %v4997_v25  ;;  %v4775_v14 = vadd.f32 %v4774_v45, %v4686_v1  ;;  %v4863_v63 = vpop.f32.mrf.mxu3 }
 0x2b1   : > { %v4688_v44 = vpop.f32.mrf.mxu1 }
 0x2b2   : > { %v4864_v37 = vadd.f32 %v4863_v63, %v4775_v14  ;;  %v4689_v57 = vadd.f32 %v4688_v44, %v7805_v19 }
 0x2b3   : > { %v4955_v32 = vpop.f32.mrf.mxu0 }
 0x2b4   : > { %v4953_v0 = vadd.f32 %v4952_v36, %v4864_v37 }
 0x2b6   : > { %v4998_v48 = vmax.f32 %v4953_v0, 0.0 }
 0x2b7   : > { %v4777_v39 = vpop.f32.mrf.mxu2 }
 0x2b8   : > { %5030 = vst [vmem:[%s7931_s10 + $0xb8] sm:$0xff] %v4998_v48  ;;  %v4778_v40 = vadd.f32 %v4777_v39, %v4689_v57  ;;  %v4866_v53 = vpop.f32.mrf.mxu3  ;;  %v8149_v48 = vld [vmem:[#allocation6_spill] sm:$0xff] }
 0x2b9   : > { %v4690_v59 = vpop.f32.mrf.mxu1 }
 0x2ba   : > { %v4867_v10 = vadd.f32 %v4866_v53, %v4778_v40  ;;  %v4691_v5 = vadd.f32 %v4690_v59, %v7816_v41 }
 0x2bb   : > { %v4957_v56 = vpop.f32.mrf.mxu0 }
 0x2bc   : > { %v4956_v16 = vadd.f32 %v4955_v32, %v4867_v10 }
 0x2be   : > { %v4999_v18 = vmax.f32 %v4956_v16, 0.0 }
 0x2bf   : > { %v4779_v15 = vpop.f32.mrf.mxu2 }
 0x2c0   : > { %5031 = vst [vmem:[%s7931_s10 + $0xc0] sm:$0xff] %v4999_v18  ;;  %v4780_v38 = vadd.f32 %v4779_v15, %v4691_v5  ;;  %v4868_v34 = vpop.f32.mrf.mxu3 }
 0x2c1   : > { %v4693_v20 = vpop.f32.mrf.mxu1 }
 0x2c2   : > { %v4869_v43 = vadd.f32 %v4868_v34, %v4780_v38  ;;  %v4694_v7 = vadd.f32 %v4693_v20, %v7834_v46 }
 0x2c3   : > { %v4960_v19 = vpop.f32.mrf.mxu0 }
 0x2c4   : > { %v4958_v3 = vadd.f32 %v4957_v56, %v4869_v43 }
 0x2c6   : > { %v5000_v9 = vmax.f32 %v4958_v3, 0.0 }
 0x2c7   : > { %v4782_v52 = vpop.f32.mrf.mxu2 }
 0x2c8   : > { %5032 = vst [vmem:[%s7931_s10 + $0xc8] sm:$0xff] %v5000_v9  ;;  %v4783_v11 = vadd.f32 %v4782_v52, %v4694_v7  ;;  %v4871_v58 = vpop.f32.mrf.mxu3 }
 0x2c9   : > { %v4695_v17 = vpop.f32.mrf.mxu1 }
 0x2ca   : > { %v4872_v28 = vadd.f32 %v4871_v58, %v4783_v11  ;;  %v4696_v22 = vadd.f32 %v4695_v17, %v7845_v50 }
 0x2cb   : > { %v4962_v41 = vpop.f32.mrf.mxu0 }
 0x2cc   : > { %v4961_v4 = vadd.f32 %v4960_v19, %v4872_v28 }
 0x2ce   : > { %v5001_v61 = vmax.f32 %v4961_v4, 0.0 }
 0x2cf   : > { %v4784_v27 = vpop.f32.mrf.mxu2 }
 0x2d0   : > { %5033 = vst [vmem:[%s7931_s10 + $0xd0] sm:$0xff] %v5001_v61  ;;  %v4785_v35 = vadd.f32 %v4784_v27, %v4696_v22  ;;  %v4873_v26 = vpop.f32.mrf.mxu3 }
 0x2d1   : > { %v4698_v47 = vpop.f32.mrf.mxu1 }
 0x2d2   : > { %v4874_v31 = vadd.f32 %v4873_v26, %v4785_v35  ;;  %v4699_v12 = vadd.f32 %v4698_v47, %v7863_v13 }
 0x2d3   : > { %v4965_v30 = vpop.f32.mrf.mxu0 }
 0x2d4   : > { %v4963_v46 = vadd.f32 %v4962_v41, %v4874_v31 }
 0x2d6   : > { %v5002_v23 = vmax.f32 %v4963_v46, 0.0 }
 0x2d7   : > { %v4787_v29 = vpop.f32.mrf.mxu2 }
 0x2d8   : > { %5034 = vst [vmem:[%s7931_s10 + $0xd8] sm:$0xff] %v5002_v23  ;;  %v4788_v60 = vadd.f32 %v4787_v29, %v4699_v12  ;;  %v4876_v2 = vpop.f32.mrf.mxu3 }
 0x2d9   : > { %v4700_v21 = vpop.f32.mrf.mxu1 }
 0x2da   : > { %v4877_v55 = vadd.f32 %v4876_v2, %v4788_v60  ;;  %v4701_v49 = vadd.f32 %v4700_v21, %v7874_v8 }
 0x2db   : > { %v4967_v24 = vpop.f32.mrf.mxu0 }
 0x2dc   : > { %v4966_v50 = vadd.f32 %v4965_v30, %v4877_v55 }
 0x2de   : > { %v5003_v51 = vmax.f32 %v4966_v50, 0.0 }
 0x2df   : > { %v4789_v42 = vpop.f32.mrf.mxu2 }
 0x2e0   : > { %5035 = vst [vmem:[%s7931_s10 + $0xe0] sm:$0xff] %v5003_v51  ;;  %v4790_v54 = vadd.f32 %v4789_v42, %v4701_v49  ;;  %v4878_v33 = vpop.f32.mrf.mxu3 }
 0x2e1   : > { %v4703_v36 = vpop.f32.mrf.mxu1 }
 0x2e2   : > { %v4879_v62 = vadd.f32 %v4878_v33, %v4790_v54  ;;  %v4704_v1 = vadd.f32 %v4703_v36, %v7892_v6 }
 0x2e3   : > { %v4970_v44 = vpop.f32.mrf.mxu0 }
 0x2e4   : > { %v4968_v13 = vadd.f32 %v4967_v24, %v4879_v62 }
 0x2e6   : > { %v5004_v25 = vmax.f32 %v4968_v13, 0.0 }
 0x2e7   : > { %v4792_v45 = vpop.f32.mrf.mxu2 }
 0x2e8   : > { %5036 = vst [vmem:[%s7931_s10 + $0xe8] sm:$0xff] %v5004_v25  ;;  %v4793_v14 = vadd.f32 %v4792_v45, %v4704_v1  ;;  %v4881_v63 = vpop.f32.mrf.mxu3 }
 0x2e9   : > { %v4705_v37 = vpop.f32.mrf.mxu1 }
 0x2ea   : > { %v4882_v8 = vadd.f32 %v4881_v63, %v4793_v14  ;;  %v4706_v57 = vadd.f32 %v4705_v37, %v8149_v48 }
 0x2eb   : > { %v4972_v59 = vpop.f32.mrf.mxu0 }
 0x2ec   : > { %v4971_v32 = vadd.f32 %v4970_v44, %v4882_v8 }
 0x2ee   : > { %v5005_v0 = vmax.f32 %v4971_v32, 0.0 }
 0x2ef   : > { %v4794_v39 = vpop.f32.mrf.mxu2 }
 0x2f0   : > { %5037 = vst [vmem:[%s7931_s10 + $0xf0] sm:$0xff] %v5005_v0  ;;  %v4795_v6 = vadd.f32 %v4794_v39, %v4706_v57  ;;  %v4883_v40 = vpop.f32.mrf.mxu3 }
 0x2f2   : > { %v4884_v53 = vadd.f32 %v4883_v40, %v4795_v6 }
 0x2f4   : > { %v4973_v10 = vadd.f32 %v4972_v59, %v4884_v53 }
 0x2f6   : > { %v5006_v56 = vmax.f32 %v4973_v10, 0.0 }
 0x2f8   : > { %5038 = vst [vmem:[%s7931_s10 + $0xf8] sm:$0xff] %v5006_v56 }
 0x2f9   : > { %6649 = shalt.err (!%p6646_p5)
}
 0x2fa   : > { %s6702_s6 = smov 128   ;;  %s6703_s7 = smov 8  }
 0x2fb   : > { %6563 = dma.vmem_to_hbm [thread:$0]  (%p6764_p4), %s5056_s21, 4096, %s5058_s23, %s5040_s15, %s6702_s6, %s6702_s6, %s6703_s7  }
 0x2fc PF: > { %p6569_p6 = scmp.ge.s32.totalorder %s6700_s17, 2  ;;  %s5072_s8 = sand.u32 1, %s6680_s12  }
 0x2fd   : > { %s5073_s10 = scalar_lea.sflag [#allocation4], %s5072_s8 }
 0x2fe   : > { %p6566_p7 = pnand %p6569_p6, %p6771_p8 }
 0x300   : > { %p6567_p9 = pneg %p6566_p7 }
 0x302   : > { %6675 = dma.done.wait (%p6567_p9), %s5073_s10, 4096  }
 0x303   : > { %6677 = vsyncadd (%p6567_p9), %s5073_s10, 4294963200  ;;  %s16_s17 = sadd.s32 1, %s6700_s17   ;;  %s8150_s12 = smov %s6684_s13 }
 0x304   : > { %p13_p10 = scmp.ge.s32.totalorder %s16_s17, 4   ;;  %s8151_s13 = smov %s6688_s14 }
 0x305   : > { %s8152_s14 = smov %s6777_s25  ;;  %s8153_s15 = smov %s6696_s16 }
 0x306   : > { %s8154_s16 = smov %s8156_s20  ;;  %15 = sbr.rel (!%p13_p10) target bundleno = 4 (0x4), region = 70 }
 0x30b   :  { %5079 = vsyncpa [#allocation4], 1 }
 0x30c   :  { %5081 = vsyncpa [#allocation4 + $0x1], 1 }

</bundles_post_ra>
